<compile_context>
chip_gen: v7x
topology: tpu7x:2x2x1
jax: 0.10.0
libtpu: 0.0.40
codegen_flags: <defaults>
</compile_context>

<pallas_src>
import functools

import jax
import jax.numpy as jnp
from jax.experimental import pallas as pl
from jax.experimental.pallas import tpu as pltpu


def _bigru_chunk_kernel(lens_ref, x_ref, wih_ref, whh_ref, bih_ref, bhh_ref,
                        out_ref, hid_ref, h_scr, acc_scr, *, t_chunk, hidden_dim):
    """One (direction, time-chunk) grid point of the bidirectional GRU.

    lens_ref: (B, 1) int32   sequence lengths (0 for padded batch rows)
    x_ref   : (B, Tc, E)     input chunk (batch-first, selected by index_map)
    wih_ref : (1, E, 3H)     fused input->gate weights [r|z|n] for this direction
    whh_ref : (1, H, 3H)     fused hidden->gate weights
    bih_ref : (1, 1, 3H)     fused input bias
    bhh_ref : (1, 1, 3H)     fused hidden bias
    out_ref : (1, B, Tc, H)  per-chunk output slot (true time order)
    hid_ref : (1, B, H)      final hidden for this direction
    h_scr   : (B, H) f32     hidden-state carry (VMEM scratch)
    acc_scr : (B, Tc, H) f32 chunk output staging buffer (processing order)
    """
    H = hidden_dim
    Tc = t_chunk
    d = pl.program_id(0)                     # 0 = forward, 1 = backward
    c = pl.program_id(1)                     # chunk counter in processing order
    nc = pl.num_programs(1)
    fwd = d == 0

    @pl.when(c == 0)
    def _():
        h_scr[...] = jnp.zeros_like(h_scr)

    # Time-chunk covered by this grid step (backward walks chunks in reverse);
    # the x / out index_maps use the same formula.
    chunk = d * (nc - 1) + (1 - 2 * d) * c
    base_t = chunk * Tc

    def reverse_time(v):                     # flip axis 1 via static slices
        return jnp.concatenate(
            [v[:, Tc - 1 - p:Tc - p, :] for p in range(Tc)], axis=1)

    # ---- Hoisted, time-parallel input projection: one (B*Tc,E)x(E,3H) GEMM ----
    B = x_ref.shape[0]
    E = x_ref.shape[2]
    x2 = x_ref[...].astype(jnp.float32).reshape(B * Tc, E)
    gx = (jnp.dot(x2, wih_ref[0], preferred_element_type=jnp.float32)
          + bih_ref[0]).reshape(B, Tc, 3 * H)
    # Re-order to processing order (backward consumes the chunk reversed).
    gx = jnp.where(fwd, gx, reverse_time(gx))

    w_hh = whh_ref[0]                        # (H, 3H)
    b_hh = bhh_ref[0]                        # (1, 3H)
    lens = lens_ref[...]                     # (B, 1) int32

    # ---- Serial recurrence: one fused (B,H)x(H,3H) matmul per step ----------
    h = h_scr[...]                           # (B, H) f32
    for j in range(Tc):
        time = base_t + jnp.where(fwd, j, Tc - 1 - j)       # true time index
        gx_j = gx[:, j, :]                                   # (B, 3H)
        gh = jnp.dot(h, w_hh, preferred_element_type=jnp.float32) + b_hh
        r = jax.nn.sigmoid(gx_j[:, :H] + gh[:, :H])
        z = jax.nn.sigmoid(gx_j[:, H:2 * H] + gh[:, H:2 * H])
        n = jnp.tanh(gx_j[:, 2 * H:] + r * gh[:, 2 * H:])
        h_new = (1.0 - z) * n + z * h
        mask = time < lens                                   # (B, 1)
        acc_scr[:, j, :] = jnp.where(mask, h_new, 0.0)       # padded steps -> 0
        h = jnp.where(mask, h_new, h)                        # freeze past length
    h_scr[...] = h

    # ---- One dense full-block store of the chunk, in true time order --------
    acc = acc_scr[...]                                       # processing order
    out_ref[0] = jnp.where(fwd, acc, reverse_time(acc)).astype(out_ref.dtype)

    # Final hidden is materialised only once, on the last chunk.
    @pl.when(c == nc - 1)
    def _():
        hid_ref[0] = h.astype(hid_ref.dtype)


def bigru_encoder(x, lengths, w_ih, w_hh, b_ih, b_hh, *, t_chunk=None):
    """Bidirectional GRU encoder (packed-sequence semantics via masking).

    x       : (B, T, E) float
    lengths : (B,) int (valid sequence lengths)
    w_ih    : (2, E, 3H) fused input->gate weights, columns [r|z|n]
              (= PyTorch weight_ih_l0{,_reverse}.T)
    w_hh    : (2, H, 3H) fused hidden->gate weights
    b_ih    : (2, 3H), b_hh: (2, 3H)
    Returns (output (B, T, 2H), hidden (2, B, H)).
    """
    B, T, E = x.shape
    H = w_hh.shape[1]
    assert w_ih.shape == (2, E, 3 * H), w_ih.shape
    assert w_hh.shape == (2, H, 3 * H), w_hh.shape

    # Pad batch to a full 8-sublane tile; pad time to a whole number of chunks.
    B_pad = max(8, ((B + 7) // 8) * 8)
    if t_chunk is None:
        t_chunk = min(16, ((T + 7) // 8) * 8)
    T_pad = ((T + t_chunk - 1) // t_chunk) * t_chunk
    nc = T_pad // t_chunk

    x_p = jnp.zeros((B_pad, T_pad, E), x.dtype).at[:B, :T].set(x)
    lens = jnp.zeros((B_pad, 1), jnp.int32).at[:B, 0].set(
        jnp.asarray(lengths, jnp.int32))

    b_ih_r = b_ih.reshape(2, 1, 3 * H)
    b_hh_r = b_hh.reshape(2, 1, 3 * H)

    def t_idx(d, c):        # processing-order chunk -> time-order chunk index
        return d * (nc - 1) + (1 - 2 * d) * c

    out, hid = pl.pallas_call(
        functools.partial(_bigru_chunk_kernel, t_chunk=t_chunk, hidden_dim=H),
        grid=(2, nc),
        in_specs=[
            pl.BlockSpec((B_pad, 1), lambda d, c: (0, 0)),
            pl.BlockSpec((B_pad, t_chunk, E), lambda d, c: (0, t_idx(d, c), 0)),
            # Per-direction weights/biases: resident across all chunks.
            # (At production sizes, single-buffer these / raise vmem_limit_bytes
            #  for v7x's 64 MiB VMEM; unnecessary at these shapes.)
            pl.BlockSpec((1, E, 3 * H), lambda d, c: (d, 0, 0)),
            pl.BlockSpec((1, H, 3 * H), lambda d, c: (d, 0, 0)),
            pl.BlockSpec((1, 1, 3 * H), lambda d, c: (d, 0, 0)),
            pl.BlockSpec((1, 1, 3 * H), lambda d, c: (d, 0, 0)),
        ],
        out_specs=(
            pl.BlockSpec((1, B_pad, t_chunk, H),
                         lambda d, c: (d, 0, t_idx(d, c), 0)),
            pl.BlockSpec((1, B_pad, H), lambda d, c: (d, 0, 0)),
        ),
        out_shape=(
            jax.ShapeDtypeStruct((2, B_pad, T_pad, H), x.dtype),
            jax.ShapeDtypeStruct((2, B_pad, H), x.dtype),
        ),
        scratch_shapes=[
            pltpu.VMEM((B_pad, H), jnp.float32),
            pltpu.VMEM((B_pad, t_chunk, H), jnp.float32),
        ],
        compiler_params=pltpu.CompilerParams(
            dimension_semantics=("parallel", "arbitrary")),
    )(lens, x_p, w_ih, w_hh, b_ih_r, b_hh_r)

    # [forward ; backward] concatenated on the feature dim, padding trimmed.
    output = jnp.concatenate([out[0, :B, :T], out[1, :B, :T]], axis=-1)
    hidden = hid[:, :B, :]
    # TODO(synk): pad_packed_sequence trims to max(lengths); that needs a
    # device->host sync (and breaks under jit), so the full-T output is
    # returned instead (identical when max(lengths) == T, as in the test).
    return output, hidden


def _reference_bigru(x, lengths, w_ih, w_hh, b_ih, b_hh):
    """Pure-JAX reference with identical packed-sequence semantics."""
    B, T, E = x.shape
    H = w_hh.shape[1]
    lengths = jnp.asarray(lengths, jnp.int32)

    def cell(d, h, xt):
        gx = xt @ w_ih[d] + b_ih[d]
        gh = h @ w_hh[d] + b_hh[d]
        r = jax.nn.sigmoid(gx[:, :H] + gh[:, :H])
        z = jax.nn.sigmoid(gx[:, H:2 * H] + gh[:, H:2 * H])
        n = jnp.tanh(gx[:, 2 * H:] + r * gh[:, 2 * H:])
        return (1.0 - z) * n + z * h

    # forward
    h = jnp.zeros((B, H), jnp.float32)
    outs_f = []
    for t in range(T):
        h_new = cell(0, h, x[:, t])
        m = (t < lengths)[:, None]
        h = jnp.where(m, h_new, h)
        outs_f.append(jnp.where(m, h_new, 0.0))
    hid_f = h

    # backward
    h = jnp.zeros((B, H), jnp.float32)
    outs_b = [None] * T
    for t in range(T - 1, -1, -1):
        h_new = cell(1, h, x[:, t])
        m = (t < lengths)[:, None]
        h = jnp.where(m, h_new, h)
        outs_b[t] = jnp.where(m, h_new, 0.0)
    hid_b = h

    output = jnp.concatenate(
        [jnp.stack(outs_f, axis=1), jnp.stack(outs_b, axis=1)], axis=-1)
    hidden = jnp.stack([hid_f, hid_b], axis=0)
    return output, hidden


if __name__ == "__main__":
    # BiGRUEncoder(embedding_dim=32, hidden_dim=32), batch=2, seq=8.
    embedding_dim = 32
    hidden_dim = 32
    batch, seq = 2, 8

    key = jax.random.PRNGKey(0)
    kx, kwi, kwh, kbi, kbh = jax.random.split(key, 5)

    # nn.GRU default init: U(-1/sqrt(H), 1/sqrt(H)) for every parameter.
    bound = 1.0 / (hidden_dim ** 0.5)

    def u(k, shape):
        return jax.random.uniform(k, shape, jnp.float32, -bound, bound)

    # Fused-gate layout: columns ordered [r | z | n] (== PyTorch weight_ih^T).
    w_ih = u(kwi, (2, embedding_dim, 3 * hidden_dim))
    w_hh = u(kwh, (2, hidden_dim, 3 * hidden_dim))
    b_ih = u(kbi, (2, 3 * hidden_dim))
    b_hh = u(kbh, (2, 3 * hidden_dim))

    x = jax.random.normal(kx, (batch, seq, embedding_dim), dtype=jnp.float32)
    lengths = jnp.array([seq, 5], dtype=jnp.int32)   # variable lengths, max == seq

    out, hidden = bigru_encoder(x, lengths, w_ih, w_hh, b_ih, b_hh)
    out = jax.block_until_ready(out)
    hidden = jax.block_until_ready(hidden)

    ref_out, ref_hidden = _reference_bigru(x, lengths, w_ih, w_hh, b_ih, b_hh)

    assert out.shape == (batch, seq, 2 * hidden_dim), out.shape
    assert hidden.shape == (2, batch, hidden_dim), hidden.shape
    assert jnp.allclose(out, ref_out, atol=1e-4, rtol=1e-4), "output mismatch"
    assert jnp.allclose(hidden, ref_hidden, atol=1e-4, rtol=1e-4), "hidden mismatch"

    print("KERNEL_OK")
</pallas_src>

<mosaic_0001>
module attributes {stable_mosaic.version = 11 : i64} {
  func.func @_bigru_chunk_kernel(%arg0: i32, %arg1: i32, %arg2: memref<8x1xi32, #tpu.memory_space<vmem>>, %arg3: memref<8x8x32xf32, #tpu.memory_space<vmem>>, %arg4: memref<1x32x96xf32, #tpu.memory_space<vmem>>, %arg5: memref<1x32x96xf32, #tpu.memory_space<vmem>>, %arg6: memref<1x1x96xf32, #tpu.memory_space<vmem>>, %arg7: memref<1x1x96xf32, #tpu.memory_space<vmem>>, %arg8: memref<1x8x8x32xf32, #tpu.memory_space<vmem>>, %arg9: memref<1x8x32xf32, #tpu.memory_space<vmem>>, %arg10: memref<8x32xf32, #tpu.memory_space<vmem>>, %arg11: memref<8x8x32xf32, #tpu.memory_space<vmem>>) attributes {dimension_semantics = [#tpu.dimension_semantics<parallel>, #tpu.dimension_semantics<arbitrary>], iteration_bounds = array<i64: 2, 1>, scalar_prefetch = 0 : i64, scratch_operands = 2 : i64, tpu.core_type = #tpu.core_type<tc>, window_params = [{pipeline_mode = #tpu.pipeline_mode<synchronous>, transform_indices = @transform_0, window_bounds = array<i64: 8, 1>}, {transform_indices = @transform_1, window_bounds = array<i64: 8, 8, 32>}, {transform_indices = @transform_2, window_bounds = array<i64: 1, 32, 96>}, {transform_indices = @transform_3, window_bounds = array<i64: 1, 32, 96>}, {transform_indices = @transform_4, window_bounds = array<i64: 1, 1, 96>}, {transform_indices = @transform_5, window_bounds = array<i64: 1, 1, 96>}, {transform_indices = @transform_6, window_bounds = array<i64: 1, 8, 8, 32>}, {transform_indices = @transform_7, window_bounds = array<i64: 1, 8, 32>}]} {
    %c0_i32 = arith.constant 0 : i32
    %0 = arith.cmpi eq, %arg0, %c0_i32 : i32
    %c0_i32_0 = arith.constant 0 : i32
    %1 = arith.cmpi eq, %arg1, %c0_i32_0 : i32
    %2 = arith.extui %1 : i1 to i32
    %c0_i32_1 = arith.constant 0 : i32
    %3 = arith.cmpi ne, %2, %c0_i32_1 : i32
    scf.if %3 {
      %cst_100 = arith.constant 0.000000e+00 : f32
      %414 = vector.broadcast %cst_100 : f32 to vector<8x32xf32>
      %c0_101 = arith.constant 0 : index
      %c0_102 = arith.constant 0 : index
      %415 = vector.load %arg10[%c0_101, %c0_102] : memref<8x32xf32, #tpu.memory_space<vmem>>, vector<8x32xf32>
      tpu.vector_store %arg10[%c0_101, %c0_102], %414 {strides = array<i32>} : memref<8x32xf32, #tpu.memory_space<vmem>>, vector<8x32xf32>,
    } else {
    }
    %c0_i32_2 = arith.constant 0 : i32
    %4 = arith.muli %arg0, %c0_i32_2 : i32
    %c2_i32 = arith.constant 2 : i32
    %5 = arith.muli %c2_i32, %arg0 : i32
    %c1_i32 = arith.constant 1 : i32
    %6 = arith.subi %c1_i32, %5 : i32
    %7 = arith.muli %6, %arg1 : i32
    %8 = arith.addi %4, %7 : i32
    %c8_i32 = arith.constant 8 : i32
    %9 = arith.muli %8, %c8_i32 : i32
    %c0 = arith.constant 0 : index
    %c0_3 = arith.constant 0 : index
    %c0_4 = arith.constant 0 : index
    %10 = vector.load %arg3[%c0, %c0_3, %c0_4] : memref<8x8x32xf32, #tpu.memory_space<vmem>>, vector<8x8x32xf32>
    %11 = vector.shape_cast %10 : vector<8x8x32xf32> to vector<64x32xf32>
    %c0_5 = arith.constant 0 : index
    %c0_6 = arith.constant 0 : index
    %c0_7 = arith.constant 0 : index
    %12 = vector.load %arg4[%c0_5, %c0_6, %c0_7] : memref<1x32x96xf32, #tpu.memory_space<vmem>>, vector<1x32x96xf32>
    %13 = vector.shape_cast %12 : vector<1x32x96xf32> to vector<32x96xf32>
    %cst = arith.constant dense<0.000000e+00> : vector<64x96xf32>
    %14 = tpu.matmul %11, %13, %cst {dimension_numbers = #tpu.dot_dimension_numbers<[1], [0], [0], [1], [0, 0, 1, 1], [], []>} : vector<64x32xf32>, vector<32x96xf32>, vector<64x96xf32> -> vector<64x96xf32>
    %c0_8 = arith.constant 0 : index
    %c0_9 = arith.constant 0 : index
    %c0_10 = arith.constant 0 : index
    %15 = vector.load %arg6[%c0_8, %c0_9, %c0_10] : memref<1x1x96xf32, #tpu.memory_space<vmem>>, vector<1x1x96xf32>
    %16 = vector.shape_cast %15 : vector<1x1x96xf32> to vector<1x96xf32>
    %17 = vector.broadcast %16 : vector<1x96xf32> to vector<64x96xf32>
    %18 = arith.addf %14, %17 : vector<64x96xf32>
    %19 = vector.shape_cast %18 : vector<64x96xf32> to vector<8x8x96xf32>
    %20 = vector.extract_strided_slice %19 {offsets = [0, 7, 0], sizes = [8, 1, 96], strides = [1, 1, 1]} : vector<8x8x96xf32> to vector<8x1x96xf32>
    %21 = vector.extract_strided_slice %19 {offsets = [0, 6, 0], sizes = [8, 1, 96], strides = [1, 1, 1]} : vector<8x8x96xf32> to vector<8x1x96xf32>
    %22 = vector.extract_strided_slice %19 {offsets = [0, 5, 0], sizes = [8, 1, 96], strides = [1, 1, 1]} : vector<8x8x96xf32> to vector<8x1x96xf32>
    %23 = vector.extract_strided_slice %19 {offsets = [0, 4, 0], sizes = [8, 1, 96], strides = [1, 1, 1]} : vector<8x8x96xf32> to vector<8x1x96xf32>
    %24 = vector.extract_strided_slice %19 {offsets = [0, 3, 0], sizes = [8, 1, 96], strides = [1, 1, 1]} : vector<8x8x96xf32> to vector<8x1x96xf32>
    %25 = vector.extract_strided_slice %19 {offsets = [0, 2, 0], sizes = [8, 1, 96], strides = [1, 1, 1]} : vector<8x8x96xf32> to vector<8x1x96xf32>
    %26 = vector.extract_strided_slice %19 {offsets = [0, 1, 0], sizes = [8, 1, 96], strides = [1, 1, 1]} : vector<8x8x96xf32> to vector<8x1x96xf32>
    %27 = vector.extract_strided_slice %19 {offsets = [0, 0, 0], sizes = [8, 1, 96], strides = [1, 1, 1]} : vector<8x8x96xf32> to vector<8x1x96xf32>
    %28 = tpu.concatenate %20, %21, %22, %23, %24, %25, %26, %27 in 1 : vector<8x1x96xf32>, vector<8x1x96xf32>, vector<8x1x96xf32>, vector<8x1x96xf32>, vector<8x1x96xf32>, vector<8x1x96xf32>, vector<8x1x96xf32>, vector<8x1x96xf32> -> vector<8x8x96xf32>
    %29 = arith.select %0, %19, %28 : vector<8x8x96xf32>
    %c0_11 = arith.constant 0 : index
    %c0_12 = arith.constant 0 : index
    %c0_13 = arith.constant 0 : index
    %30 = vector.load %arg5[%c0_11, %c0_12, %c0_13] : memref<1x32x96xf32, #tpu.memory_space<vmem>>, vector<1x32x96xf32>
    %31 = vector.shape_cast %30 : vector<1x32x96xf32> to vector<32x96xf32>
    %c0_14 = arith.constant 0 : index
    %c0_15 = arith.constant 0 : index
    %c0_16 = arith.constant 0 : index
    %32 = vector.load %arg7[%c0_14, %c0_15, %c0_16] : memref<1x1x96xf32, #tpu.memory_space<vmem>>, vector<1x1x96xf32>
    %33 = vector.shape_cast %32 : vector<1x1x96xf32> to vector<1x96xf32>
    %c0_17 = arith.constant 0 : index
    %c0_18 = arith.constant 0 : index
    %34 = vector.load %arg2[%c0_17, %c0_18] : memref<8x1xi32, #tpu.memory_space<vmem>>, vector<8x1xi32>
    %c0_19 = arith.constant 0 : index
    %c0_20 = arith.constant 0 : index
    %35 = vector.load %arg10[%c0_19, %c0_20] : memref<8x32xf32, #tpu.memory_space<vmem>>, vector<8x32xf32>
    %c0_i32_21 = arith.constant 0 : i32
    %c7_i32 = arith.constant 7 : i32
    %36 = arith.select %0, %c0_i32_21, %c7_i32 : i32
    %37 = arith.addi %9, %36 : i32
    %38 = vector.extract_strided_slice %29 {offsets = [0, 0, 0], sizes = [8, 1, 96], strides = [1, 1, 1]} : vector<8x8x96xf32> to vector<8x1x96xf32>
    %39 = vector.shape_cast %38 : vector<8x1x96xf32> to vector<8x96xf32>
    %cst_22 = arith.constant dense<0.000000e+00> : vector<8x96xf32>
    %40 = tpu.matmul %35, %31, %cst_22 {dimension_numbers = #tpu.dot_dimension_numbers<[1], [0], [0], [1], [0, 0, 1, 1], [], []>} : vector<8x32xf32>, vector<32x96xf32>, vector<8x96xf32> -> vector<8x96xf32>
    %41 = vector.broadcast %33 : vector<1x96xf32> to vector<8x96xf32>
    %42 = arith.addf %40, %41 : vector<8x96xf32>
    %43 = vector.extract_strided_slice %39 {offsets = [0, 0], sizes = [8, 32], strides = [1, 1]} : vector<8x96xf32> to vector<8x32xf32>
    %44 = vector.extract_strided_slice %42 {offsets = [0, 0], sizes = [8, 32], strides = [1, 1]} : vector<8x96xf32> to vector<8x32xf32>
    %45 = arith.addf %43, %44 : vector<8x32xf32>
    %46 = arith.negf %45 : vector<8x32xf32>
    %47 = math.exp %46 : vector<8x32xf32>
    %cst_23 = arith.constant 1.000000e+00 : f32
    %48 = vector.broadcast %cst_23 : f32 to vector<8x32xf32>
    %49 = arith.addf %48, %47 : vector<8x32xf32>
    %50 = arith.divf %48, %49 : vector<8x32xf32>
    %51 = vector.extract_strided_slice %39 {offsets = [0, 32], sizes = [8, 32], strides = [1, 1]} : vector<8x96xf32> to vector<8x32xf32>
    %52 = vector.extract_strided_slice %42 {offsets = [0, 32], sizes = [8, 32], strides = [1, 1]} : vector<8x96xf32> to vector<8x32xf32>
    %53 = arith.addf %51, %52 : vector<8x32xf32>
    %54 = arith.negf %53 : vector<8x32xf32>
    %55 = math.exp %54 : vector<8x32xf32>
    %cst_24 = arith.constant 1.000000e+00 : f32
    %56 = vector.broadcast %cst_24 : f32 to vector<8x32xf32>
    %57 = arith.addf %56, %55 : vector<8x32xf32>
    %58 = arith.divf %56, %57 : vector<8x32xf32>
    %59 = vector.extract_strided_slice %39 {offsets = [0, 64], sizes = [8, 32], strides = [1, 1]} : vector<8x96xf32> to vector<8x32xf32>
    %60 = vector.extract_strided_slice %42 {offsets = [0, 64], sizes = [8, 32], strides = [1, 1]} : vector<8x96xf32> to vector<8x32xf32>
    %61 = arith.mulf %50, %60 : vector<8x32xf32>
    %62 = arith.addf %59, %61 : vector<8x32xf32>
    %63 = math.tanh %62 : vector<8x32xf32>
    %cst_25 = arith.constant 1.000000e+00 : f32
    %64 = vector.broadcast %cst_25 : f32 to vector<8x32xf32>
    %65 = arith.subf %64, %58 : vector<8x32xf32>
    %66 = arith.mulf %65, %63 : vector<8x32xf32>
    %67 = arith.mulf %58, %35 : vector<8x32xf32>
    %68 = arith.addf %66, %67 : vector<8x32xf32>
    %69 = vector.broadcast %37 : i32 to vector<8x1xi32>
    %70 = arith.cmpi slt, %69, %34 : vector<8x1xi32>
    %cst_26 = arith.constant 0.000000e+00 : f32
    %71 = vector.shape_cast %70 : vector<8x1xi1> to vector<8x1xi1>
    %72 = vector.broadcast %71 : vector<8x1xi1> to vector<8x32xi1>
    %73 = vector.broadcast %cst_26 : f32 to vector<8x32xf32>
    %74 = arith.select %72, %68, %73 : vector<8x32xi1>, vector<8x32xf32>
    %c0_27 = arith.constant 0 : index
    %c0_28 = arith.constant 0 : index
    %c0_29 = arith.constant 0 : index
    %75 = vector.load %arg11[%c0_27, %c0_28, %c0_29] : memref<8x8x32xf32, #tpu.memory_space<vmem>>, vector<8x1x32xf32>
    %76 = vector.shape_cast %75 : vector<8x1x32xf32> to vector<8x32xf32>
    %77 = vector.shape_cast %74 : vector<8x32xf32> to vector<8x1x32xf32>
    tpu.vector_store %arg11[%c0_27, %c0_28, %c0_29], %77 {strides = array<i32>} : memref<8x8x32xf32, #tpu.memory_space<vmem>>, vector<8x1x32xf32>,
    %78 = vector.shape_cast %70 : vector<8x1xi1> to vector<8x1xi1>
    %79 = vector.broadcast %78 : vector<8x1xi1> to vector<8x32xi1>
    %80 = arith.select %79, %68, %35 : vector<8x32xi1>, vector<8x32xf32>
    %c1_i32_30 = arith.constant 1 : i32
    %c6_i32 = arith.constant 6 : i32
    %81 = arith.select %0, %c1_i32_30, %c6_i32 : i32
    %82 = arith.addi %9, %81 : i32
    %83 = vector.extract_strided_slice %29 {offsets = [0, 1, 0], sizes = [8, 1, 96], strides = [1, 1, 1]} : vector<8x8x96xf32> to vector<8x1x96xf32>
    %84 = vector.shape_cast %83 : vector<8x1x96xf32> to vector<8x96xf32>
    %cst_31 = arith.constant dense<0.000000e+00> : vector<8x96xf32>
    %85 = tpu.matmul %80, %31, %cst_31 {dimension_numbers = #tpu.dot_dimension_numbers<[1], [0], [0], [1], [0, 0, 1, 1], [], []>} : vector<8x32xf32>, vector<32x96xf32>, vector<8x96xf32> -> vector<8x96xf32>
    %86 = vector.broadcast %33 : vector<1x96xf32> to vector<8x96xf32>
    %87 = arith.addf %85, %86 : vector<8x96xf32>
    %88 = vector.extract_strided_slice %84 {offsets = [0, 0], sizes = [8, 32], strides = [1, 1]} : vector<8x96xf32> to vector<8x32xf32>
    %89 = vector.extract_strided_slice %87 {offsets = [0, 0], sizes = [8, 32], strides = [1, 1]} : vector<8x96xf32> to vector<8x32xf32>
    %90 = arith.addf %88, %89 : vector<8x32xf32>
    %91 = arith.negf %90 : vector<8x32xf32>
    %92 = math.exp %91 : vector<8x32xf32>
    %cst_32 = arith.constant 1.000000e+00 : f32
    %93 = vector.broadcast %cst_32 : f32 to vector<8x32xf32>
    %94 = arith.addf %93, %92 : vector<8x32xf32>
    %95 = arith.divf %93, %94 : vector<8x32xf32>
    %96 = vector.extract_strided_slice %84 {offsets = [0, 32], sizes = [8, 32], strides = [1, 1]} : vector<8x96xf32> to vector<8x32xf32>
    %97 = vector.extract_strided_slice %87 {offsets = [0, 32], sizes = [8, 32], strides = [1, 1]} : vector<8x96xf32> to vector<8x32xf32>
    %98 = arith.addf %96, %97 : vector<8x32xf32>
    %99 = arith.negf %98 : vector<8x32xf32>
    %100 = math.exp %99 : vector<8x32xf32>
    %cst_33 = arith.constant 1.000000e+00 : f32
    %101 = vector.broadcast %cst_33 : f32 to vector<8x32xf32>
    %102 = arith.addf %101, %100 : vector<8x32xf32>
    %103 = arith.divf %101, %102 : vector<8x32xf32>
    %104 = vector.extract_strided_slice %84 {offsets = [0, 64], sizes = [8, 32], strides = [1, 1]} : vector<8x96xf32> to vector<8x32xf32>
    %105 = vector.extract_strided_slice %87 {offsets = [0, 64], sizes = [8, 32], strides = [1, 1]} : vector<8x96xf32> to vector<8x32xf32>
    %106 = arith.mulf %95, %105 : vector<8x32xf32>
    %107 = arith.addf %104, %106 : vector<8x32xf32>
    %108 = math.tanh %107 : vector<8x32xf32>
    %cst_34 = arith.constant 1.000000e+00 : f32
    %109 = vector.broadcast %cst_34 : f32 to vector<8x32xf32>
    %110 = arith.subf %109, %103 : vector<8x32xf32>
    %111 = arith.mulf %110, %108 : vector<8x32xf32>
    %112 = arith.mulf %103, %80 : vector<8x32xf32>
    %113 = arith.addf %111, %112 : vector<8x32xf32>
    %114 = vector.broadcast %82 : i32 to vector<8x1xi32>
    %115 = arith.cmpi slt, %114, %34 : vector<8x1xi32>
    %cst_35 = arith.constant 0.000000e+00 : f32
    %116 = vector.shape_cast %115 : vector<8x1xi1> to vector<8x1xi1>
    %117 = vector.broadcast %116 : vector<8x1xi1> to vector<8x32xi1>
    %118 = vector.broadcast %cst_35 : f32 to vector<8x32xf32>
    %119 = arith.select %117, %113, %118 : vector<8x32xi1>, vector<8x32xf32>
    %c0_36 = arith.constant 0 : index
    %c1 = arith.constant 1 : index
    %c0_37 = arith.constant 0 : index
    %120 = vector.load %arg11[%c0_36, %c1, %c0_37] : memref<8x8x32xf32, #tpu.memory_space<vmem>>, vector<8x1x32xf32>
    %121 = vector.shape_cast %120 : vector<8x1x32xf32> to vector<8x32xf32>
    %122 = vector.shape_cast %119 : vector<8x32xf32> to vector<8x1x32xf32>
    tpu.vector_store %arg11[%c0_36, %c1, %c0_37], %122 {strides = array<i32>} : memref<8x8x32xf32, #tpu.memory_space<vmem>>, vector<8x1x32xf32>,
    %123 = vector.shape_cast %115 : vector<8x1xi1> to vector<8x1xi1>
    %124 = vector.broadcast %123 : vector<8x1xi1> to vector<8x32xi1>
    %125 = arith.select %124, %113, %80 : vector<8x32xi1>, vector<8x32xf32>
    %c2_i32_38 = arith.constant 2 : i32
    %c5_i32 = arith.constant 5 : i32
    %126 = arith.select %0, %c2_i32_38, %c5_i32 : i32
    %127 = arith.addi %9, %126 : i32
    %128 = vector.extract_strided_slice %29 {offsets = [0, 2, 0], sizes = [8, 1, 96], strides = [1, 1, 1]} : vector<8x8x96xf32> to vector<8x1x96xf32>
    %129 = vector.shape_cast %128 : vector<8x1x96xf32> to vector<8x96xf32>
    %cst_39 = arith.constant dense<0.000000e+00> : vector<8x96xf32>
    %130 = tpu.matmul %125, %31, %cst_39 {dimension_numbers = #tpu.dot_dimension_numbers<[1], [0], [0], [1], [0, 0, 1, 1], [], []>} : vector<8x32xf32>, vector<32x96xf32>, vector<8x96xf32> -> vector<8x96xf32>
    %131 = vector.broadcast %33 : vector<1x96xf32> to vector<8x96xf32>
    %132 = arith.addf %130, %131 : vector<8x96xf32>
    %133 = vector.extract_strided_slice %129 {offsets = [0, 0], sizes = [8, 32], strides = [1, 1]} : vector<8x96xf32> to vector<8x32xf32>
    %134 = vector.extract_strided_slice %132 {offsets = [0, 0], sizes = [8, 32], strides = [1, 1]} : vector<8x96xf32> to vector<8x32xf32>
    %135 = arith.addf %133, %134 : vector<8x32xf32>
    %136 = arith.negf %135 : vector<8x32xf32>
    %137 = math.exp %136 : vector<8x32xf32>
    %cst_40 = arith.constant 1.000000e+00 : f32
    %138 = vector.broadcast %cst_40 : f32 to vector<8x32xf32>
    %139 = arith.addf %138, %137 : vector<8x32xf32>
    %140 = arith.divf %138, %139 : vector<8x32xf32>
    %141 = vector.extract_strided_slice %129 {offsets = [0, 32], sizes = [8, 32], strides = [1, 1]} : vector<8x96xf32> to vector<8x32xf32>
    %142 = vector.extract_strided_slice %132 {offsets = [0, 32], sizes = [8, 32], strides = [1, 1]} : vector<8x96xf32> to vector<8x32xf32>
    %143 = arith.addf %141, %142 : vector<8x32xf32>
    %144 = arith.negf %143 : vector<8x32xf32>
    %145 = math.exp %144 : vector<8x32xf32>
    %cst_41 = arith.constant 1.000000e+00 : f32
    %146 = vector.broadcast %cst_41 : f32 to vector<8x32xf32>
    %147 = arith.addf %146, %145 : vector<8x32xf32>
    %148 = arith.divf %146, %147 : vector<8x32xf32>
    %149 = vector.extract_strided_slice %129 {offsets = [0, 64], sizes = [8, 32], strides = [1, 1]} : vector<8x96xf32> to vector<8x32xf32>
    %150 = vector.extract_strided_slice %132 {offsets = [0, 64], sizes = [8, 32], strides = [1, 1]} : vector<8x96xf32> to vector<8x32xf32>
    %151 = arith.mulf %140, %150 : vector<8x32xf32>
    %152 = arith.addf %149, %151 : vector<8x32xf32>
    %153 = math.tanh %152 : vector<8x32xf32>
    %cst_42 = arith.constant 1.000000e+00 : f32
    %154 = vector.broadcast %cst_42 : f32 to vector<8x32xf32>
    %155 = arith.subf %154, %148 : vector<8x32xf32>
    %156 = arith.mulf %155, %153 : vector<8x32xf32>
    %157 = arith.mulf %148, %125 : vector<8x32xf32>
    %158 = arith.addf %156, %157 : vector<8x32xf32>
    %159 = vector.broadcast %127 : i32 to vector<8x1xi32>
    %160 = arith.cmpi slt, %159, %34 : vector<8x1xi32>
    %cst_43 = arith.constant 0.000000e+00 : f32
    %161 = vector.shape_cast %160 : vector<8x1xi1> to vector<8x1xi1>
    %162 = vector.broadcast %161 : vector<8x1xi1> to vector<8x32xi1>
    %163 = vector.broadcast %cst_43 : f32 to vector<8x32xf32>
    %164 = arith.select %162, %158, %163 : vector<8x32xi1>, vector<8x32xf32>
    %c0_44 = arith.constant 0 : index
    %c2 = arith.constant 2 : index
    %c0_45 = arith.constant 0 : index
    %165 = vector.load %arg11[%c0_44, %c2, %c0_45] : memref<8x8x32xf32, #tpu.memory_space<vmem>>, vector<8x1x32xf32>
    %166 = vector.shape_cast %165 : vector<8x1x32xf32> to vector<8x32xf32>
    %167 = vector.shape_cast %164 : vector<8x32xf32> to vector<8x1x32xf32>
    tpu.vector_store %arg11[%c0_44, %c2, %c0_45], %167 {strides = array<i32>} : memref<8x8x32xf32, #tpu.memory_space<vmem>>, vector<8x1x32xf32>,
    %168 = vector.shape_cast %160 : vector<8x1xi1> to vector<8x1xi1>
    %169 = vector.broadcast %168 : vector<8x1xi1> to vector<8x32xi1>
    %170 = arith.select %169, %158, %125 : vector<8x32xi1>, vector<8x32xf32>
    %c3_i32 = arith.constant 3 : i32
    %c4_i32 = arith.constant 4 : i32
    %171 = arith.select %0, %c3_i32, %c4_i32 : i32
    %172 = arith.addi %9, %171 : i32
    %173 = vector.extract_strided_slice %29 {offsets = [0, 3, 0], sizes = [8, 1, 96], strides = [1, 1, 1]} : vector<8x8x96xf32> to vector<8x1x96xf32>
    %174 = vector.shape_cast %173 : vector<8x1x96xf32> to vector<8x96xf32>
    %cst_46 = arith.constant dense<0.000000e+00> : vector<8x96xf32>
    %175 = tpu.matmul %170, %31, %cst_46 {dimension_numbers = #tpu.dot_dimension_numbers<[1], [0], [0], [1], [0, 0, 1, 1], [], []>} : vector<8x32xf32>, vector<32x96xf32>, vector<8x96xf32> -> vector<8x96xf32>
    %176 = vector.broadcast %33 : vector<1x96xf32> to vector<8x96xf32>
    %177 = arith.addf %175, %176 : vector<8x96xf32>
    %178 = vector.extract_strided_slice %174 {offsets = [0, 0], sizes = [8, 32], strides = [1, 1]} : vector<8x96xf32> to vector<8x32xf32>
    %179 = vector.extract_strided_slice %177 {offsets = [0, 0], sizes = [8, 32], strides = [1, 1]} : vector<8x96xf32> to vector<8x32xf32>
    %180 = arith.addf %178, %179 : vector<8x32xf32>
    %181 = arith.negf %180 : vector<8x32xf32>
    %182 = math.exp %181 : vector<8x32xf32>
    %cst_47 = arith.constant 1.000000e+00 : f32
    %183 = vector.broadcast %cst_47 : f32 to vector<8x32xf32>
    %184 = arith.addf %183, %182 : vector<8x32xf32>
    %185 = arith.divf %183, %184 : vector<8x32xf32>
    %186 = vector.extract_strided_slice %174 {offsets = [0, 32], sizes = [8, 32], strides = [1, 1]} : vector<8x96xf32> to vector<8x32xf32>
    %187 = vector.extract_strided_slice %177 {offsets = [0, 32], sizes = [8, 32], strides = [1, 1]} : vector<8x96xf32> to vector<8x32xf32>
    %188 = arith.addf %186, %187 : vector<8x32xf32>
    %189 = arith.negf %188 : vector<8x32xf32>
    %190 = math.exp %189 : vector<8x32xf32>
    %cst_48 = arith.constant 1.000000e+00 : f32
    %191 = vector.broadcast %cst_48 : f32 to vector<8x32xf32>
    %192 = arith.addf %191, %190 : vector<8x32xf32>
    %193 = arith.divf %191, %192 : vector<8x32xf32>
    %194 = vector.extract_strided_slice %174 {offsets = [0, 64], sizes = [8, 32], strides = [1, 1]} : vector<8x96xf32> to vector<8x32xf32>
    %195 = vector.extract_strided_slice %177 {offsets = [0, 64], sizes = [8, 32], strides = [1, 1]} : vector<8x96xf32> to vector<8x32xf32>
    %196 = arith.mulf %185, %195 : vector<8x32xf32>
    %197 = arith.addf %194, %196 : vector<8x32xf32>
    %198 = math.tanh %197 : vector<8x32xf32>
    %cst_49 = arith.constant 1.000000e+00 : f32
    %199 = vector.broadcast %cst_49 : f32 to vector<8x32xf32>
    %200 = arith.subf %199, %193 : vector<8x32xf32>
    %201 = arith.mulf %200, %198 : vector<8x32xf32>
    %202 = arith.mulf %193, %170 : vector<8x32xf32>
    %203 = arith.addf %201, %202 : vector<8x32xf32>
    %204 = vector.broadcast %172 : i32 to vector<8x1xi32>
    %205 = arith.cmpi slt, %204, %34 : vector<8x1xi32>
    %cst_50 = arith.constant 0.000000e+00 : f32
    %206 = vector.shape_cast %205 : vector<8x1xi1> to vector<8x1xi1>
    %207 = vector.broadcast %206 : vector<8x1xi1> to vector<8x32xi1>
    %208 = vector.broadcast %cst_50 : f32 to vector<8x32xf32>
    %209 = arith.select %207, %203, %208 : vector<8x32xi1>, vector<8x32xf32>
    %c0_51 = arith.constant 0 : index
    %c3 = arith.constant 3 : index
    %c0_52 = arith.constant 0 : index
    %210 = vector.load %arg11[%c0_51, %c3, %c0_52] : memref<8x8x32xf32, #tpu.memory_space<vmem>>, vector<8x1x32xf32>
    %211 = vector.shape_cast %210 : vector<8x1x32xf32> to vector<8x32xf32>
    %212 = vector.shape_cast %209 : vector<8x32xf32> to vector<8x1x32xf32>
    tpu.vector_store %arg11[%c0_51, %c3, %c0_52], %212 {strides = array<i32>} : memref<8x8x32xf32, #tpu.memory_space<vmem>>, vector<8x1x32xf32>,
    %213 = vector.shape_cast %205 : vector<8x1xi1> to vector<8x1xi1>
    %214 = vector.broadcast %213 : vector<8x1xi1> to vector<8x32xi1>
    %215 = arith.select %214, %203, %170 : vector<8x32xi1>, vector<8x32xf32>
    %c4_i32_53 = arith.constant 4 : i32
    %c3_i32_54 = arith.constant 3 : i32
    %216 = arith.select %0, %c4_i32_53, %c3_i32_54 : i32
    %217 = arith.addi %9, %216 : i32
    %218 = vector.extract_strided_slice %29 {offsets = [0, 4, 0], sizes = [8, 1, 96], strides = [1, 1, 1]} : vector<8x8x96xf32> to vector<8x1x96xf32>
    %219 = vector.shape_cast %218 : vector<8x1x96xf32> to vector<8x96xf32>
    %cst_55 = arith.constant dense<0.000000e+00> : vector<8x96xf32>
    %220 = tpu.matmul %215, %31, %cst_55 {dimension_numbers = #tpu.dot_dimension_numbers<[1], [0], [0], [1], [0, 0, 1, 1], [], []>} : vector<8x32xf32>, vector<32x96xf32>, vector<8x96xf32> -> vector<8x96xf32>
    %221 = vector.broadcast %33 : vector<1x96xf32> to vector<8x96xf32>
    %222 = arith.addf %220, %221 : vector<8x96xf32>
    %223 = vector.extract_strided_slice %219 {offsets = [0, 0], sizes = [8, 32], strides = [1, 1]} : vector<8x96xf32> to vector<8x32xf32>
    %224 = vector.extract_strided_slice %222 {offsets = [0, 0], sizes = [8, 32], strides = [1, 1]} : vector<8x96xf32> to vector<8x32xf32>
    %225 = arith.addf %223, %224 : vector<8x32xf32>
    %226 = arith.negf %225 : vector<8x32xf32>
    %227 = math.exp %226 : vector<8x32xf32>
    %cst_56 = arith.constant 1.000000e+00 : f32
    %228 = vector.broadcast %cst_56 : f32 to vector<8x32xf32>
    %229 = arith.addf %228, %227 : vector<8x32xf32>
    %230 = arith.divf %228, %229 : vector<8x32xf32>
    %231 = vector.extract_strided_slice %219 {offsets = [0, 32], sizes = [8, 32], strides = [1, 1]} : vector<8x96xf32> to vector<8x32xf32>
    %232 = vector.extract_strided_slice %222 {offsets = [0, 32], sizes = [8, 32], strides = [1, 1]} : vector<8x96xf32> to vector<8x32xf32>
    %233 = arith.addf %231, %232 : vector<8x32xf32>
    %234 = arith.negf %233 : vector<8x32xf32>
    %235 = math.exp %234 : vector<8x32xf32>
    %cst_57 = arith.constant 1.000000e+00 : f32
    %236 = vector.broadcast %cst_57 : f32 to vector<8x32xf32>
    %237 = arith.addf %236, %235 : vector<8x32xf32>
    %238 = arith.divf %236, %237 : vector<8x32xf32>
    %239 = vector.extract_strided_slice %219 {offsets = [0, 64], sizes = [8, 32], strides = [1, 1]} : vector<8x96xf32> to vector<8x32xf32>
    %240 = vector.extract_strided_slice %222 {offsets = [0, 64], sizes = [8, 32], strides = [1, 1]} : vector<8x96xf32> to vector<8x32xf32>
    %241 = arith.mulf %230, %240 : vector<8x32xf32>
    %242 = arith.addf %239, %241 : vector<8x32xf32>
    %243 = math.tanh %242 : vector<8x32xf32>
    %cst_58 = arith.constant 1.000000e+00 : f32
    %244 = vector.broadcast %cst_58 : f32 to vector<8x32xf32>
    %245 = arith.subf %244, %238 : vector<8x32xf32>
    %246 = arith.mulf %245, %243 : vector<8x32xf32>
    %247 = arith.mulf %238, %215 : vector<8x32xf32>
    %248 = arith.addf %246, %247 : vector<8x32xf32>
    %249 = vector.broadcast %217 : i32 to vector<8x1xi32>
    %250 = arith.cmpi slt, %249, %34 : vector<8x1xi32>
    %cst_59 = arith.constant 0.000000e+00 : f32
    %251 = vector.shape_cast %250 : vector<8x1xi1> to vector<8x1xi1>
    %252 = vector.broadcast %251 : vector<8x1xi1> to vector<8x32xi1>
    %253 = vector.broadcast %cst_59 : f32 to vector<8x32xf32>
    %254 = arith.select %252, %248, %253 : vector<8x32xi1>, vector<8x32xf32>
    %c0_60 = arith.constant 0 : index
    %c4 = arith.constant 4 : index
    %c0_61 = arith.constant 0 : index
    %255 = vector.load %arg11[%c0_60, %c4, %c0_61] : memref<8x8x32xf32, #tpu.memory_space<vmem>>, vector<8x1x32xf32>
    %256 = vector.shape_cast %255 : vector<8x1x32xf32> to vector<8x32xf32>
    %257 = vector.shape_cast %254 : vector<8x32xf32> to vector<8x1x32xf32>
    tpu.vector_store %arg11[%c0_60, %c4, %c0_61], %257 {strides = array<i32>} : memref<8x8x32xf32, #tpu.memory_space<vmem>>, vector<8x1x32xf32>,
    %258 = vector.shape_cast %250 : vector<8x1xi1> to vector<8x1xi1>
    %259 = vector.broadcast %258 : vector<8x1xi1> to vector<8x32xi1>
    %260 = arith.select %259, %248, %215 : vector<8x32xi1>, vector<8x32xf32>
    %c5_i32_62 = arith.constant 5 : i32
    %c2_i32_63 = arith.constant 2 : i32
    %261 = arith.select %0, %c5_i32_62, %c2_i32_63 : i32
    %262 = arith.addi %9, %261 : i32
    %263 = vector.extract_strided_slice %29 {offsets = [0, 5, 0], sizes = [8, 1, 96], strides = [1, 1, 1]} : vector<8x8x96xf32> to vector<8x1x96xf32>
    %264 = vector.shape_cast %263 : vector<8x1x96xf32> to vector<8x96xf32>
    %cst_64 = arith.constant dense<0.000000e+00> : vector<8x96xf32>
    %265 = tpu.matmul %260, %31, %cst_64 {dimension_numbers = #tpu.dot_dimension_numbers<[1], [0], [0], [1], [0, 0, 1, 1], [], []>} : vector<8x32xf32>, vector<32x96xf32>, vector<8x96xf32> -> vector<8x96xf32>
    %266 = vector.broadcast %33 : vector<1x96xf32> to vector<8x96xf32>
    %267 = arith.addf %265, %266 : vector<8x96xf32>
    %268 = vector.extract_strided_slice %264 {offsets = [0, 0], sizes = [8, 32], strides = [1, 1]} : vector<8x96xf32> to vector<8x32xf32>
    %269 = vector.extract_strided_slice %267 {offsets = [0, 0], sizes = [8, 32], strides = [1, 1]} : vector<8x96xf32> to vector<8x32xf32>
    %270 = arith.addf %268, %269 : vector<8x32xf32>
    %271 = arith.negf %270 : vector<8x32xf32>
    %272 = math.exp %271 : vector<8x32xf32>
    %cst_65 = arith.constant 1.000000e+00 : f32
    %273 = vector.broadcast %cst_65 : f32 to vector<8x32xf32>
    %274 = arith.addf %273, %272 : vector<8x32xf32>
    %275 = arith.divf %273, %274 : vector<8x32xf32>
    %276 = vector.extract_strided_slice %264 {offsets = [0, 32], sizes = [8, 32], strides = [1, 1]} : vector<8x96xf32> to vector<8x32xf32>
    %277 = vector.extract_strided_slice %267 {offsets = [0, 32], sizes = [8, 32], strides = [1, 1]} : vector<8x96xf32> to vector<8x32xf32>
    %278 = arith.addf %276, %277 : vector<8x32xf32>
    %279 = arith.negf %278 : vector<8x32xf32>
    %280 = math.exp %279 : vector<8x32xf32>
    %cst_66 = arith.constant 1.000000e+00 : f32
    %281 = vector.broadcast %cst_66 : f32 to vector<8x32xf32>
    %282 = arith.addf %281, %280 : vector<8x32xf32>
    %283 = arith.divf %281, %282 : vector<8x32xf32>
    %284 = vector.extract_strided_slice %264 {offsets = [0, 64], sizes = [8, 32], strides = [1, 1]} : vector<8x96xf32> to vector<8x32xf32>
    %285 = vector.extract_strided_slice %267 {offsets = [0, 64], sizes = [8, 32], strides = [1, 1]} : vector<8x96xf32> to vector<8x32xf32>
    %286 = arith.mulf %275, %285 : vector<8x32xf32>
    %287 = arith.addf %284, %286 : vector<8x32xf32>
    %288 = math.tanh %287 : vector<8x32xf32>
    %cst_67 = arith.constant 1.000000e+00 : f32
    %289 = vector.broadcast %cst_67 : f32 to vector<8x32xf32>
    %290 = arith.subf %289, %283 : vector<8x32xf32>
    %291 = arith.mulf %290, %288 : vector<8x32xf32>
    %292 = arith.mulf %283, %260 : vector<8x32xf32>
    %293 = arith.addf %291, %292 : vector<8x32xf32>
    %294 = vector.broadcast %262 : i32 to vector<8x1xi32>
    %295 = arith.cmpi slt, %294, %34 : vector<8x1xi32>
    %cst_68 = arith.constant 0.000000e+00 : f32
    %296 = vector.shape_cast %295 : vector<8x1xi1> to vector<8x1xi1>
    %297 = vector.broadcast %296 : vector<8x1xi1> to vector<8x32xi1>
    %298 = vector.broadcast %cst_68 : f32 to vector<8x32xf32>
    %299 = arith.select %297, %293, %298 : vector<8x32xi1>, vector<8x32xf32>
    %c0_69 = arith.constant 0 : index
    %c5 = arith.constant 5 : index
    %c0_70 = arith.constant 0 : index
    %300 = vector.load %arg11[%c0_69, %c5, %c0_70] : memref<8x8x32xf32, #tpu.memory_space<vmem>>, vector<8x1x32xf32>
    %301 = vector.shape_cast %300 : vector<8x1x32xf32> to vector<8x32xf32>
    %302 = vector.shape_cast %299 : vector<8x32xf32> to vector<8x1x32xf32>
    tpu.vector_store %arg11[%c0_69, %c5, %c0_70], %302 {strides = array<i32>} : memref<8x8x32xf32, #tpu.memory_space<vmem>>, vector<8x1x32xf32>,
    %303 = vector.shape_cast %295 : vector<8x1xi1> to vector<8x1xi1>
    %304 = vector.broadcast %303 : vector<8x1xi1> to vector<8x32xi1>
    %305 = arith.select %304, %293, %260 : vector<8x32xi1>, vector<8x32xf32>
    %c6_i32_71 = arith.constant 6 : i32
    %c1_i32_72 = arith.constant 1 : i32
    %306 = arith.select %0, %c6_i32_71, %c1_i32_72 : i32
    %307 = arith.addi %9, %306 : i32
    %308 = vector.extract_strided_slice %29 {offsets = [0, 6, 0], sizes = [8, 1, 96], strides = [1, 1, 1]} : vector<8x8x96xf32> to vector<8x1x96xf32>
    %309 = vector.shape_cast %308 : vector<8x1x96xf32> to vector<8x96xf32>
    %cst_73 = arith.constant dense<0.000000e+00> : vector<8x96xf32>
    %310 = tpu.matmul %305, %31, %cst_73 {dimension_numbers = #tpu.dot_dimension_numbers<[1], [0], [0], [1], [0, 0, 1, 1], [], []>} : vector<8x32xf32>, vector<32x96xf32>, vector<8x96xf32> -> vector<8x96xf32>
    %311 = vector.broadcast %33 : vector<1x96xf32> to vector<8x96xf32>
    %312 = arith.addf %310, %311 : vector<8x96xf32>
    %313 = vector.extract_strided_slice %309 {offsets = [0, 0], sizes = [8, 32], strides = [1, 1]} : vector<8x96xf32> to vector<8x32xf32>
    %314 = vector.extract_strided_slice %312 {offsets = [0, 0], sizes = [8, 32], strides = [1, 1]} : vector<8x96xf32> to vector<8x32xf32>
    %315 = arith.addf %313, %314 : vector<8x32xf32>
    %316 = arith.negf %315 : vector<8x32xf32>
    %317 = math.exp %316 : vector<8x32xf32>
    %cst_74 = arith.constant 1.000000e+00 : f32
    %318 = vector.broadcast %cst_74 : f32 to vector<8x32xf32>
    %319 = arith.addf %318, %317 : vector<8x32xf32>
    %320 = arith.divf %318, %319 : vector<8x32xf32>
    %321 = vector.extract_strided_slice %309 {offsets = [0, 32], sizes = [8, 32], strides = [1, 1]} : vector<8x96xf32> to vector<8x32xf32>
    %322 = vector.extract_strided_slice %312 {offsets = [0, 32], sizes = [8, 32], strides = [1, 1]} : vector<8x96xf32> to vector<8x32xf32>
    %323 = arith.addf %321, %322 : vector<8x32xf32>
    %324 = arith.negf %323 : vector<8x32xf32>
    %325 = math.exp %324 : vector<8x32xf32>
    %cst_75 = arith.constant 1.000000e+00 : f32
    %326 = vector.broadcast %cst_75 : f32 to vector<8x32xf32>
    %327 = arith.addf %326, %325 : vector<8x32xf32>
    %328 = arith.divf %326, %327 : vector<8x32xf32>
    %329 = vector.extract_strided_slice %309 {offsets = [0, 64], sizes = [8, 32], strides = [1, 1]} : vector<8x96xf32> to vector<8x32xf32>
    %330 = vector.extract_strided_slice %312 {offsets = [0, 64], sizes = [8, 32], strides = [1, 1]} : vector<8x96xf32> to vector<8x32xf32>
    %331 = arith.mulf %320, %330 : vector<8x32xf32>
    %332 = arith.addf %329, %331 : vector<8x32xf32>
    %333 = math.tanh %332 : vector<8x32xf32>
    %cst_76 = arith.constant 1.000000e+00 : f32
    %334 = vector.broadcast %cst_76 : f32 to vector<8x32xf32>
    %335 = arith.subf %334, %328 : vector<8x32xf32>
    %336 = arith.mulf %335, %333 : vector<8x32xf32>
    %337 = arith.mulf %328, %305 : vector<8x32xf32>
    %338 = arith.addf %336, %337 : vector<8x32xf32>
    %339 = vector.broadcast %307 : i32 to vector<8x1xi32>
    %340 = arith.cmpi slt, %339, %34 : vector<8x1xi32>
    %cst_77 = arith.constant 0.000000e+00 : f32
    %341 = vector.shape_cast %340 : vector<8x1xi1> to vector<8x1xi1>
    %342 = vector.broadcast %341 : vector<8x1xi1> to vector<8x32xi1>
    %343 = vector.broadcast %cst_77 : f32 to vector<8x32xf32>
    %344 = arith.select %342, %338, %343 : vector<8x32xi1>, vector<8x32xf32>
    %c0_78 = arith.constant 0 : index
    %c6 = arith.constant 6 : index
    %c0_79 = arith.constant 0 : index
    %345 = vector.load %arg11[%c0_78, %c6, %c0_79] : memref<8x8x32xf32, #tpu.memory_space<vmem>>, vector<8x1x32xf32>
    %346 = vector.shape_cast %345 : vector<8x1x32xf32> to vector<8x32xf32>
    %347 = vector.shape_cast %344 : vector<8x32xf32> to vector<8x1x32xf32>
    tpu.vector_store %arg11[%c0_78, %c6, %c0_79], %347 {strides = array<i32>} : memref<8x8x32xf32, #tpu.memory_space<vmem>>, vector<8x1x32xf32>,
    %348 = vector.shape_cast %340 : vector<8x1xi1> to vector<8x1xi1>
    %349 = vector.broadcast %348 : vector<8x1xi1> to vector<8x32xi1>
    %350 = arith.select %349, %338, %305 : vector<8x32xi1>, vector<8x32xf32>
    %c7_i32_80 = arith.constant 7 : i32
    %c0_i32_81 = arith.constant 0 : i32
    %351 = arith.select %0, %c7_i32_80, %c0_i32_81 : i32
    %352 = arith.addi %9, %351 : i32
    %353 = vector.extract_strided_slice %29 {offsets = [0, 7, 0], sizes = [8, 1, 96], strides = [1, 1, 1]} : vector<8x8x96xf32> to vector<8x1x96xf32>
    %354 = vector.shape_cast %353 : vector<8x1x96xf32> to vector<8x96xf32>
    %cst_82 = arith.constant dense<0.000000e+00> : vector<8x96xf32>
    %355 = tpu.matmul %350, %31, %cst_82 {dimension_numbers = #tpu.dot_dimension_numbers<[1], [0], [0], [1], [0, 0, 1, 1], [], []>} : vector<8x32xf32>, vector<32x96xf32>, vector<8x96xf32> -> vector<8x96xf32>
    %356 = vector.broadcast %33 : vector<1x96xf32> to vector<8x96xf32>
    %357 = arith.addf %355, %356 : vector<8x96xf32>
    %358 = vector.extract_strided_slice %354 {offsets = [0, 0], sizes = [8, 32], strides = [1, 1]} : vector<8x96xf32> to vector<8x32xf32>
    %359 = vector.extract_strided_slice %357 {offsets = [0, 0], sizes = [8, 32], strides = [1, 1]} : vector<8x96xf32> to vector<8x32xf32>
    %360 = arith.addf %358, %359 : vector<8x32xf32>
    %361 = arith.negf %360 : vector<8x32xf32>
    %362 = math.exp %361 : vector<8x32xf32>
    %cst_83 = arith.constant 1.000000e+00 : f32
    %363 = vector.broadcast %cst_83 : f32 to vector<8x32xf32>
    %364 = arith.addf %363, %362 : vector<8x32xf32>
    %365 = arith.divf %363, %364 : vector<8x32xf32>
    %366 = vector.extract_strided_slice %354 {offsets = [0, 32], sizes = [8, 32], strides = [1, 1]} : vector<8x96xf32> to vector<8x32xf32>
    %367 = vector.extract_strided_slice %357 {offsets = [0, 32], sizes = [8, 32], strides = [1, 1]} : vector<8x96xf32> to vector<8x32xf32>
    %368 = arith.addf %366, %367 : vector<8x32xf32>
    %369 = arith.negf %368 : vector<8x32xf32>
    %370 = math.exp %369 : vector<8x32xf32>
    %cst_84 = arith.constant 1.000000e+00 : f32
    %371 = vector.broadcast %cst_84 : f32 to vector<8x32xf32>
    %372 = arith.addf %371, %370 : vector<8x32xf32>
    %373 = arith.divf %371, %372 : vector<8x32xf32>
    %374 = vector.extract_strided_slice %354 {offsets = [0, 64], sizes = [8, 32], strides = [1, 1]} : vector<8x96xf32> to vector<8x32xf32>
    %375 = vector.extract_strided_slice %357 {offsets = [0, 64], sizes = [8, 32], strides = [1, 1]} : vector<8x96xf32> to vector<8x32xf32>
    %376 = arith.mulf %365, %375 : vector<8x32xf32>
    %377 = arith.addf %374, %376 : vector<8x32xf32>
    %378 = math.tanh %377 : vector<8x32xf32>
    %cst_85 = arith.constant 1.000000e+00 : f32
    %379 = vector.broadcast %cst_85 : f32 to vector<8x32xf32>
    %380 = arith.subf %379, %373 : vector<8x32xf32>
    %381 = arith.mulf %380, %378 : vector<8x32xf32>
    %382 = arith.mulf %373, %350 : vector<8x32xf32>
    %383 = arith.addf %381, %382 : vector<8x32xf32>
    %384 = vector.broadcast %352 : i32 to vector<8x1xi32>
    %385 = arith.cmpi slt, %384, %34 : vector<8x1xi32>
    %cst_86 = arith.constant 0.000000e+00 : f32
    %386 = vector.shape_cast %385 : vector<8x1xi1> to vector<8x1xi1>
    %387 = vector.broadcast %386 : vector<8x1xi1> to vector<8x32xi1>
    %388 = vector.broadcast %cst_86 : f32 to vector<8x32xf32>
    %389 = arith.select %387, %383, %388 : vector<8x32xi1>, vector<8x32xf32>
    %c0_87 = arith.constant 0 : index
    %c7 = arith.constant 7 : index
    %c0_88 = arith.constant 0 : index
    %390 = vector.load %arg11[%c0_87, %c7, %c0_88] : memref<8x8x32xf32, #tpu.memory_space<vmem>>, vector<8x1x32xf32>
    %391 = vector.shape_cast %390 : vector<8x1x32xf32> to vector<8x32xf32>
    %392 = vector.shape_cast %389 : vector<8x32xf32> to vector<8x1x32xf32>
    tpu.vector_store %arg11[%c0_87, %c7, %c0_88], %392 {strides = array<i32>} : memref<8x8x32xf32, #tpu.memory_space<vmem>>, vector<8x1x32xf32>,
    %393 = vector.shape_cast %385 : vector<8x1xi1> to vector<8x1xi1>
    %394 = vector.broadcast %393 : vector<8x1xi1> to vector<8x32xi1>
    %395 = arith.select %394, %383, %350 : vector<8x32xi1>, vector<8x32xf32>
    %c0_89 = arith.constant 0 : index
    %c0_90 = arith.constant 0 : index
    %396 = vector.load %arg10[%c0_89, %c0_90] : memref<8x32xf32, #tpu.memory_space<vmem>>, vector<8x32xf32>
    tpu.vector_store %arg10[%c0_89, %c0_90], %395 {strides = array<i32>} : memref<8x32xf32, #tpu.memory_space<vmem>>, vector<8x32xf32>,
    %c0_91 = arith.constant 0 : index
    %c0_92 = arith.constant 0 : index
    %c0_93 = arith.constant 0 : index
    %397 = vector.load %arg11[%c0_91, %c0_92, %c0_93] : memref<8x8x32xf32, #tpu.memory_space<vmem>>, vector<8x8x32xf32>
    %398 = vector.extract_strided_slice %397 {offsets = [0, 7, 0], sizes = [8, 1, 32], strides = [1, 1, 1]} : vector<8x8x32xf32> to vector<8x1x32xf32>
    %399 = vector.extract_strided_slice %397 {offsets = [0, 6, 0], sizes = [8, 1, 32], strides = [1, 1, 1]} : vector<8x8x32xf32> to vector<8x1x32xf32>
    %400 = vector.extract_strided_slice %397 {offsets = [0, 5, 0], sizes = [8, 1, 32], strides = [1, 1, 1]} : vector<8x8x32xf32> to vector<8x1x32xf32>
    %401 = vector.extract_strided_slice %397 {offsets = [0, 4, 0], sizes = [8, 1, 32], strides = [1, 1, 1]} : vector<8x8x32xf32> to vector<8x1x32xf32>
    %402 = vector.extract_strided_slice %397 {offsets = [0, 3, 0], sizes = [8, 1, 32], strides = [1, 1, 1]} : vector<8x8x32xf32> to vector<8x1x32xf32>
    %403 = vector.extract_strided_slice %397 {offsets = [0, 2, 0], sizes = [8, 1, 32], strides = [1, 1, 1]} : vector<8x8x32xf32> to vector<8x1x32xf32>
    %404 = vector.extract_strided_slice %397 {offsets = [0, 1, 0], sizes = [8, 1, 32], strides = [1, 1, 1]} : vector<8x8x32xf32> to vector<8x1x32xf32>
    %405 = vector.extract_strided_slice %397 {offsets = [0, 0, 0], sizes = [8, 1, 32], strides = [1, 1, 1]} : vector<8x8x32xf32> to vector<8x1x32xf32>
    %406 = tpu.concatenate %398, %399, %400, %401, %402, %403, %404, %405 in 1 : vector<8x1x32xf32>, vector<8x1x32xf32>, vector<8x1x32xf32>, vector<8x1x32xf32>, vector<8x1x32xf32>, vector<8x1x32xf32>, vector<8x1x32xf32>, vector<8x1x32xf32> -> vector<8x8x32xf32>
    %407 = arith.select %0, %397, %406 : vector<8x8x32xf32>
    %c0_94 = arith.constant 0 : index
    %c0_95 = arith.constant 0 : index
    %c0_96 = arith.constant 0 : index
    %c0_97 = arith.constant 0 : index
    %408 = vector.load %arg8[%c0_94, %c0_95, %c0_96, %c0_97] : memref<1x8x8x32xf32, #tpu.memory_space<vmem>>, vector<1x8x8x32xf32>
    %409 = vector.shape_cast %408 : vector<1x8x8x32xf32> to vector<8x8x32xf32>
    %410 = vector.shape_cast %407 : vector<8x8x32xf32> to vector<1x8x8x32xf32>
    tpu.vector_store %arg8[%c0_94, %c0_95, %c0_96, %c0_97], %410 {strides = array<i32>} : memref<1x8x8x32xf32, #tpu.memory_space<vmem>>, vector<1x8x8x32xf32>,
    %c0_i32_98 = arith.constant 0 : i32
    %411 = arith.cmpi eq, %arg1, %c0_i32_98 : i32
    %412 = arith.extui %411 : i1 to i32
    %c0_i32_99 = arith.constant 0 : i32
    %413 = arith.cmpi ne, %412, %c0_i32_99 : i32
    scf.if %413 {
      %c0_100 = arith.constant 0 : index
      %c0_101 = arith.constant 0 : index
      %c0_102 = arith.constant 0 : index
      %414 = vector.load %arg9[%c0_100, %c0_101, %c0_102] : memref<1x8x32xf32, #tpu.memory_space<vmem>>, vector<1x8x32xf32>
      %415 = vector.shape_cast %414 : vector<1x8x32xf32> to vector<8x32xf32>
      %416 = vector.shape_cast %395 : vector<8x32xf32> to vector<1x8x32xf32>
      tpu.vector_store %arg9[%c0_100, %c0_101, %c0_102], %416 {strides = array<i32>} : memref<1x8x32xf32, #tpu.memory_space<vmem>>, vector<1x8x32xf32>,
    } else {
    }
    return
  }
  func.func @transform_0(%arg0: i32, %arg1: i32) -> (i32, i32) {
    %c0_i32 = arith.constant 0 : i32
    %c0_i32_0 = arith.constant 0 : i32
    %c0_i32_1 = arith.constant 0 : i32
    return %c0_i32, %c0_i32_0 : i32, i32
  }
  func.func @transform_1(%arg0: i32, %arg1: i32) -> (i32, i32, i32) {
    %c0_i32 = arith.constant 0 : i32
    %0 = arith.muli %arg0, %c0_i32 : i32
    %c2_i32 = arith.constant 2 : i32
    %1 = arith.muli %c2_i32, %arg0 : i32
    %c1_i32 = arith.constant 1 : i32
    %2 = arith.subi %c1_i32, %1 : i32
    %3 = arith.muli %2, %arg1 : i32
    %4 = arith.addi %0, %3 : i32
    %c0_i32_0 = arith.constant 0 : i32
    %c0_i32_1 = arith.constant 0 : i32
    %c0_i32_2 = arith.constant 0 : i32
    return %c0_i32_0, %4, %c0_i32_1 : i32, i32, i32
  }
  func.func @transform_2(%arg0: i32, %arg1: i32) -> (i32, i32, i32) {
    %c0_i32 = arith.constant 0 : i32
    %c0_i32_0 = arith.constant 0 : i32
    %c0_i32_1 = arith.constant 0 : i32
    return %arg0, %c0_i32, %c0_i32_0 : i32, i32, i32
  }
  func.func @transform_3(%arg0: i32, %arg1: i32) -> (i32, i32, i32) {
    %c0_i32 = arith.constant 0 : i32
    %c0_i32_0 = arith.constant 0 : i32
    %c0_i32_1 = arith.constant 0 : i32
    return %arg0, %c0_i32, %c0_i32_0 : i32, i32, i32
  }
  func.func @transform_4(%arg0: i32, %arg1: i32) -> (i32, i32, i32) {
    %c0_i32 = arith.constant 0 : i32
    %c0_i32_0 = arith.constant 0 : i32
    %c0_i32_1 = arith.constant 0 : i32
    return %arg0, %c0_i32, %c0_i32_0 : i32, i32, i32
  }
  func.func @transform_5(%arg0: i32, %arg1: i32) -> (i32, i32, i32) {
    %c0_i32 = arith.constant 0 : i32
    %c0_i32_0 = arith.constant 0 : i32
    %c0_i32_1 = arith.constant 0 : i32
    return %arg0, %c0_i32, %c0_i32_0 : i32, i32, i32
  }
  func.func @transform_6(%arg0: i32, %arg1: i32) -> (i32, i32, i32, i32) {
    %c0_i32 = arith.constant 0 : i32
    %0 = arith.muli %arg0, %c0_i32 : i32
    %c2_i32 = arith.constant 2 : i32
    %1 = arith.muli %c2_i32, %arg0 : i32
    %c1_i32 = arith.constant 1 : i32
    %2 = arith.subi %c1_i32, %1 : i32
    %3 = arith.muli %2, %arg1 : i32
    %4 = arith.addi %0, %3 : i32
    %c0_i32_0 = arith.constant 0 : i32
    %c0_i32_1 = arith.constant 0 : i32
    %c0_i32_2 = arith.constant 0 : i32
    return %arg0, %c0_i32_0, %4, %c0_i32_1 : i32, i32, i32, i32
  }
  func.func @transform_7(%arg0: i32, %arg1: i32) -> (i32, i32, i32) {
    %c0_i32 = arith.constant 0 : i32
    %c0_i32_0 = arith.constant 0 : i32
    %c0_i32_1 = arith.constant 0 : i32
    return %arg0, %c0_i32, %c0_i32_0 : i32, i32, i32
  }
}

</mosaic_0001>

<bundles_post_ra>
// kernel: tpu_custom_call.1
= control target key start
LH: loop header
LB: loop body
LE: loop exit
PB: predicated region body
PF: predicated region fallthrough
CT: control target
= control target key end

     0   :  { %s7408_s0 = inlined_call_operand.vmem [shape: s32[8,1], index: 0, kind: input, shape index: {}]   ;;  %s7409_s1 = inlined_call_operand.hbm [shape: f32[8,8,32], index: 1, kind: input, shape index: {}]   ;;  %s7410_s2 = inlined_call_operand.hbm [shape: f32[2,32,96], index: 2, kind: input, shape index: {}]   ;;  %s7411_s3 = inlined_call_operand.hbm [shape: f32[2,32,96], index: 3, kind: input, shape index: {}]   ;;  %s7412_s4 = inlined_call_operand.vmem [shape: f32[2,1,96], index: 4, kind: input, shape index: {}]   ;;  %s7413_s5 = inlined_call_operand.vmem [shape: f32[2,1,96], index: 5, kind: input, shape index: {}]   ;;  %s7414_s6 = inlined_call_operand.hbm [shape: f32[2,8,8,32], index: 6, kind: output, shape index: {0}]   ;;  %s7415_s7 = inlined_call_operand.hbm [shape: f32[2,8,32], index: 7, kind: output, shape index: {1}]  }
   0x1   :  { %7429 = sst [smem:[#allocation21_spill]] %s7410_s2 }
   0x2   :  { %13 = vsyncpa [#allocation5], 0 }
   0x3   :  { %15 = vsyncpa [#allocation5 + $0x1], 0 }
   0x4   :  { %16 = vsyncpa [#allocation8], 0 }
   0x5   :  { %18 = vsyncpa [#allocation8 + $0x1], 0 }
   0x6   :  { %19 = vsyncpa [#allocation6], 0 }
   0x7   :  { %21 = vsyncpa [#allocation6 + $0x1], 0 }
   0x8   :  { %22 = vsyncpa [#allocation12], 0 }
   0x9   :  { %24 = vsyncpa [#allocation12 + $0x1], 0  ;;  %s5600_s24 = smov 0   ;;  %s5602_s25 = smov 0  }
   0xa   :  { %s5604_s26 = smov 0   ;;  %s5606_s27 = smov 0  }
   0xb   :  { %s5608_s28 = smov 0   ;;  %s5610_s29 = smov 0  }
   0xc LB: > { %7430 = sst [smem:[#allocation17_spill]] %s5529_s26  ;;  %s5631_s30 = sadd.s32 4294967295, %s5541_s29   ;;  %s5541_s29 = sphi %s5610_s29, %s30_s29   ;;  %s5537_s28 = sphi %s5608_s28, %s7481_s28   ;;  %s5533_s27 = sphi %s5606_s27, %s7480_s27   ;;  %s5529_s26 = sphi %s5604_s26, %s7479_s26   ;;  %s5525_s25 = sphi %s5602_s25, %s7483_s25   ;;  %s5521_s24 = sphi %s5600_s24, %s7482_s24  }
   0xd   : > { %7431 = sst [smem:[#allocation18_spill]] %s5537_s28  ;;  %s4520_s8 = sadd.s32 4294967294, %s5541_s29  }
   0xe   : > { %s42_s9 = sadd.s32 1, %s5537_s28  ;;  %s102_s10 = sadd.s32 1, %s5529_s26 }
   0xf   : > { %p44_p0 = scmp.ge.s32.totalorder %s42_s9, 2  ;;  %p109_p1 = scmp.ne.s32.totalorder %s5529_s26, %s5525_s25 }
  0x10   : > { %p7421_p2 = scmp.eq.s32.totalorder %s5541_s29, 0  ;;  %p115_p3 = scmp.ne.s32.totalorder %s5525_s25, %s5521_s24 }
  0x11   : > { %s7485_s9 = smov (%p44_p0, %s42_s9), 0  ;;  %p7419_p5 = scmp.eq.s32.totalorder %s5631_s30, 0 }
  0x12   : > { %7432 = sst [smem:[#allocation19_spill]] %s7485_s9  ;;  %p5645_p4 = por %p7421_p2, %p109_p1 }
  0x13   : > { %s99_s12 = ssub.s32 %s5537_s28, %s7485_s9  ;;  %p225_p6 = scmp.eq.s32.totalorder %s5631_s30, 1 }
  0x14   : > { %p100_p7 = scmp.eq.s32.totalorder %s99_s12, 0  ;;  %p5655_p8 = por %p7419_p5, %p115_p3 }
  0x15   : > { %p5659_p9 = por %p225_p6, %p109_p1  ;;  %p231_p10 = scmp.eq.s32.totalorder %s4520_s8, 1 }
  0x16   : > { %s7434_s13 = scalar_select %p5655_p8, 1, 0 }
  0x17   : > { %s7435_s14 = scalar_select %p5659_p9, 1, 0 }
  0x18   : > { %s5664_s15 = scalar_select %p100_p7, %s5529_s26, %s102_s10  }
  0x19   : > { %p5666_p11 = por %p231_p10, %p115_p3  ;;  %p7420_p13 = scmp.lt.s32.totalorder %s5541_s29, 2 }
  0x1a   : > { %7436 = sst [smem:[#allocation20_spill]] %s5664_s15  ;;  %s303_s17 = sand.u32 1, %s5541_s29  }
  0x1b   : > { %s7437_s16 = scalar_select %p5666_p11, 1, 0 }
  0x1c   : > { %s305_s18 = sand.u32 1, %s5529_s26   ;;  %s4632_s20 = sshll.u32 %s5537_s28, 9 }
  0x1d   : > { %s4529_s19 = sshll.u32 %s305_s18, 5  ;;  %s7438_s2 = sld [smem:[#allocation21_spill]] }
  0x1e   : > { %s307_s8 = scalar_lea.vmem [#allocation7], %s4529_s19  ;;  %p5686_p0 = pnand %p7420_p13, %p5645_p4 }
  0x1f   : > { %s314_s10 = sshll.u32 %s307_s8, 4  ;;  %s5693_s21 = scalar_lea.hbm %s7411_s3, %s4632_s20  ;;  %s5680_s10 = int_to_ptr.vmem [resolvable:$true] %s314_s10 }
  0x20   : > { %s328_s22 = scalar_lea.vmem [#allocation9], %s4529_s19  ;;  %s5697_s8 = scalar_lea.sflag [#allocation8], %s303_s17 }
  0x21   : > { %s5695_s28 = sshll.u32 %s328_s22, 4  ;;  %p5337_p3 = pneg %p5686_p0  ;;  %s5729_s28 = int_to_ptr.vmem [resolvable:$true] %s5695_s28 }
  0x23   : > { %s5678_s23 = scalar_lea.hbm %s7438_s2, %s4632_s20  ;;  %s5340_s9 = scalar_lea.hbm %s7438_s2, 1024 }
  0x24   : > { %s5335_s15 = scalar_lea.hbm %s5678_s23, 512  ;;  %p5341_p7 = scmp.lt.u32.totalorder %s5678_s23, %s7438_s2 }
  0x25   : > { %p5336_p1 = scmp.ne.s32.totalorder %s5678_s23, %s5335_s15  ;;  %p5342_p10 = scmp.lt.u32.totalorder %s5340_s9, %s5335_s15 }
  0x26   : > { %p5344_p5 = scmp.lt.u32.totalorder %s5335_s15, %s5678_s23 }
  0x27   : > { %p5338_p4 = pnand %p5337_p3, %p5336_p1  ;;  %p5343_p12 = por %p5342_p10, %p5341_p7 }
  0x29   : > { %p5339_p6 = pneg %p5338_p4  ;;  %p5345_p13 = por %p5344_p5, %p5343_p12 }
  0x2b   : > { %p5346_p2 = pnand %p5345_p13, %p5339_p6 }
  0x2d   : > { %5349 = shalt.err (!%p5346_p2)
}
  0x2e   : > { %s5350_s17 = scalar_lea.vmem %s5680_s10, 512  ;;  %s5543_s26 = smov [#allocation7]  }
  0x2f   : > { %p5351_p1 = scmp.ne.s32.totalorder %s5680_s10, %s5350_s17  ;;  %s5355_s19 = sshll.u32 %s5543_s26, 4  ;;  %s5356_s19 = int_to_ptr.vmem [resolvable:$false] %s5355_s19 }
  0x30   : > { %s5357_s22 = scalar_lea.vmem %s5356_s19, 1024  ;;  %p5358_p9 = scmp.lt.s32.totalorder %s5680_s10, %s5356_s19 }
  0x31   : > { %p5353_p4 = pnand %p5351_p1, %p5337_p3  ;;  %p5359_p7 = scmp.lt.s32.totalorder %s5357_s22, %s5350_s17 }
  0x33   : > { %p5354_p11 = pneg %p5353_p4  ;;  %p5360_p10 = por %p5359_p7, %p5358_p9 }
  0x35   : > { %p5361_p5 = pnand %p5360_p10, %p5354_p11 }
  0x37   : > { %5364 = shalt.err (!%p5361_p5)
}
  0x38   : > { %s7423_s15 = smov 128   ;;  %s5545_s11 = smov 8  }
  0x39   : > { %4869 = dma.hbm_to_vmem [thread:$0]  (!%p5686_p0), %s5678_s23, 512, %s5680_s10, %s5697_s8, %s7423_s15, %s7423_s15, %s5545_s11  }
  0x3a   : > { %p4535_p2 = scmp.ge.s32.totalorder %s5541_s29, 1  ;;  %p355_p9 = scmp.lt.s32.totalorder %s5541_s29, 3 }
  0x3b   : > { %s5546_s18 = smov [#allocation4]   ;;  %p7441_p12 = scmp.eq.s32.totalorder %s5541_s29, 0 }
  0x3c   : > { %p5733_p11 = pnand %p4535_p2, %p355_p9  ;;  %s293_s20 = sshll.u32 %s5546_s18, 4  ;;  %s5737_s20 = int_to_ptr.vmem [resolvable:$true] %s293_s20 }
  0x3d   : > { %p7442_p13 = scmp.lt.s32.totalorder %s5541_s29, 2  ;;  %s5365_s23 = scalar_lea.hbm %s5693_s21, 512 }
  0x3e   : > { %s7440_s9 = scalar_select %p5733_p11, 1, 0 }
  0x3f   : > { %p5743_p6 = pnand %p7442_p13, %p7441_p12  ;;  %p5366_p1 = scmp.ne.s32.totalorder %s5693_s21, %s5365_s23 }
  0x40   : > { %s5370_s19 = scalar_lea.hbm %s7411_s3, 1024  ;;  %p5371_p10 = scmp.lt.u32.totalorder %s5693_s21, %s7411_s3 }
  0x41   : > { %p5368_p4 = pnand %p5366_p1, %p5337_p3  ;;  %p5372_p5 = scmp.lt.u32.totalorder %s5370_s19, %s5365_s23 }
  0x42   : > { %p5374_p9 = scmp.lt.u32.totalorder %s5365_s23, %s5693_s21 }
  0x43   : > { %p5369_p7 = pneg %p5368_p4  ;;  %p5373_p2 = por %p5372_p5, %p5371_p10 }
  0x45   : > { %p5375_p12 = por %p5374_p9, %p5373_p2 }
  0x47   : > { %p5376_p13 = pnand %p5375_p12, %p5369_p7 }
  0x49   : > { %5379 = shalt.err (!%p5376_p13)
}
  0x4a   : > { %s5380_s15 = scalar_lea.vmem %s5729_s28, 512  ;;  %s5547_s10 = smov [#allocation9]  }
  0x4b   : > { %p5381_p1 = scmp.ne.s32.totalorder %s5729_s28, %s5380_s15  ;;  %s5385_s26 = sshll.u32 %s5547_s10, 4  ;;  %s5386_s26 = int_to_ptr.vmem [resolvable:$false] %s5385_s26 }
  0x4c   : > { %s5387_s22 = scalar_lea.vmem %s5386_s26, 1024  ;;  %p5388_p11 = scmp.lt.s32.totalorder %s5729_s28, %s5386_s26 }
  0x4d   : > { %p5383_p4 = pnand %p5381_p1, %p5337_p3  ;;  %p5389_p10 = scmp.lt.s32.totalorder %s5387_s22, %s5380_s15 }
  0x4f   : > { %p5384_p8 = pneg %p5383_p4  ;;  %p5390_p5 = por %p5389_p10, %p5388_p11 }
  0x51   : > { %p5391_p2 = pnand %p5390_p5, %p5384_p8 }
  0x53   : > { %5394 = shalt.err (!%p5391_p2)
}
  0x54   : > { %s7444_s23 = smov 128   ;;  %s5395_s10 = scalar_lea.hbm %s7409_s1, 1024 }
  0x55   : > { %4872 = dma.hbm_to_vmem [thread:$0]  (!%p5686_p0), %s5693_s21, 512, %s5729_s28, %s5697_s8, %s7444_s23, %s7444_s23, %s5545_s11  }
  0x56   : > { %p5396_p3 = scmp.ne.s32.totalorder %s7409_s1, %s5395_s10  ;;  %p5397_p8 = pneg %p5743_p6 }
  0x57   : > { %p5402_p9 = scmp.lt.u32.totalorder %s5395_s10, %s7409_s1 }
  0x58   : > { %p5398_p11 = pnand %p5397_p8, %p5396_p3 }
  0x5a   : > { %p5399_p7 = pneg %p5398_p11 }
  0x5c   : > { %p5404_p12 = pnand %p5402_p9, %p5399_p7 }
  0x5e   : > { %5407 = shalt.err (!%p5404_p12)
}
  0x5f   : > { %s5408_s28 = scalar_lea.vmem %s5737_s20, 1024  ;;  %s5415_s2 = scalar_lea.vmem %s5737_s20, 2048 }
  0x60   : > { %p5409_p0 = scmp.ne.s32.totalorder %s5737_s20, %s5408_s28  ;;  %p5416_p4 = scmp.lt.s32.totalorder %s5737_s20, %s5737_s20 }
  0x61   : > { %p5417_p10 = scmp.lt.s32.totalorder %s5415_s2, %s5408_s28 }
  0x62   : > { %p5411_p13 = pnand %p5409_p0, %p5397_p8 }
  0x63   : > { %p5418_p5 = por %p5417_p10, %p5416_p4 }
  0x64   : > { %p5412_p1 = pneg %p5411_p13 }
  0x66   : > { %p5419_p2 = pnand %p5418_p5, %p5412_p1 }
  0x68   : > { %5422 = shalt.err (!%p5419_p2)
}
  0x69   : > { %4866 = dma.hbm_to_vmem [thread:$0]  (!%p5743_p6), %s7409_s1, 1024, %s5737_s20, [#allocation5], %s7444_s23, %s7444_s23, %s5545_s11  }
  0x6a   : > { %p7445_p3 = scmp.ne.s32.totalorder %s7440_s9, 0 }
  0x6b   : > { %p7446_p8 = scmp.eq.s32.totalorder (!%p7445_p3), %s5631_s30, 0 }
  0x6c   : > { %359 = sbr.rel (%p7445_p3) target bundleno = 5986 (0x1762), region = 44 }
  0x73   : > { %5504 = dma.done.wait (%p7446_p8), [#allocation5], 1024   ;;  %p7447_p11 = pmov %p7446_p8 }
  0x74   : > { %s370_s17 = sand.u32 1, %s5631_s30   ;;  %s5807_s22 = sand.u32 1, %s5525_s25  }
  0x75   : > { %5506 = vsyncadd (%p7447_p11), [#allocation5], 4294966272  ;;  %s4537_s19 = sshll.u32 %s5807_s22, 5  ;;  %s371_s18 = scalar_lea.sflag [#allocation8], %s370_s17 }
  0x76   : > { %s374_s10 = scalar_lea.vmem [#allocation7], %s4537_s19  ;;  %p7448_p6 = scmp.ne.s32.totalorder %s7434_s13, 0 }
  0x78   : > { %5508 = dma.done.wait (%p7448_p6), %s371_s18, 1024  }
  0x79   : > { %5510 = vsyncadd (%p7448_p6), %s371_s18, 4294966272  ;;  %vm452_vm0 = vcmask 261120   ;;  %v5548_v0 = vmov 0.0|0.0   ;;  %v5549_v1 = vmov 0.0   ;;  %vm5550_vm1 = vmmov 0   ;;  %v466_v2 = vld [vmem:[%s374_s10] sm:$0xff] }
  0x7a   : > { %4803 = vmatprep.subr.bf16.mxu1 %v5548_v0  ;;  %453 = vst.msk [vmem:[#allocation2] sm:$0xff] %vm452_vm0, %v5549_v1  ;;  %4715 = vmatprep.mubr.msk.f32.mxu1 %vm5550_vm1, %v5549_v1  ;;  %v467_v3 = vld [vmem:[%s374_s10 + $0x8] sm:$0xff]  ;;  %s383_s30 = scalar_lea.vmem [#allocation9], %s4537_s19  ;;  %v468_v7 = vld [vmem:[%s374_s10 + $0x10] sm:$0xff]  ;;  %v469_v8 = vld [vmem:[%s374_s10 + $0x18] sm:$0xff]  ;;  %p438_p7 = scmp.lt.s32.totalorder %s5533_s27, 1 }
  0x7b   : > { %v753_v4 = vld [vmem:[%s383_s30] sm:$0xff]  ;;  %v4795_v5 = vpack.c.bf16 %v467_v3, %v466_v2  ;;  %v754_v6 = vld [vmem:[%s383_s30 + $0x8] sm:$0xff]  ;;  %v4799_v10 = vpack.c.bf16 %v469_v8, %v468_v7  ;;  %v755_v11 = vld [vmem:[%s383_s30 + $0x10] sm:$0xff]  ;;  %s5551_s23 = smov 64   ;;  %vm679_vm2 = vcmask 1040384   ;;  %vm688_vm3 = vcmask 1041408  }
  0x7c   : > { %v5819_v9 = vpack.c.bf16 %v754_v6, %v753_v4  ;;  %v756_v12 = vld [vmem:[%s383_s30 + $0x18] sm:$0xff]  ;;  %v458_v13 = vld [vmem:[#allocation4] sm:$0xff]  ;;  %v459_v16 = vld [vmem:[#allocation4 + $0x8] sm:$0xff]  ;;  %s5854_s13 = scalar_select %p438_p7, %s5533_s27, 1  ;;  %vm697_vm4 = vcmask 1042432   ;;  %vm706_vm5 = vcmask 1043456  }
  0x7d   : > { %4796 = vmatprep.subr.bf16.mxu0 %v4795_v5  ;;  %4695 = vmatprep.mubr.msk.f32.mxu0 %vm452_vm0, %v458_v13  ;;  %v5823_v14 = vpack.c.bf16 %v756_v12, %v755_v11  ;;  %v460_v17 = vld [vmem:[#allocation4 + $0x10] sm:$0xff]  ;;  %v461_v18 = vld [vmem:[#allocation4 + $0x18] sm:$0xff]  ;;  %v462_v19 = vld [vmem:[#allocation4 + $0x20] sm:$0xff]  ;;  %p447_p9 = scmp.eq.s32.totalorder %s5533_s27, 0  ;;  %vm7428_vm6 = vcmask 1044480   ;;  %vm7427_vm7 = vcmask 1045504  }
  0x7e   : > { %4805 = vmatpush3.bf16.msra.mxu1 %v5819_v9  ;;  %4798 = vmatpush3.bf16.msra.mxu0 %v4795_v5  ;;  %v463_v20 = vld [vmem:[#allocation4 + $0x28] sm:$0xff]  ;;  %v464_v21 = vld [vmem:[#allocation4 + $0x30] sm:$0xff]  ;;  %v465_v22 = vld [vmem:[#allocation4 + $0x38] sm:$0xff]  ;;  %s5860_s20 = scalar_lea.vmem %s7413_s5, %s5854_s13  ;;  %s440_s15 = scalar_lea.vmem %s7412_s4, %s5854_s13  ;;  %vm7426_vm8 = vcmask 1046528   ;;  %vm1104_vm11 = vcmask 1041409   ;;  %vm1107_vm12 = vcmask 1042434  }
  0x7f   : > { %4806 = vmatprep.subr.bf16.mxu1 %v5548_v0  ;;  %4800 = vmatprep.subr.bf16.mxu0 %v4799_v10  ;;  %v5863_v23 = vld [vmem:[%s5860_s20] ss:$0 sm:$0xff]  ;;  %s742_s28 = scalar_select %p447_p9, 1, 0  ;;  %vm1110_vm13 = vcmask 1043459   ;;  %vm1113_vm14 = vcmask 1044484  }
  0x80   : > { %v5906_v42 = vld [vmem:[%s440_s15] ss:$0 sm:$0xff]  ;;  %s5552_s2 = smov 32   ;;  %s5553_s21 = smov 96   ;;  %vm1116_vm15 = vcmask 1045509  }
  0x81   : > { %v5827_v15 = vld [vmem:[#allocation2] sm:$0xff]  ;;  %s760_s8 = scalar_select %p447_p9, 0, 7 }
  0x82   : > { %4808 = vmatpush3.bf16.msra.mxu1 %v5823_v14  ;;  %4802 = vmatpush3.bf16.msra.mxu0 %v4799_v10  ;;  %s1196_s18 = scalar_select %p447_p9, 1, 6 }
  0x83   : > { %4809 = vmatprep.subr.bf16.mxu1 %v5548_v0  ;;  %4815 = vmatprep.subr.bf16.mxu0 %v5548_v0  ;;  %s1618_s10 = scalar_select %p447_p9, 2, 5 }
  0x84   : > { %s2040_s11 = scalar_select %p447_p9, 3, 4 }
  0x85   : > { %4716 = vmatmul.mubr.msk.f32.vlgmr.msra.gmra.mrb[0].mxu1 %vm452_vm0, %v5827_v15  ;;  %4696 = vmatmul.mubr.msk.f32.vlgmr.msra.gmra.mrb[0].mxu0 %vm452_vm0, %v459_v16  ;;  %s2462_s9 = scalar_select %p447_p9, 4, 3 }
  0x86   : > { %4698 = vmatprep.mubr.msk.f32.mxu0 %vm452_vm0, %v460_v17  ;;  %4811 = vmatpush3.bf16.msra.mxu1 %v5819_v9  ;;  %s3306_s15 = scalar_select %p447_p9, 6, 1 }
  0x87   : > { %4812 = vmatprep.subr.bf16.mxu1 %v5548_v0  ;;  %4726 = vmatprep.mubr.msk.f32.mxu1 %vm5550_vm1, %v5549_v1  ;;  %p7451_p0 = scmp.ne.s32.totalorder %s7435_s14, 0  ;;  %s5556_s13 = smov [#allocation11]  }
  0x88   : > { %4817 = vmatpush3.bf16.msra.mxu0 %v5819_v9 }
  0x89   : > { %4699 = vmatmul.mubr.msk.f32.gmra.mrb[2].mxu0 %vm452_vm0, %v461_v18  ;;  %4818 = vmatprep.subr.bf16.mxu0 %v5548_v0 }
  0x8a   : > { %4701 = vmatprep.mubr.msk.f32.mxu0 %vm452_vm0, %v462_v19  ;;  %4814 = vmatpush3.bf16.msra.mxu1 %v5823_v14 }
  0x8b   : > { %4821 = vmatprep.subr.bf16.mxu1 %v5548_v0 }
  0x8c   : > { %4820 = vmatpush3.bf16.msra.mxu0 %v5823_v14 }
  0x8d   : > { %4702 = vmatmul.mubr.msk.f32.gmra.mrb[4].mxu0 %vm452_vm0, %v463_v20  ;;  %4827 = vmatprep.subr.bf16.mxu0 %v5548_v0 }
  0x8e   : > { %4704 = vmatprep.mubr.msk.f32.mxu0 %vm452_vm0, %v464_v21 }
  0x91   : > { %4705 = vmatmul.mubr.msk.f32.gmra.mrb[6].mxu0 %vm452_vm0, %v465_v22 }
  0x92   : > { %4737 = vmatprep.mubr.msk.f32.mxu0 %vm5550_vm1, %v5549_v1 }
 0x158   : > { %v837_v24 = vpop.f32.mrb[0].mxu1  ;;  %v4697_v25 = vpop.f32.mrb[0].mxu0 }
 0x159   : > { %v5866_v26 = vadd.f32 %v5863_v23, %v837_v24  ;;  %v4717_v27 = vpop.f32.mrb[1].mxu1  ;;  %v568_v28 = vpop.f32.mrb[1].mxu0  ;;  %v5912_v44 = vadd.f32 %v4697_v25, %v5906_v42  ;;  %v743_v24 = vstv %s742_s28  ;;  %s4540_s28 = sshll.u32 %s5807_s22, 3 }
 0x15a   : > { %v5909_v43 = vadd.f32 %v5906_v42, %v568_v28  ;;  %vm5970_vm9 = vcmp.eq.s32.totalorder %v743_v24, 1 }
 0x15b   : > { %913 = vrot.lane.b32.xlu1 %v5866_v26, %s5551_s23  ;;  %v842_v30 = vrot.slane %v5866_v26, 1  ;;  %v844_v32 = vrot.slane %v5866_v26, 3  ;;  %v843_v34 = vrot.slane %v5866_v26, 2  ;;  %v846_v38 = vrot.slane %v5866_v26, 5 }
 0x15c   : > { %v4700_v29 = vpop.f32.mrb[2].mxu0  ;;  %v845_v39 = vrot.slane %v5866_v26, 4  ;;  %v848_v40 = vrot.slane %v5866_v26, 7  ;;  %v847_v41 = vrot.slane %v5866_v26, 6  ;;  %v615_v45 = vrot.slane %v5909_v43, 7 }
 0x15d   : > { %v578_v31 = vpop.f32.mrb[3].mxu0  ;;  %915 = vrot.lane.b32.xlu0 %v842_v30, %s5551_s23  ;;  %v631_v46 = vrot.slane %v5909_v43, 5  ;;  %v616_v47 = vrot.slane %v5912_v44, 7  ;;  %v632_v48 = vrot.slane %v5912_v44, 5  ;;  %v647_v49 = vrot.slane %v5909_v43, 3 }
 0x15e   : > { %v5921_v51 = vadd.f32 %v5906_v42, %v578_v31  ;;  %v648_v52 = vrot.slane %v5912_v44, 3  ;;  %v663_v53 = vrot.slane %v5909_v43, 1  ;;  %v5928_v56 = vadd.f32 %v4700_v29, %v5906_v42 }
 0x15f   : > { %919 = vrot.lane.b32.xlu1 %v844_v32, %s5551_s23  ;;  %v680_v50 = vsel %vm679_vm2, %v615_v45, %v631_v46  ;;  %v681_v54 = vsel %vm679_vm2, %v616_v47, %v632_v48  ;;  %v664_v59 = vrot.slane %v5912_v44, 1 }
 0x160   : > { %v4703_v33 = vpop.f32.mrb[4].mxu0  ;;  %v689_v55 = vsel %vm688_vm3, %v680_v50, %v647_v49  ;;  %v617_v57 = vrot.slane %v5921_v51, 7  ;;  %v633_v58 = vrot.slane %v5921_v51, 5  ;;  %v690_v60 = vsel %vm688_vm3, %v681_v54, %v648_v52 }
 0x161   : > { %v588_v35 = vpop.f32.mrb[5].mxu0  ;;  %917 = vrot.lane.b32.xlu0 %v843_v34, %s5551_s23  ;;  %v698_v61 = vsel %vm697_vm4, %v689_v55, %v663_v53  ;;  %v618_v62 = vrot.slane %v5928_v56, 7  ;;  %v634_v63 = vrot.slane %v5928_v56, 5  ;;  %v649_v2 = vrot.slane %v5921_v51, 3 }
 0x162   : > { %v682_v3 = vsel %vm679_vm2, %v617_v57, %v633_v58  ;;  %v5941_v4 = vadd.f32 %v4703_v33, %v5906_v42  ;;  %v699_v5 = vsel %vm697_vm4, %v690_v60, %v664_v59  ;;  %v707_v6 = vsel %vm706_vm5, %v698_v61, %v615_v45 }
 0x163   : > { %923 = vrot.lane.b32.xlu1 %v846_v38, %s5551_s23  ;;  %v650_v7 = vrot.slane %v5928_v56, 3  ;;  %v665_v8 = vrot.slane %v5921_v51, 1  ;;  %v683_v10 = vsel %vm679_vm2, %v618_v62, %v634_v63  ;;  %v691_v11 = vsel %vm688_vm3, %v682_v3, %v649_v2 }
 0x164   : > { %v5882_v36 = vpop.f32.mrb[6].mxu0  ;;  %v708_v12 = vsel %vm706_vm5, %v699_v5, %v616_v47  ;;  %v716_v13 = vsel %vm7428_vm6, %v707_v6, %v631_v46  ;;  %v620_v16 = vrot.slane %v5941_v4, 7  ;;  %v636_v17 = vrot.slane %v5941_v4, 5 }
 0x165   : > { %v5884_v37 = vpop.f32.mrb[7].mxu0  ;;  %921 = vrot.lane.b32.xlu0 %v845_v39, %s5551_s23  ;;  %v666_v18 = vrot.slane %v5928_v56, 1  ;;  %v5957_v19 = vadd.f32 %v5906_v42, %v588_v35  ;;  %v692_v20 = vsel %vm688_vm3, %v683_v10, %v650_v7  ;;  %v700_v21 = vsel %vm697_vm4, %v691_v11, %v665_v8 }
 0x166   : > { %v717_v22 = vsel %vm7428_vm6, %v708_v12, %v632_v48  ;;  %v725_v25 = vsel %vm7427_vm7, %v716_v13, %v647_v49  ;;  %v652_v27 = vrot.slane %v5941_v4, 3  ;;  %v685_v28 = vsel %vm679_vm2, %v620_v16, %v636_v17 }
 0x167   : > { %927 = vrot.lane.b32.xlu1 %v848_v40, %s5551_s23  ;;  %v701_v29 = vsel %vm697_vm4, %v692_v20, %v666_v18  ;;  %v709_v31 = vsel %vm706_vm5, %v700_v21, %v617_v57  ;;  %v619_v33 = vrot.slane %v5957_v19, 7  ;;  %v635_v35 = vrot.slane %v5957_v19, 5 }
 0x168   : > { %v726_v45 = vsel %vm7427_vm7, %v717_v22, %v648_v52  ;;  %v734_v47 = vsel %vm7426_vm8, %v725_v25, %v663_v53  ;;  %v668_v48 = vrot.slane %v5941_v4, 1  ;;  %v694_v49 = vsel %vm688_vm3, %v685_v28, %v652_v27 }
 0x169   : > { %925 = vrot.lane.b32.xlu0 %v847_v41, %s5551_s23  ;;  %v710_v50 = vsel %vm706_vm5, %v701_v29, %v618_v62  ;;  %v718_v54 = vsel %vm7428_vm6, %v709_v31, %v633_v58  ;;  %v651_v55 = vrot.slane %v5957_v19, 3  ;;  %v735_v57 = vsel %vm7426_vm8, %v726_v45, %v664_v59 }
 0x16a   : > { %v5984_v52 = vsel %vm5970_vm9, %v5909_v43, %v734_v47  ;;  %v684_v60 = vsel %vm679_vm2, %v619_v33, %v635_v35  ;;  %v5989_v53 = vadd.f32 %v5882_v36, %v5906_v42  ;;  %v703_v61 = vsel %vm697_vm4, %v694_v49, %v668_v48 }
 0x16b   : > { %v719_v62 = vsel %vm7428_vm6, %v710_v50, %v634_v63  ;;  %v727_v58 = vsel %vm7427_vm7, %v718_v54, %v649_v2  ;;  %v667_v3 = vrot.slane %v5957_v19, 1  ;;  %v5997_v59 = vadd.f32 %v5906_v42, %v5884_v37 }
 0x16c   : > { %v6002_v43 = vsel %vm5970_vm9, %v5912_v44, %v735_v57  ;;  %v693_v36 = vsel %vm688_vm3, %v684_v60, %v651_v55  ;;  %v857_v5 = vadd.f32 %v5866_v26, %v5984_v52  ;;  %v712_v63 = vsel %vm706_vm5, %v703_v61, %v620_v16 }
 0x16d   : > { %v622_v2 = vrot.slane %v5989_v53, 7  ;;  %v638_v6 = vrot.slane %v5989_v53, 5  ;;  %v728_v10 = vsel %vm7427_vm7, %v719_v62, %v650_v7  ;;  %v736_v37 = vsel %vm7426_vm8, %v727_v58, %v665_v8 }
 0x16e   : > { %v858_v42 = vadd.f32 %v842_v30, %v6002_v43  ;;  %v702_v44 = vsel %vm697_vm4, %v693_v36, %v667_v3  ;;  %v621_v11 = vrot.slane %v5997_v59, 7  ;;  %v637_v12 = vrot.slane %v5997_v59, 5 }
 0x16f   : > { %v721_v13 = vsel %vm7428_vm6, %v712_v63, %v636_v17  ;;  %v654_v16 = vrot.slane %v5989_v53, 3  ;;  %v4553_v20 = vmul.f32 -1.442695, %v857_v5  ;;  %v737_v21 = vsel %vm7426_vm8, %v728_v10, %v666_v18 }
 0x170   : > { %v6024_v7 = vsel %vm5970_vm9, %v5921_v51, %v736_v37  ;;  %v687_v30 = vsel %vm679_vm2, %v622_v2, %v638_v6  ;;  %v711_v8 = vsel %vm706_vm5, %v702_v44, %v619_v33  ;;  %v653_v22 = vrot.slane %v5997_v59, 3 }
 0x171   : > { %v4554_v24 = vmul.f32 -1.442695, %v858_v42  ;;  %v730_v25 = vsel %vm7427_vm7, %v721_v13, %v652_v27  ;;  %v670_v17 = vrot.slane %v5989_v53, 1  ;;  %v686_v28 = vsel %vm679_vm2, %v621_v11, %v637_v12 }
 0x172   : > { %v6035_v18 = vsel %vm5970_vm9, %v5928_v56, %v737_v21  ;;  %v859_v51 = vadd.f32 %v843_v34, %v6024_v7  ;;  %v696_v29 = vsel %vm688_vm3, %v687_v30, %v654_v16  ;;  %4947 = vpow2.f32 %v4553_v20 }
 0x173   : > { %v720_v31 = vsel %vm7428_vm6, %v711_v8, %v635_v35  ;;  %v669_v27 = vrot.slane %v5997_v59, 1  ;;  %v739_v33 = vsel %vm7426_vm8, %v730_v25, %v668_v48  ;;  %v695_v45 = vsel %vm688_vm3, %v686_v28, %v653_v22 }
 0x174   : > { %4949 = vpow2.f32 %v4554_v24  ;;  %v860_v56 = vadd.f32 %v844_v32, %v6035_v18  ;;  %v705_v47 = vsel %vm697_vm4, %v696_v29, %v670_v17  ;;  %v4555_v49 = vmul.f32 -1.442695, %v859_v51 }
 0x175   : > { %v729_v34 = vsel %vm7427_vm7, %v720_v31, %v651_v55  ;;  %v6053_v35 = vsel %vm5970_vm9, %v5941_v4, %v739_v33  ;;  %v704_v50 = vsel %vm697_vm4, %v695_v45, %v669_v27  ;;  %v714_v48 = vsel %vm706_vm5, %v705_v47, %v622_v2 }
 0x176   : > { %v4556_v54 = vmul.f32 -1.442695, %v860_v56  ;;  %v738_v57 = vsel %vm7426_vm8, %v729_v34, %v667_v3  ;;  %4951 = vpow2.f32 %v4555_v49  ;;  %v862_v32 = vadd.f32 %v846_v38, %v6053_v35 }
 0x177   : > { %v713_v60 = vsel %vm706_vm5, %v704_v50, %v621_v11  ;;  %v723_v55 = vsel %vm7428_vm6, %v714_v48, %v638_v6  ;;  %v6066_v4 = vsel %vm5970_vm9, %v5957_v19, %v738_v57 }
 0x178   : > { %4953 = vpow2.f32 %v4556_v54  ;;  %v722_v62 = vsel %vm7428_vm6, %v713_v60, %v637_v12  ;;  %v4558_v58 = vmul.f32 -1.442695, %v862_v32  ;;  %v732_v3 = vsel %vm7427_vm7, %v723_v55, %v654_v16 }
 0x179   : > { %v861_v38 = vadd.f32 %v845_v39, %v6066_v4  ;;  %v731_v63 = vsel %vm7427_vm7, %v722_v62, %v653_v22  ;;  %v741_v2 = vsel %vm7426_vm8, %v732_v3, %v670_v17  ;;  %v1041_v3 = vrot.slane %v5827_v15, 1 }
 0x17a   : > { %4955 = vpow2.f32 %v4558_v58  ;;  %v740_v10 = vsel %vm7426_vm8, %v731_v63, %v669_v27  ;;  %v6079_v42 = vsel %vm5970_vm9, %v5989_v53, %v741_v2  ;;  %v1045_v63 = vrot.slane %v5827_v15, 5 }
 0x17b   : > { %v4557_v19 = vmul.f32 -1.442695, %v861_v38  ;;  %v6084_v39 = vsel %vm5970_vm9, %v5997_v59, %v740_v10  ;;  %v864_v12 = vadd.f32 %v848_v40, %v6079_v42  ;;  %v1043_v38 = vrot.slane %v5827_v15, 3 }
 0x17c   : > { %v4948_v61 = vpop.eup %4947  ;;  %v863_v13 = vadd.f32 %v847_v41, %v6084_v39  ;;  %v1046_v2 = vrot.slane %v5827_v15, 6  ;;  %vm1122_vm8 = vcmask 1047559   ;;  %vm1186_vm6 = vcmask 253952  }
 0x17d   : > { %v889_v5 = vadd.f32 1.0, %v4948_v61  ;;  %v4560_v53 = vmul.f32 -1.442695, %v864_v12 }
 0x17e   : > { %v4950_v36 = vpop.eup %4949  ;;  %v4559_v30 = vmul.f32 -1.442695, %v863_v13 }
 0x17f   : > { %v890_v6 = vadd.f32 1.0, %v4950_v36  ;;  %4957 = vrcp.f32 %v889_v5  ;;  %v1042_v36 = vrot.slane %v5827_v15, 2  ;;  %v1044_v5 = vrot.slane %v5827_v15, 4 }
 0x180   : > { %v4952_v37 = vpop.eup %4951 }
 0x181   : > { %4959 = vrcp.f32 %v890_v6  ;;  %v891_v11 = vadd.f32 1.0, %v4952_v37 }
 0x182   : > { %v4954_v44 = vpop.eup %4953  ;;  %4961 = vpow2.f32 %v4557_v19 }
 0x183   : > { %v892_v16 = vadd.f32 1.0, %v4954_v44  ;;  %4963 = vrcp.f32 %v891_v11 }
 0x184   : > { %v4956_v20 = vpop.eup %4955 }
 0x185   : > { %4965 = vrcp.f32 %v892_v16  ;;  %v894_v22 = vadd.f32 1.0, %v4956_v20 }
 0x186   : > { %4967 = vpow2.f32 %v4560_v53 }
 0x187   : > { %4969 = vpow2.f32 %v4559_v30 }
 0x188   : > { %4971 = vrcp.f32 %v894_v22 }
 0x189   : > { %v6092_v21 = vpop.eup %4957 }
 0x18b   : > { %v6095_v24 = vpop.eup %4959 }
 0x18c   : > { %v4962_v40 = vpop.eup %4961 }
 0x18d   : > { %v893_v25 = vadd.f32 1.0, %v4962_v40  ;;  %v6100_v17 = vpop.eup %4963 }
 0x18f   : > { %v6103_v31 = vpop.eup %4965  ;;  %4973 = vrcp.f32 %v893_v25 }
 0x190   : > { %v4968_v27 = vpop.eup %4967 }
 0x191   : > { %v4970_v45 = vpop.eup %4969  ;;  %v896_v47 = vadd.f32 1.0, %v4968_v27 }
 0x192   : > { %v6108_v49 = vpop.eup %4971  ;;  %v895_v34 = vadd.f32 1.0, %v4970_v45 }
 0x193   : > { %4975 = vrcp.f32 %v896_v47  ;;  %v1088_v47 = vstv %s760_s8  ;;  %s434_s8 = scalar_lea.vmem [#allocation11], %s4540_s28 }
 0x194   : > { %4977 = vrcp.f32 %v895_v34  ;;  %s4346_s17 = sshll.u32 %s434_s8, 4  ;;  %s7140_s17 = int_to_ptr.vmem [resolvable:$true] %s4346_s17 }
 0x195   : > { %s5423_s30 = scalar_lea.vmem %s7140_s17, 128 }
 0x196   : > { %p5424_p12 = scmp.ne.s32.totalorder %s7140_s17, %s5423_s30 }
 0x198   : > { %p5425_p13 = pnand %p5424_p12, %p7451_p0 }
 0x199   : > { %v6112_v48 = vpop.eup %4973 }
 0x19a   : > { %p5426_p1 = pneg %p5425_p13 }
 0x19d   : > { %v6116_v32 = vpop.eup %4975 }
 0x19e   : > { %v6119_v61 = vpop.eup %4977 }
 0x1cd   : > { %v914_v59 = vpop.permute.xlu1 %913 }
 0x1ce   : > { %v937_v8 = vmul.f32 %v6092_v21, %v914_v59 }
 0x1cf   : > { %v916_v26 = vpop.permute.xlu0 %915 }
 0x1d0   : > { %953 = vrot.lane.b32.xlu0 %v937_v8, %s5551_s23  ;;  %v938_v41 = vmul.f32 %v6095_v24, %v916_v26  ;;  %v1047_v26 = vrot.slane %v5827_v15, 7 }
 0x1d1   : > { %v920_v28 = vpop.permute.xlu1 %919 }
 0x1d2   : > { %v940_v33 = vmul.f32 %v6103_v31, %v920_v28  ;;  %v5554_v28 = vmov 0  }
 0x1d3   : > { %v918_v51 = vpop.permute.xlu0 %917  ;;  %4945 = vset.pattern.permute.xlu0 %v5554_v28  ;;  %4946 = vset.pattern.permute.xlu1 %v5554_v28 }
 0x1d4   : > { %955 = vrot.lane.b32.xlu0 %v938_v41, %s5551_s23  ;;  %v939_v29 = vmul.f32 %v6100_v17, %v918_v51 }
 0x1d5   : > { %v924_v56 = vpop.permute.xlu1 %923 }
 0x1d6   : > { %957 = vrot.lane.b32.xlu1 %v939_v29, %s5551_s23  ;;  %v942_v50 = vmul.f32 %v6108_v49, %v924_v56  ;;  %v6161_v56 = vld [vmem:[%s7408_s0] sm:$0xff] }
 0x1d7   : > { %v922_v54 = vpop.permute.xlu0 %921  ;;  %vm1089_vm10 = vcmp.lt.s32.totalorder %v1088_v47, %v6161_v56 }
 0x1d8   : > { %v941_v57 = vmul.f32 %v6112_v48, %v922_v54 }
 0x1d9   : > { %v928_v60 = vpop.permute.xlu1 %927 }
 0x1da   : > { %959 = vrot.lane.b32.xlu1 %v940_v33, %s5551_s23  ;;  %961 = vrot.lane.b32.xlu0 %v941_v57, %s5551_s23  ;;  %v944_v55 = vmul.f32 %v6116_v32, %v928_v60 }
 0x1db   : > { %v926_v62 = vpop.permute.xlu0 %925 }
 0x1dc   : > { %v943_v58 = vmul.f32 %v6119_v61, %v926_v62 }
 0x1de   : > { %963 = vrot.lane.b32.xlu1 %v942_v50, %s5551_s23  ;;  %965 = vrot.lane.b32.xlu0 %v943_v58, %s5551_s23  ;;  %v1090_v50 = vsel %vm1089_vm10, 1, %v5554_v28  ;;  %vm1119_vm10 = vcmask 1046534  }
 0x1e2   : > { %967 = vrot.lane.b32.xlu1 %v944_v55, %s5551_s23  ;;  %1048 = vrot.lane.b32.xlu0 %v5827_v15, %s5552_s2 }
 0x1e6   : > { %1050 = vrot.lane.b32.xlu1 %v1041_v3, %s5552_s2 }
 0x1ea   : > { %1052 = vrot.lane.b32.xlu1 %v1042_v36, %s5552_s2 }
 0x1ee   : > { %1054 = vrot.lane.b32.xlu1 %v1043_v38, %s5552_s2 }
 0x1f2   : > { %1056 = vrot.lane.b32.xlu1 %v1044_v5, %s5552_s2 }
 0x1f6   : > { %1058 = vrot.lane.b32.xlu1 %v1045_v63, %s5552_s2  ;;  %v994_v63 = vsub.f32 1.0, %v6095_v24 }
 0x1fa   : > { %1060 = vrot.lane.b32.xlu1 %v1046_v2, %s5552_s2  ;;  %v995_v2 = vsub.f32 1.0, %v6100_v17 }
 0x242   : > { %v954_v6 = vpop.permute.xlu0 %953 }
 0x243   : > { %v977_v19 = vadd.f32 %v954_v6, %v5984_v52 }
 0x245   : > { %4979 = vtanh.f32 %v977_v19 }
 0x246   : > { %v956_v10 = vpop.permute.xlu0 %955 }
 0x247   : > { %v978_v37 = vadd.f32 %v956_v10, %v6002_v43 }
 0x248   : > { %v958_v44 = vpop.permute.xlu1 %957 }
 0x249   : > { %4981 = vtanh.f32 %v978_v37  ;;  %v979_v11 = vadd.f32 %v958_v44, %v6024_v7 }
 0x24b   : > { %4983 = vtanh.f32 %v979_v11  ;;  %v996_v11 = vsub.f32 1.0, %v6103_v31 }
 0x24c   : > { %v960_v12 = vpop.permute.xlu1 %959  ;;  %v962_v30 = vpop.permute.xlu0 %961 }
 0x24d   : > { %v980_v16 = vadd.f32 %v960_v12, %v6035_v18  ;;  %v981_v8 = vadd.f32 %v962_v30, %v6066_v4  ;;  %v997_v30 = vsub.f32 1.0, %v6112_v48 }
 0x24f   : > { %v4980_v13 = vpop.eup %4979  ;;  %4985 = vtanh.f32 %v980_v16 }
 0x250   : > { %1009 = vrot.lane.b32.xlu0 %v4980_v13, %s5553_s21  ;;  %v964_v59 = vpop.permute.xlu1 %963  ;;  %4987 = vtanh.f32 %v981_v8  ;;  %v966_v41 = vpop.permute.xlu0 %965  ;;  %v993_v13 = vsub.f32 1.0, %v6092_v21 }
 0x251   : > { %v982_v22 = vadd.f32 %v964_v59, %v6053_v35  ;;  %v983_v51 = vadd.f32 %v966_v41, %v6084_v39 }
 0x253   : > { %v4982_v53 = vpop.eup %4981  ;;  %4989 = vtanh.f32 %v982_v22 }
 0x254   : > { %1011 = vrot.lane.b32.xlu0 %v4982_v53, %s5553_s21  ;;  %v968_v25 = vpop.permute.xlu1 %967  ;;  %4991 = vtanh.f32 %v983_v51  ;;  %v1049_v60 = vpop.permute.xlu0 %1048 }
 0x255   : > { %v4984_v20 = vpop.eup %4983  ;;  %v984_v27 = vadd.f32 %v968_v25, %v6079_v42 }
 0x257   : > { %4993 = vtanh.f32 %v984_v27 }
 0x258   : > { %1013 = vrot.lane.b32.xlu0 %v4984_v20, %s5553_s21  ;;  %v1051_v54 = vpop.permute.xlu1 %1050 }
 0x259   : > { %v4986_v40 = vpop.eup %4985  ;;  %v1073_v44 = vmul.f32 %v6095_v24, %v1051_v54  ;;  %v1072_v24 = vmul.f32 %v6092_v21, %v1049_v60 }
 0x25a   : > { %1015 = vrot.lane.b32.xlu1 %v4986_v40, %s5553_s21  ;;  %v4988_v29 = vpop.eup %4987  ;;  %v998_v40 = vsub.f32 1.0, %v6108_v49 }
 0x25c   : > { %1017 = vrot.lane.b32.xlu0 %v4988_v29, %s5553_s21  ;;  %v1053_v57 = vpop.permute.xlu1 %1052 }
 0x25d   : > { %v4990_v33 = vpop.eup %4989  ;;  %v1074_v12 = vmul.f32 %v6100_v17, %v1053_v57 }
 0x25e   : > { %1062 = vrot.lane.b32.xlu1 %v1047_v26, %s5552_s2  ;;  %v4992_v45 = vpop.eup %4991 }
 0x260   : > { %1019 = vrot.lane.b32.xlu0 %v4990_v33, %s5553_s21  ;;  %v1055_v55 = vpop.permute.xlu1 %1054 }
 0x261   : > { %v4994_v34 = vpop.eup %4993  ;;  %v1075_v8 = vmul.f32 %v6103_v31, %v1055_v55 }
 0x264   : > { %1021 = vrot.lane.b32.xlu0 %v4992_v45, %s5553_s21  ;;  %v1057_v58 = vpop.permute.xlu1 %1056  ;;  %v999_v45 = vsub.f32 1.0, %v6119_v61 }
 0x265   : > { %v1076_v17 = vmul.f32 %v6112_v48, %v1057_v58 }
 0x268   : > { %1023 = vrot.lane.b32.xlu0 %v4994_v34, %s5553_s21  ;;  %v1059_v36 = vpop.permute.xlu1 %1058 }
 0x269   : > { %v1077_v27 = vmul.f32 %v6108_v49, %v1059_v36  ;;  %v1000_v49 = vsub.f32 1.0, %v6116_v32 }
 0x26c   : > { %1092 = vperm.xlu0 %4945, %v1090_v50   ;;  %v1061_v5 = vpop.permute.xlu1 %1060 }
 0x26d   : > { %v1078_v31 = vmul.f32 %v6119_v61, %v1061_v5 }
 0x2c2   : > { %v1010_v62 = vpop.permute.xlu0 %1009 }
 0x2c3   : > { %v1033_v22 = vmul.f32 %v1010_v62, %v993_v13 }
 0x2c5   : > { %v1080_v33 = vadd.f32 %v1072_v24, %v1033_v22 }
 0x2c6   : > { %v1012_v3 = vpop.permute.xlu0 %1011 }
 0x2c7   : > { %v1034_v6 = vmul.f32 %v1012_v3, %v994_v63 }
 0x2c9   : > { %v1081_v16 = vadd.f32 %v1073_v44, %v1034_v6  ;;  %v5555_v44 = vmov 1966171168  }
 0x2ca   : > { %v1014_v38 = vpop.permute.xlu0 %1013 }
 0x2cb   : > { %v1035_v19 = vmul.f32 %v1014_v38, %v995_v2  ;;  %v1103_v41 = vrot.slane %v1081_v16, 7 }
 0x2cc   : > { %v1016_v10 = vpop.permute.xlu1 %1015 }
 0x2cd   : > { %v1036_v53 = vmul.f32 %v1016_v10, %v996_v11  ;;  %v1082_v20 = vadd.f32 %v1074_v12, %v1035_v19  ;;  %v1105_v50 = vsel %vm1104_vm11, %v1103_v41, %v1080_v33  ;;  %v1133_v11 = vlaneseq }
 0x2ce   : > { %v1018_v37 = vpop.permute.xlu0 %1017 }
 0x2cf   : > { %v1037_v26 = vmul.f32 %v1018_v37, %v997_v30  ;;  %v1083_v25 = vadd.f32 %v1075_v8, %v1036_v53  ;;  %v1106_v29 = vrot.slane %v1082_v20, 6  ;;  %v1134_v13 = vshrl.u32 %v1133_v11, 7 }
 0x2d0   : > { %v1063_v48 = vpop.permute.xlu1 %1062 }
 0x2d1   : > { %v1084_v47 = vadd.f32 %v1076_v17, %v1037_v26  ;;  %v1109_v21 = vrot.slane %v1083_v25, 5  ;;  %v1108_v60 = vsel %vm1107_vm12, %v1106_v29, %v1105_v50  ;;  %v1079_v61 = vmul.f32 %v6116_v32, %v1063_v48 }
 0x2d2   : > { %v1020_v59 = vpop.permute.xlu0 %1019  ;;  %v1131_v32 = vunpack.c.l.s4 %v5555_v44 }
 0x2d3   : > { %v1038_v51 = vmul.f32 %v1020_v59, %v998_v40  ;;  %v1112_v62 = vrot.slane %v1084_v47, 4  ;;  %v1111_v3 = vsel %vm1110_vm13, %v1109_v21, %v1108_v60 }
 0x2d4   : > { %v1132_v12 = vunpack.c.0.s8 %v1131_v32 }
 0x2d5   : > { %v1085_v54 = vadd.f32 %v1077_v27, %v1038_v51  ;;  %v1114_v2 = vsel %vm1113_vm14, %v1112_v62, %v1111_v3 }
 0x2d6   : > { %v1022_v34 = vpop.permute.xlu0 %1021  ;;  %v6191_v53 = vsub.s32 %v1132_v12, %v1134_v13 }
 0x2d7   : > { %v1039_v57 = vmul.f32 %v1022_v34, %v999_v45  ;;  %v1115_v36 = vrot.slane %v1085_v54, 3 }
 0x2d9   : > { %v1086_v55 = vadd.f32 %v1078_v31, %v1039_v57  ;;  %v1117_v19 = vsel %vm1116_vm15, %v1115_v36, %v1114_v2 }
 0x2da   : > { %v1024_v58 = vpop.permute.xlu0 %1023 }
 0x2db   : > { %v1040_v38 = vmul.f32 %v1024_v58, %v1000_v49  ;;  %v1118_v5 = vrot.slane %v1086_v55, 2 }
 0x2dd   : > { %v1087_v63 = vadd.f32 %v1079_v61, %v1040_v38  ;;  %v1120_v10 = vsel %vm1119_vm10, %v1118_v5, %v1117_v19 }
 0x2df   : > { %v1121_v6 = vrot.slane %v1087_v63, 1 }
 0x2e1   : > { %v1123_v37 = vsel %vm1122_vm8, %v1121_v6, %v1120_v10 }
 0x2e2   : > { %1124 = vrot.lane.b32.xlu1 %v1123_v37, %s5553_s21 }
 0x2eb   : > { %v1093_v16 = vpop.permute.xlu0 %1092 }
 0x2ec   : > { %vm1094_vm7 = vcmp.eq.s32.totalorder %v1093_v16, 1 }
 0x354   : > { %v1125_v20 = vpop.permute.xlu1 %1124 }
 0x355   : > { %v1127_v30 = vsel %vm1094_vm7, %v1125_v20, 0.0  ;;  %v6194_v59 = vsel %vm1094_vm7, %v1125_v20, %v5827_v15 }
 0x356   : > { %v1129_v8 = vcombine.high %v1127_v30, %v1127_v30  ;;  %v1136_v22 = vrot.slane %v1127_v30, %v6191_v53  ;;  %4727 = vmatmul.mubr.msk.f32.vlgmr.msra.gmra.mrb[2].mxu1 %vm452_vm0, %v6194_v59 }
 0x357   : > { %4823 = vmatpush3.bf16.msra.mxu1 %v5819_v9  ;;  %4748 = vmatprep.mubr.msk.f32.mxu1 %vm5550_vm1, %v5549_v1 }
 0x358   : > { %v1143_v40 = vrot.slane %v1129_v8, %v6191_v53  ;;  %v1144_v26 = vcombine.high %v1136_v22, %v1136_v22  ;;  %v1152_v24 = vrot.slane %v1136_v22, %v6191_v53  ;;  %4824 = vmatprep.subr.bf16.mxu1 %v5548_v0 }
 0x35a   : > { %v1145_v15 = vcombine.high %v1143_v40, %v1143_v40  ;;  %v1159_v41 = vrot.slane %v1143_v40, %v6191_v53  ;;  %v1166_v25 = vrot.slane %v1144_v26, %v6191_v53  ;;  %v1174_v51 = vcombine.high %v1152_v24, %v1152_v24  ;;  %1187 = vst.msk [vmem:[#allocation3] sm:$0x1] %vm1186_vm6, %v1152_v24 }
 0x35b   : > { %4826 = vmatpush3.bf16.msra.mxu1 %v5823_v14 }
 0x35c   : > { %v1173_v17 = vrot.slane %v1145_v15, %v6191_v53  ;;  %v1175_v29 = vcombine.high %v1159_v41, %v1159_v41  ;;  %v1176_v27 = vcombine.high %v1166_v25, %v1166_v25  ;;  %1188 = vst.msk [vmem:[#allocation3 + $0x8] sm:$0x1] %vm1186_vm6, %v1166_v25  ;;  %1189 = vst.msk [vmem:[#allocation3 + $0x10] sm:$0x1] %vm1186_vm6, %v1174_v51  ;;  %4833 = vmatprep.subr.bf16.mxu1 %v5548_v0 }
 0x35d   : > { %1191 = vst.msk [vmem:[#allocation3 + $0x20] sm:$0x1] %vm1186_vm6, %v1159_v41 }
 0x35e   : > { %v1177_v33 = vcombine.high %v1173_v17, %v1173_v17  ;;  %1190 = vst.msk [vmem:[#allocation3 + $0x18] sm:$0x1] %vm1186_vm6, %v1176_v27  ;;  %1192 = vst.msk [vmem:[#allocation3 + $0x28] sm:$0x1] %vm1186_vm6, %v1173_v17 }
 0x35f   : > { %1193 = vst.msk [vmem:[#allocation3 + $0x30] sm:$0x1] %vm1186_vm6, %v1175_v29 }
 0x360   : > { %1194 = vst.msk [vmem:[#allocation3 + $0x38] sm:$0x1] %vm1186_vm6, %v1177_v33 }
 0x429   : > { %v1267_v45 = vpop.f32.mrb[2].mxu1 }
 0x42a   : > { %v1268_v31 = vadd.f32 %v5863_v23, %v1267_v45  ;;  %v4728_v47 = vpop.f32.mrb[3].mxu1 }
 0x42c   : > { %1345 = vrot.lane.b32.xlu1 %v1268_v31, %s5551_s23  ;;  %v1273_v34 = vrot.slane %v1268_v31, 1  ;;  %v1272_v50 = vrot.slane %v1268_v31, 7  ;;  %v1274_v21 = vrot.slane %v1268_v31, 2  ;;  %v1275_v54 = vrot.slane %v1268_v31, 3 }
 0x42d   : > { %v1276_v57 = vrot.slane %v1268_v31, 4  ;;  %v1277_v60 = vrot.slane %v1268_v31, 5  ;;  %v1278_v23 = vrot.slane %v1268_v31, 6  ;;  %v1288_v48 = vadd.f32 %v1268_v31, %v6002_v43 }
 0x42e   : > { %1347 = vrot.lane.b32.xlu0 %v1273_v34, %s5551_s23  ;;  %v1289_v55 = vadd.f32 %v1273_v34, %v6024_v7  ;;  %v1287_v49 = vadd.f32 %v1272_v50, %v5984_v52  ;;  %v1290_v3 = vadd.f32 %v1274_v21, %v6035_v18  ;;  %v1291_v36 = vadd.f32 %v1275_v54, %v6066_v4 }
 0x42f   : > { %v4563_v62 = vmul.f32 -1.442695, %v1288_v48  ;;  %v1292_v5 = vadd.f32 %v1276_v57, %v6053_v35  ;;  %v1293_v2 = vadd.f32 %v1277_v60, %v6084_v39  ;;  %v1294_v19 = vadd.f32 %v1278_v23, %v6079_v42 }
 0x430   : > { %1343 = vrot.lane.b32.xlu1 %v1272_v50, %s5551_s23  ;;  %v4564_v58 = vmul.f32 -1.442695, %v1289_v55  ;;  %v4562_v61 = vmul.f32 -1.442695, %v1287_v49  ;;  %v4565_v38 = vmul.f32 -1.442695, %v1290_v3 }
 0x431   : > { %4995 = vpow2.f32 %v4563_v62  ;;  %v4566_v63 = vmul.f32 -1.442695, %v1291_v36  ;;  %v4567_v6 = vmul.f32 -1.442695, %v1292_v5  ;;  %v4568_v10 = vmul.f32 -1.442695, %v1293_v2 }
 0x432   : > { %1349 = vrot.lane.b32.xlu0 %v1274_v21, %s5551_s23  ;;  %4997 = vpow2.f32 %v4564_v58  ;;  %v4569_v44 = vmul.f32 -1.442695, %v1294_v19  ;;  %v1471_v5 = vrot.slane %v6194_v59, 7  ;;  %v1473_v2 = vrot.slane %v6194_v59, 2 }
 0x433   : > { %4999 = vpow2.f32 %v4562_v61  ;;  %v1475_v19 = vrot.slane %v6194_v59, 4 }
 0x434   : > { %1351 = vrot.lane.b32.xlu1 %v1275_v54, %s5551_s23  ;;  %5001 = vpow2.f32 %v4565_v38 }
 0x435   : > { %5003 = vpow2.f32 %v4566_v63  ;;  %v1472_v63 = vrot.slane %v6194_v59, 1 }
 0x436   : > { %1353 = vrot.lane.b32.xlu0 %v1276_v57, %s5551_s23  ;;  %5005 = vpow2.f32 %v4567_v6  ;;  %v1474_v6 = vrot.slane %v6194_v59, 3 }
 0x437   : > { %5007 = vpow2.f32 %v4568_v10  ;;  %v1476_v10 = vrot.slane %v6194_v59, 5 }
 0x438   : > { %1355 = vrot.lane.b32.xlu1 %v1277_v60, %s5551_s23  ;;  %5009 = vpow2.f32 %v4569_v44 }
 0x43a   : > { %1357 = vrot.lane.b32.xlu0 %v1278_v23, %s5551_s23 }
 0x43b   : > { %v4996_v37 = vpop.eup %4995 }
 0x43c   : > { %v4998_v32 = vpop.eup %4997  ;;  %v1320_v11 = vadd.f32 1.0, %v4996_v37 }
 0x43d   : > { %v5000_v12 = vpop.eup %4999  ;;  %v1321_v13 = vadd.f32 1.0, %v4998_v32 }
 0x43e   : > { %v5002_v16 = vpop.eup %5001  ;;  %v1319_v20 = vadd.f32 1.0, %v5000_v12  ;;  %5011 = vrcp.f32 %v1320_v11 }
 0x43f   : > { %v5004_v30 = vpop.eup %5003  ;;  %5013 = vrcp.f32 %v1321_v13  ;;  %v1322_v8 = vadd.f32 1.0, %v5002_v16 }
 0x440   : > { %v5006_v22 = vpop.eup %5005  ;;  %5015 = vrcp.f32 %v1319_v20  ;;  %v1323_v40 = vadd.f32 1.0, %v5004_v30 }
 0x441   : > { %v5008_v26 = vpop.eup %5007  ;;  %5017 = vrcp.f32 %v1322_v8  ;;  %v1324_v24 = vadd.f32 1.0, %v5006_v22 }
 0x442   : > { %v5010_v15 = vpop.eup %5009  ;;  %5019 = vrcp.f32 %v1323_v40  ;;  %v1325_v41 = vadd.f32 1.0, %v5008_v26 }
 0x443   : > { %5021 = vrcp.f32 %v1324_v24  ;;  %v1326_v51 = vadd.f32 1.0, %v5010_v15 }
 0x444   : > { %5023 = vrcp.f32 %v1325_v41 }
 0x445   : > { %5025 = vrcp.f32 %v1326_v51 }
 0x448   : > { %v6235_v25 = vpop.eup %5011 }
 0x449   : > { %v6238_v27 = vpop.eup %5013 }
 0x44a   : > { %v6242_v31 = vpop.eup %5015 }
 0x44b   : > { %v6246_v50 = vpop.eup %5017 }
 0x44c   : > { %v6250_v57 = vpop.eup %5019 }
 0x44d   : > { %v6254_v48 = vpop.eup %5021 }
 0x44e   : > { %v6258_v62 = vpop.eup %5023 }
 0x44f   : > { %v6262_v61 = vpop.eup %5025 }
 0x49e   : > { %v1346_v17 = vpop.permute.xlu1 %1345 }
 0x49f   : > { %v1368_v29 = vmul.f32 %v6235_v25, %v1346_v17 }
 0x4a0   : > { %v1348_v33 = vpop.permute.xlu0 %1347 }
 0x4a1   : > { %v1369_v45 = vmul.f32 %v6238_v27, %v1348_v33  ;;  %1385 = vrot.lane.b32.xlu1 %v1368_v29, %s5551_s23  ;;  %v1477_v33 = vrot.slane %v6194_v59, 6 }
 0x4a2   : > { %v1344_v47 = vpop.permute.xlu1 %1343 }
 0x4a3   : > { %v1367_v34 = vmul.f32 %v6242_v31, %v1344_v47  ;;  %1387 = vrot.lane.b32.xlu0 %v1369_v45, %s5551_s23 }
 0x4a4   : > { %v1350_v21 = vpop.permute.xlu0 %1349 }
 0x4a5   : > { %v1370_v54 = vmul.f32 %v6246_v50, %v1350_v21  ;;  %1383 = vrot.lane.b32.xlu1 %v1367_v34, %s5551_s23 }
 0x4a6   : > { %v1352_v60 = vpop.permute.xlu1 %1351 }
 0x4a7   : > { %v1371_v23 = vmul.f32 %v6250_v57, %v1352_v60  ;;  %1389 = vrot.lane.b32.xlu0 %v1370_v54, %s5551_s23  ;;  %v1518_v54 = vstv %s1196_s18 }
 0x4a8   : > { %v1354_v55 = vpop.permute.xlu0 %1353  ;;  %vm1519_vm7 = vcmp.lt.s32.totalorder %v1518_v54, %v6161_v56  ;;  %v1425_v56 = vsub.f32 1.0, %v6238_v27 }
 0x4a9   : > { %v1372_v49 = vmul.f32 %v6254_v48, %v1354_v55  ;;  %1391 = vrot.lane.b32.xlu1 %v1371_v23, %s5551_s23  ;;  %v1520_v23 = vsel %vm1519_vm7, 1, %v5554_v28 }
 0x4aa   : > { %v1356_v58 = vpop.permute.xlu1 %1355 }
 0x4ab   : > { %v1373_v3 = vmul.f32 %v6258_v62, %v1356_v58  ;;  %1393 = vrot.lane.b32.xlu0 %v1372_v49, %s5551_s23 }
 0x4ac   : > { %v1358_v36 = vpop.permute.xlu0 %1357 }
 0x4ad   : > { %v1374_v38 = vmul.f32 %v6262_v61, %v1358_v36  ;;  %1395 = vrot.lane.b32.xlu1 %v1373_v3, %s5551_s23 }
 0x4af   : > { %1397 = vrot.lane.b32.xlu0 %v1374_v38, %s5551_s23 }
 0x4b1   : > { %1480 = vrot.lane.b32.xlu1 %v6194_v59, %s5552_s2 }
 0x4b3   : > { %1478 = vrot.lane.b32.xlu0 %v1471_v5, %s5552_s2 }
 0x4b7   : > { %1482 = vrot.lane.b32.xlu0 %v1472_v63, %s5552_s2 }
 0x4bb   : > { %1484 = vrot.lane.b32.xlu0 %v1473_v2, %s5552_s2 }
 0x4bf   : > { %1486 = vrot.lane.b32.xlu0 %v1474_v6, %s5552_s2  ;;  %v1423_v6 = vsub.f32 1.0, %v6242_v31 }
 0x4c3   : > { %1488 = vrot.lane.b32.xlu0 %v1475_v19, %s5552_s2 }
 0x4c7   : > { %1490 = vrot.lane.b32.xlu0 %v1476_v10, %s5552_s2 }
 0x513   : > { %v1386_v37 = vpop.permute.xlu1 %1385 }
 0x514   : > { %v1408_v44 = vadd.f32 %v1386_v37, %v6002_v43 }
 0x515   : > { %v1388_v32 = vpop.permute.xlu0 %1387 }
 0x516   : > { %5027 = vtanh.f32 %v1408_v44  ;;  %v1409_v16 = vadd.f32 %v1388_v32, %v6024_v7 }
 0x517   : > { %v1384_v11 = vpop.permute.xlu1 %1383 }
 0x518   : > { %v1407_v12 = vadd.f32 %v1384_v11, %v5984_v52 }
 0x519   : > { %v1390_v13 = vpop.permute.xlu0 %1389 }
 0x51a   : > { %5029 = vtanh.f32 %v1407_v12  ;;  %v1410_v20 = vadd.f32 %v1390_v13, %v6035_v18  ;;  %v1427_v13 = vsub.f32 1.0, %v6250_v57 }
 0x51b   : > { %v1392_v30 = vpop.permute.xlu1 %1391 }
 0x51c   : > { %5031 = vtanh.f32 %v1410_v20  ;;  %v1411_v8 = vadd.f32 %v1392_v30, %v6066_v4  ;;  %v1426_v30 = vsub.f32 1.0, %v6246_v50 }
 0x51d   : > { %5033 = vtanh.f32 %v1409_v16  ;;  %v1394_v22 = vpop.permute.xlu0 %1393  ;;  %v1424_v16 = vsub.f32 1.0, %v6235_v25 }
 0x51e   : > { %5035 = vtanh.f32 %v1411_v8  ;;  %v1412_v26 = vadd.f32 %v1394_v22, %v6053_v35  ;;  %v1428_v8 = vsub.f32 1.0, %v6254_v48 }
 0x51f   : > { %v1396_v24 = vpop.permute.xlu1 %1395 }
 0x520   : > { %v5028_v40 = vpop.eup %5027  ;;  %5037 = vtanh.f32 %v1412_v26  ;;  %v1413_v51 = vadd.f32 %v1396_v24, %v6084_v39 }
 0x521   : > { %1441 = vrot.lane.b32.xlu1 %v5028_v40, %s5553_s21  ;;  %v1398_v17 = vpop.permute.xlu0 %1397 }
 0x522   : > { %5039 = vtanh.f32 %v1413_v51  ;;  %v1414_v45 = vadd.f32 %v1398_v17, %v6079_v42 }
 0x523   : > { %v1481_v3 = vpop.permute.xlu1 %1480 }
 0x524   : > { %v5030_v15 = vpop.eup %5029  ;;  %5041 = vtanh.f32 %v1414_v45  ;;  %v1503_v51 = vmul.f32 %v6235_v25, %v1481_v3  ;;  %v1430_v25 = vsub.f32 1.0, %v6262_v61 }
 0x525   : > { %1439 = vrot.lane.b32.xlu1 %v5030_v15, %s5553_s21  ;;  %v1479_v55 = vpop.permute.xlu0 %1478 }
 0x526   : > { %v5032_v41 = vpop.eup %5031  ;;  %v1502_v32 = vmul.f32 %v6242_v31, %v1479_v55 }
 0x527   : > { %1445 = vrot.lane.b32.xlu0 %v5032_v41, %s5553_s21  ;;  %v5034_v29 = vpop.eup %5033 }
 0x528   : > { %v5036_v47 = vpop.eup %5035 }
 0x529   : > { %1443 = vrot.lane.b32.xlu1 %v5034_v29, %s5553_s21  ;;  %v1483_v49 = vpop.permute.xlu0 %1482 }
 0x52a   : > { %v5038_v34 = vpop.eup %5037  ;;  %v1504_v11 = vmul.f32 %v6238_v27, %v1483_v49  ;;  %v1429_v27 = vsub.f32 1.0, %v6258_v62 }
 0x52b   : > { %1492 = vrot.lane.b32.xlu0 %v1477_v33, %s5552_s2 }
 0x52c   : > { %v5040_v21 = vpop.eup %5039 }
 0x52d   : > { %1447 = vrot.lane.b32.xlu1 %v5036_v47, %s5553_s21  ;;  %v1485_v58 = vpop.permute.xlu0 %1484 }
 0x52e   : > { %v5042_v60 = vpop.eup %5041  ;;  %v1505_v17 = vmul.f32 %v6246_v50, %v1485_v58 }
 0x531   : > { %1449 = vrot.lane.b32.xlu1 %v5038_v34, %s5553_s21  ;;  %v1487_v36 = vpop.permute.xlu0 %1486 }
 0x532   : > { %v1506_v31 = vmul.f32 %v6250_v57, %v1487_v36 }
 0x535   : > { %1451 = vrot.lane.b32.xlu1 %v5040_v21, %s5553_s21  ;;  %v1489_v5 = vpop.permute.xlu0 %1488 }
 0x536   : > { %v1507_v29 = vmul.f32 %v6254_v48, %v1489_v5 }
 0x539   : > { %1453 = vrot.lane.b32.xlu1 %v5042_v60, %s5553_s21  ;;  %v1491_v19 = vpop.permute.xlu0 %1490 }
 0x53a   : > { %v1508_v45 = vmul.f32 %v6258_v62, %v1491_v19 }
 0x53d   : > { %1522 = vperm.xlu1 %4946, %v1520_v23  }
 0x593   : > { %v1442_v38 = vpop.permute.xlu1 %1441 }
 0x594   : > { %v1464_v24 = vmul.f32 %v1442_v38, %v1424_v16 }
 0x596   : > { %v1511_v54 = vadd.f32 %v1503_v51, %v1464_v24  ;;  %v6353_v51 = vld [vmem:[%s5860_s20] ss:$0 sm:$0xff] }
 0x597   : > { %v1440_v63 = vpop.permute.xlu1 %1439 }
 0x598   : > { %v1463_v10 = vmul.f32 %v1440_v63, %v1423_v6 }
 0x599   : > { %v1446_v12 = vpop.permute.xlu0 %1445 }
 0x59a   : > { %v1510_v20 = vadd.f32 %v1502_v32, %v1463_v10  ;;  %v1466_v15 = vmul.f32 %v1446_v12, %v1426_v30 }
 0x59b   : > { %v1444_v2 = vpop.permute.xlu1 %1443 }
 0x59c   : > { %v1465_v37 = vmul.f32 %v1444_v2, %v1425_v56  ;;  %v1533_v33 = vrot.slane %v1510_v20, 1  ;;  %v1513_v60 = vadd.f32 %v1505_v17, %v1466_v15 }
 0x59d   : > { %v1493_v49 = vpop.permute.xlu0 %1492 }
 0x59e   : > { %v1512_v22 = vadd.f32 %v1504_v11, %v1465_v37  ;;  %v1534_v57 = vsel %vm1104_vm11, %v1511_v54, %v1533_v33  ;;  %v1537_v3 = vrot.slane %v1513_v60, 6  ;;  %v1509_v62 = vmul.f32 %v6262_v61, %v1493_v49 }
 0x59f   : > { %v1448_v44 = vpop.permute.xlu1 %1447 }
 0x5a0   : > { %v1467_v40 = vmul.f32 %v1448_v44, %v1427_v13  ;;  %v1535_v47 = vrot.slane %v1512_v22, 7 }
 0x5a2   : > { %v1514_v34 = vadd.f32 %v1506_v31, %v1467_v40  ;;  %v1536_v50 = vsel %vm1107_vm12, %v1535_v47, %v1534_v57 }
 0x5a3   : > { %v1450_v26 = vpop.permute.xlu1 %1449  ;;  %v1538_v6 = vsel %vm1110_vm13, %v1537_v3, %v1536_v50 }
 0x5a4   : > { %v1468_v41 = vmul.f32 %v1450_v26, %v1428_v8  ;;  %v1539_v58 = vrot.slane %v1514_v34, 5 }
 0x5a6   : > { %v1515_v23 = vadd.f32 %v1507_v29, %v1468_v41  ;;  %v1540_v19 = vsel %vm1113_vm14, %v1539_v58, %v1538_v6 }
 0x5a7   : > { %v1452_v21 = vpop.permute.xlu1 %1451 }
 0x5a8   : > { %v1469_v55 = vmul.f32 %v1452_v21, %v1429_v27  ;;  %v1541_v38 = vrot.slane %v1515_v23, 4 }
 0x5aa   : > { %v1516_v36 = vadd.f32 %v1508_v45, %v1469_v55  ;;  %v1542_v10 = vsel %vm1116_vm15, %v1541_v38, %v1540_v19 }
 0x5ab   : > { %v1454_v48 = vpop.permute.xlu1 %1453 }
 0x5ac   : > { %v1470_v5 = vmul.f32 %v1454_v48, %v1430_v25  ;;  %v1543_v63 = vrot.slane %v1516_v36, 3 }
 0x5ae   : > { %v1517_v2 = vadd.f32 %v1509_v62, %v1470_v5  ;;  %v1544_v37 = vsel %vm1119_vm10, %v1543_v63, %v1542_v10 }
 0x5b0   : > { %v1545_v56 = vrot.slane %v1517_v2, 2 }
 0x5b2   : > { %v1546_v44 = vsel %vm1122_vm8, %v1545_v56, %v1544_v37 }
 0x5b3   : > { %1547 = vrot.lane.b32.xlu0 %v1546_v44, %s5553_s21 }
 0x5bc   : > { %v1523_v32 = vpop.permute.xlu1 %1522 }
 0x5bd   : > { %vm1524_vm7 = vcmp.eq.s32.totalorder %v1523_v32, 1 }
 0x625   : > { %v1548_v61 = vpop.permute.xlu0 %1547 }
 0x626   : > { %v1550_v11 = vsel %vm1524_vm7, %v1548_v61, 0.0  ;;  %v6328_v12 = vsel %vm1524_vm7, %v1548_v61, %v6194_v59 }
 0x627   : > { %v1552_v13 = vcombine.high %v1550_v11, %v1550_v11  ;;  %v1559_v16 = vrot.slane %v1550_v11, %v6191_v53  ;;  %4738 = vmatmul.mubr.msk.f32.vlgmr.msra.gmra.mrb[8].mxu0 %vm452_vm0, %v6328_v12 }
 0x628   : > { %4829 = vmatpush3.bf16.msra.mxu0 %v5819_v9  ;;  %4759 = vmatprep.mubr.msk.f32.mxu0 %vm5550_vm1, %v5549_v1 }
 0x629   : > { %v1566_v20 = vrot.slane %v1552_v13, %v6191_v53  ;;  %v1567_v30 = vcombine.high %v1559_v16, %v1559_v16  ;;  %v1575_v8 = vrot.slane %v1559_v16, %v6191_v53  ;;  %4830 = vmatprep.subr.bf16.mxu0 %v5548_v0 }
 0x62b   : > { %v1568_v59 = vcombine.high %v1566_v20, %v1566_v20  ;;  %v1582_v22 = vrot.slane %v1566_v20, %v6191_v53  ;;  %v1589_v40 = vrot.slane %v1567_v30, %v6191_v53  ;;  %v1597_v26 = vcombine.high %v1575_v8, %v1575_v8  ;;  %1609 = vst.msk [vmem:[#allocation3 + $0x1] sm:$0x1] %vm1186_vm6, %v1575_v8 }
 0x62c   : > { %4832 = vmatpush3.bf16.msra.mxu0 %v5823_v14 }
 0x62d   : > { %v1596_v24 = vrot.slane %v1568_v59, %v6191_v53  ;;  %v1598_v15 = vcombine.high %v1582_v22, %v1582_v22  ;;  %v1599_v41 = vcombine.high %v1589_v40, %v1589_v40  ;;  %1610 = vst.msk [vmem:[#allocation3 + $0x9] sm:$0x1] %vm1186_vm6, %v1589_v40  ;;  %1611 = vst.msk [vmem:[#allocation3 + $0x11] sm:$0x1] %vm1186_vm6, %v1597_v26  ;;  %4839 = vmatprep.subr.bf16.mxu0 %v5548_v0 }
 0x62e   : > { %1613 = vst.msk [vmem:[#allocation3 + $0x21] sm:$0x1] %vm1186_vm6, %v1582_v22 }
 0x62f   : > { %v1600_v31 = vcombine.high %v1596_v24, %v1596_v24  ;;  %1612 = vst.msk [vmem:[#allocation3 + $0x19] sm:$0x1] %vm1186_vm6, %v1599_v41  ;;  %1614 = vst.msk [vmem:[#allocation3 + $0x29] sm:$0x1] %vm1186_vm6, %v1596_v24 }
 0x630   : > { %1615 = vst.msk [vmem:[#allocation3 + $0x31] sm:$0x1] %vm1186_vm6, %v1598_v15 }
 0x631   : > { %1616 = vst.msk [vmem:[#allocation3 + $0x39] sm:$0x1] %vm1186_vm6, %v1600_v31 }
 0x6fa   : > { %v1689_v27 = vpop.f32.mrb[8].mxu0 }
 0x6fb   : > { %v1690_v17 = vadd.f32 %v6353_v51, %v1689_v27  ;;  %v4739_v29 = vpop.f32.mrb[9].mxu0 }
 0x6fd   : > { %1769 = vrot.lane.b32.xlu0 %v1690_v17, %s5551_s23  ;;  %v1694_v33 = vrot.slane %v1690_v17, 6  ;;  %v1695_v45 = vrot.slane %v1690_v17, 7  ;;  %v1696_v47 = vrot.slane %v1690_v17, 1  ;;  %v1698_v34 = vrot.slane %v1690_v17, 3 }
 0x6fe   : > { %v1697_v21 = vrot.slane %v1690_v17, 2  ;;  %v1700_v54 = vrot.slane %v1690_v17, 5  ;;  %v1699_v60 = vrot.slane %v1690_v17, 4  ;;  %v1711_v23 = vadd.f32 %v1690_v17, %v6024_v7 }
 0x6ff   : > { %1765 = vrot.lane.b32.xlu1 %v1694_v33, %s5551_s23  ;;  %v1709_v55 = vadd.f32 %v1694_v33, %v5984_v52  ;;  %v1710_v49 = vadd.f32 %v1695_v45, %v6002_v43  ;;  %v1712_v25 = vadd.f32 %v1696_v47, %v6035_v18  ;;  %v1714_v58 = vadd.f32 %v1698_v34, %v6053_v35 }
 0x700   : > { %v4573_v57 = vmul.f32 -1.442695, %v1711_v23  ;;  %v1713_v3 = vadd.f32 %v1697_v21, %v6066_v4  ;;  %v1716_v38 = vadd.f32 %v1700_v54, %v6079_v42  ;;  %v1715_v63 = vadd.f32 %v1699_v60, %v6084_v39 }
 0x701   : > { %1767 = vrot.lane.b32.xlu0 %v1695_v45, %s5551_s23  ;;  %v4571_v36 = vmul.f32 -1.442695, %v1709_v55  ;;  %v4572_v50 = vmul.f32 -1.442695, %v1710_v49  ;;  %v4574_v48 = vmul.f32 -1.442695, %v1712_v25 }
 0x702   : > { %5043 = vpow2.f32 %v4573_v57  ;;  %v4576_v62 = vmul.f32 -1.442695, %v1714_v58  ;;  %v4575_v5 = vmul.f32 -1.442695, %v1713_v3  ;;  %v4578_v2 = vmul.f32 -1.442695, %v1716_v38 }
 0x703   : > { %1771 = vrot.lane.b32.xlu1 %v1696_v47, %s5551_s23  ;;  %5045 = vpow2.f32 %v4571_v36  ;;  %v4577_v19 = vmul.f32 -1.442695, %v1715_v63  ;;  %v1894_v3 = vrot.slane %v6328_v12, 7  ;;  %v1895_v38 = vrot.slane %v6328_v12, 1 }
 0x704   : > { %5047 = vpow2.f32 %v4572_v50  ;;  %v1897_v63 = vrot.slane %v6328_v12, 3 }
 0x705   : > { %1775 = vrot.lane.b32.xlu0 %v1698_v34, %s5551_s23  ;;  %5049 = vpow2.f32 %v4574_v48 }
 0x706   : > { %5051 = vpow2.f32 %v4576_v62  ;;  %v1893_v62 = vrot.slane %v6328_v12, 6 }
 0x707   : > { %1773 = vrot.lane.b32.xlu1 %v1697_v21, %s5551_s23  ;;  %5053 = vpow2.f32 %v4575_v5  ;;  %v1896_v5 = vrot.slane %v6328_v12, 2 }
 0x708   : > { %5055 = vpow2.f32 %v4578_v2  ;;  %v1898_v2 = vrot.slane %v6328_v12, 4 }
 0x709   : > { %1779 = vrot.lane.b32.xlu0 %v1700_v54, %s5551_s23  ;;  %5057 = vpow2.f32 %v4577_v19 }
 0x70b   : > { %1777 = vrot.lane.b32.xlu1 %v1699_v60, %s5551_s23 }
 0x70c   : > { %v5044_v6 = vpop.eup %5043 }
 0x70d   : > { %v5046_v56 = vpop.eup %5045  ;;  %v1743_v10 = vadd.f32 1.0, %v5044_v6 }
 0x70e   : > { %v5048_v37 = vpop.eup %5047  ;;  %v1741_v44 = vadd.f32 1.0, %v5046_v56 }
 0x70f   : > { %v5050_v32 = vpop.eup %5049  ;;  %v1742_v61 = vadd.f32 1.0, %v5048_v37  ;;  %5059 = vrcp.f32 %v1743_v10 }
 0x710   : > { %v5052_v11 = vpop.eup %5051  ;;  %5061 = vrcp.f32 %v1741_v44  ;;  %v1744_v13 = vadd.f32 1.0, %v5050_v32 }
 0x711   : > { %v5054_v16 = vpop.eup %5053  ;;  %5063 = vrcp.f32 %v1742_v61  ;;  %v1746_v20 = vadd.f32 1.0, %v5052_v11 }
 0x712   : > { %v5056_v30 = vpop.eup %5055  ;;  %5065 = vrcp.f32 %v1744_v13  ;;  %v1745_v8 = vadd.f32 1.0, %v5054_v16 }
 0x713   : > { %v5058_v59 = vpop.eup %5057  ;;  %5067 = vrcp.f32 %v1746_v20  ;;  %v1748_v22 = vadd.f32 1.0, %v5056_v30 }
 0x714   : > { %5069 = vrcp.f32 %v1745_v8  ;;  %v1747_v26 = vadd.f32 1.0, %v5058_v59 }
 0x715   : > { %5071 = vrcp.f32 %v1748_v22 }
 0x716   : > { %5073 = vrcp.f32 %v1747_v26 }
 0x719   : > { %v6372_v40 = vpop.eup %5059 }
 0x71a   : > { %v6375_v41 = vpop.eup %5061 }
 0x71b   : > { %v6379_v17 = vpop.eup %5063 }
 0x71c   : > { %v6383_v45 = vpop.eup %5065 }
 0x71d   : > { %v6387_v21 = vpop.eup %5067 }
 0x71e   : > { %v6391_v23 = vpop.eup %5069 }
 0x71f   : > { %v6395_v57 = vpop.eup %5071 }
 0x720   : > { %v6399_v50 = vpop.eup %5073 }
 0x76f   : > { %v1770_v24 = vpop.permute.xlu0 %1769 }
 0x770   : > { %v1791_v15 = vmul.f32 %v6372_v40, %v1770_v24 }
 0x771   : > { %v1766_v31 = vpop.permute.xlu1 %1765 }
 0x772   : > { %v1789_v27 = vmul.f32 %v6375_v41, %v1766_v31  ;;  %1809 = vrot.lane.b32.xlu0 %v1791_v15, %s5551_s23 }
 0x773   : > { %v1768_v29 = vpop.permute.xlu0 %1767 }
 0x774   : > { %v1790_v33 = vmul.f32 %v6379_v17, %v1768_v29  ;;  %1805 = vrot.lane.b32.xlu1 %v1789_v27, %s5551_s23 }
 0x775   : > { %v1772_v47 = vpop.permute.xlu1 %1771 }
 0x776   : > { %v1792_v34 = vmul.f32 %v6383_v45, %v1772_v47  ;;  %1807 = vrot.lane.b32.xlu0 %v1790_v33, %s5551_s23  ;;  %v1899_v33 = vrot.slane %v6328_v12, 5 }
 0x777   : > { %v1776_v54 = vpop.permute.xlu0 %1775 }
 0x778   : > { %v1794_v60 = vmul.f32 %v6387_v21, %v1776_v54  ;;  %1811 = vrot.lane.b32.xlu1 %v1792_v34, %s5551_s23  ;;  %v1940_v34 = vstv %s1618_s10  ;;  %v6440_v54 = vld [vmem:[%s7408_s0] sm:$0xff] }
 0x779   : > { %v1774_v55 = vpop.permute.xlu1 %1773  ;;  %vm1941_vm7 = vcmp.lt.s32.totalorder %v1940_v34, %v6440_v54 }
 0x77a   : > { %v1793_v49 = vmul.f32 %v6391_v23, %v1774_v55  ;;  %1815 = vrot.lane.b32.xlu0 %v1794_v60, %s5551_s23  ;;  %v1942_v55 = vsel %vm1941_vm7, 1, %v5554_v28 }
 0x77b   : > { %v1780_v36 = vpop.permute.xlu0 %1779 }
 0x77c   : > { %v1796_v25 = vmul.f32 %v6395_v57, %v1780_v36  ;;  %1813 = vrot.lane.b32.xlu1 %v1793_v49, %s5551_s23 }
 0x77d   : > { %v1778_v58 = vpop.permute.xlu1 %1777 }
 0x77e   : > { %v1795_v48 = vmul.f32 %v6399_v50, %v1778_v58  ;;  %1819 = vrot.lane.b32.xlu0 %v1796_v25, %s5551_s23 }
 0x780   : > { %1817 = vrot.lane.b32.xlu1 %v1795_v48, %s5551_s23 }
 0x782   : > { %1902 = vrot.lane.b32.xlu0 %v1894_v3, %s5552_s2 }
 0x784   : > { %1900 = vrot.lane.b32.xlu1 %v1893_v62, %s5552_s2 }
 0x786   : > { %1906 = vrot.lane.b32.xlu0 %v1895_v38, %s5552_s2 }
 0x788   : > { %1904 = vrot.lane.b32.xlu1 %v6328_v12, %s5552_s2 }
 0x78a   : > { %1908 = vrot.lane.b32.xlu0 %v1896_v5, %s5552_s2  ;;  %v1846_v5 = vsub.f32 1.0, %v6379_v17 }
 0x78e   : > { %1910 = vrot.lane.b32.xlu0 %v1897_v63, %s5552_s2  ;;  %v1845_v63 = vsub.f32 1.0, %v6375_v41 }
 0x792   : > { %1912 = vrot.lane.b32.xlu0 %v1898_v2, %s5552_s2 }
 0x7e4   : > { %v1810_v6 = vpop.permute.xlu0 %1809 }
 0x7e5   : > { %v1831_v19 = vadd.f32 %v1810_v6, %v6024_v7 }
 0x7e6   : > { %v1806_v56 = vpop.permute.xlu1 %1805 }
 0x7e7   : > { %5075 = vtanh.f32 %v1831_v19  ;;  %v1829_v10 = vadd.f32 %v1806_v56, %v5984_v52 }
 0x7e8   : > { %v1808_v37 = vpop.permute.xlu0 %1807 }
 0x7e9   : > { %v1830_v44 = vadd.f32 %v1808_v37, %v6002_v43  ;;  %5077 = vtanh.f32 %v1829_v10 }
 0x7ea   : > { %v1812_v32 = vpop.permute.xlu1 %1811 }
 0x7eb   : > { %5079 = vtanh.f32 %v1830_v44  ;;  %v1832_v61 = vadd.f32 %v1812_v32, %v6035_v18 }
 0x7ec   : > { %v1816_v11 = vpop.permute.xlu0 %1815 }
 0x7ed   : > { %5081 = vtanh.f32 %v1832_v61  ;;  %v1834_v16 = vadd.f32 %v1816_v11, %v6053_v35  ;;  %v1848_v61 = vsub.f32 1.0, %v6383_v45 }
 0x7ee   : > { %v1814_v13 = vpop.permute.xlu1 %1813 }
 0x7ef   : > { %v1833_v20 = vadd.f32 %v1814_v13, %v6066_v4 }
 0x7f0   : > { %v1820_v26 = vpop.permute.xlu0 %1819 }
 0x7f1   : > { %v5076_v30 = vpop.eup %5075  ;;  %5083 = vtanh.f32 %v1833_v20  ;;  %v1836_v15 = vadd.f32 %v1820_v26, %v6079_v42  ;;  %v1849_v20 = vsub.f32 1.0, %v6391_v23 }
 0x7f2   : > { %1865 = vrot.lane.b32.xlu1 %v5076_v30, %s5553_s21  ;;  %v1818_v8 = vpop.permute.xlu1 %1817  ;;  %5085 = vtanh.f32 %v1834_v16  ;;  %v1847_v30 = vsub.f32 1.0, %v6372_v40 }
 0x7f3   : > { %v1835_v59 = vadd.f32 %v1818_v8, %v6084_v39  ;;  %v5078_v22 = vpop.eup %5077 }
 0x7f4   : > { %v1903_v49 = vpop.permute.xlu0 %1902 }
 0x7f5   : > { %v5080_v24 = vpop.eup %5079  ;;  %5087 = vtanh.f32 %v1835_v59  ;;  %v1925_v19 = vmul.f32 %v6379_v17, %v1903_v49  ;;  %v1850_v59 = vsub.f32 1.0, %v6387_v21 }
 0x7f6   : > { %1863 = vrot.lane.b32.xlu0 %v5080_v24, %s5553_s21  ;;  %1861 = vrot.lane.b32.xlu1 %v5078_v22, %s5553_s21  ;;  %5089 = vtanh.f32 %v1836_v15  ;;  %v1901_v58 = vpop.permute.xlu1 %1900 }
 0x7f7   : > { %v5082_v31 = vpop.eup %5081  ;;  %v1924_v56 = vmul.f32 %v6375_v41, %v1901_v58 }
 0x7f8   : > { %v1907_v36 = vpop.permute.xlu0 %1906 }
 0x7f9   : > { %v1927_v13 = vmul.f32 %v6383_v45, %v1907_v36 }
 0x7fa   : > { %1867 = vrot.lane.b32.xlu1 %v5082_v31, %s5553_s21  ;;  %v1905_v3 = vpop.permute.xlu1 %1904 }
 0x7fb   : > { %v5084_v27 = vpop.eup %5083 }
 0x7fc   : > { %1869 = vrot.lane.b32.xlu0 %v5084_v27, %s5553_s21  ;;  %v5086_v29 = vpop.eup %5085  ;;  %v1909_v25 = vpop.permute.xlu0 %1908 }
 0x7fd   : > { %v1928_v24 = vmul.f32 %v6391_v23, %v1909_v25 }
 0x7fe   : > { %1871 = vrot.lane.b32.xlu1 %v5086_v29, %s5553_s21  ;;  %v1926_v29 = vmul.f32 %v6372_v40, %v1905_v3 }
 0x7ff   : > { %v5088_v47 = vpop.eup %5087 }
 0x800   : > { %1914 = vrot.lane.b32.xlu0 %v1899_v33, %s5552_s2  ;;  %v5090_v60 = vpop.eup %5089  ;;  %v1911_v48 = vpop.permute.xlu0 %1910 }
 0x801   : > { %v1929_v33 = vmul.f32 %v6387_v21, %v1911_v48  ;;  %v1852_v21 = vsub.f32 1.0, %v6395_v57 }
 0x802   : > { %1873 = vrot.lane.b32.xlu1 %v5088_v47, %s5553_s21 }
 0x804   : > { %v1913_v62 = vpop.permute.xlu0 %1912 }
 0x805   : > { %v1930_v36 = vmul.f32 %v6399_v50, %v1913_v62 }
 0x806   : > { %1875 = vrot.lane.b32.xlu1 %v5090_v60, %s5553_s21  ;;  %v1851_v60 = vsub.f32 1.0, %v6399_v50 }
 0x80a   : > { %1944 = vperm.xlu1 %4946, %v1942_v55  }
 0x864   : > { %v1866_v38 = vpop.permute.xlu1 %1865 }
 0x865   : > { %v1887_v15 = vmul.f32 %v1866_v38, %v1847_v30 }
 0x867   : > { %v1934_v55 = vadd.f32 %v1926_v29, %v1887_v15 }
 0x868   : > { %v1864_v2 = vpop.permute.xlu0 %1863  ;;  %v1862_v6 = vpop.permute.xlu1 %1861 }
 0x869   : > { %v1886_v10 = vmul.f32 %v1864_v2, %v1846_v5  ;;  %v1885_v37 = vmul.f32 %v1862_v6, %v1845_v63 }
 0x86b   : > { %v1933_v44 = vadd.f32 %v1925_v19, %v1886_v10  ;;  %v1932_v32 = vadd.f32 %v1924_v56, %v1885_v37 }
 0x86c   : > { %v1868_v11 = vpop.permute.xlu1 %1867 }
 0x86d   : > { %v1888_v16 = vmul.f32 %v1868_v11, %v1848_v61  ;;  %v1956_v17 = vrot.slane %v1933_v44, 1  ;;  %v1955_v22 = vrot.slane %v1932_v32, 2 }
 0x86e   : > { %v1870_v8 = vpop.permute.xlu0 %1869 }
 0x86f   : > { %v1935_v41 = vadd.f32 %v1927_v13, %v1888_v16  ;;  %v1889_v26 = vmul.f32 %v1870_v8, %v1849_v20  ;;  %v1957_v47 = vsel %vm1104_vm11, %v1956_v17, %v1955_v22 }
 0x870   : > { %v1872_v31 = vpop.permute.xlu1 %1871  ;;  %v1958_v23 = vsel %vm1107_vm12, %v1934_v55, %v1957_v47 }
 0x871   : > { %v1890_v27 = vmul.f32 %v1872_v31, %v1850_v59  ;;  %v1936_v45 = vadd.f32 %v1928_v24, %v1889_v26  ;;  %v1959_v34 = vrot.slane %v1935_v41, 7 }
 0x872   : > { %v1915_v38 = vpop.permute.xlu0 %1914 }
 0x873   : > { %v1937_v58 = vadd.f32 %v1929_v33, %v1890_v27  ;;  %v1961_v25 = vrot.slane %v1936_v45, 6  ;;  %v1960_v40 = vsel %vm1110_vm13, %v1959_v34, %v1958_v23  ;;  %v1931_v2 = vmul.f32 %v6395_v57, %v1915_v38 }
 0x874   : > { %v1874_v49 = vpop.permute.xlu1 %1873 }
 0x875   : > { %v1891_v5 = vmul.f32 %v1874_v49, %v1851_v60  ;;  %v1963_v63 = vrot.slane %v1937_v58, 5  ;;  %v1962_v19 = vsel %vm1113_vm14, %v1961_v25, %v1960_v40 }
 0x877   : > { %v1938_v3 = vadd.f32 %v1930_v36, %v1891_v5  ;;  %v1964_v10 = vsel %vm1116_vm15, %v1963_v63, %v1962_v19 }
 0x878   : > { %v1876_v48 = vpop.permute.xlu1 %1875 }
 0x879   : > { %v1892_v6 = vmul.f32 %v1876_v48, %v1852_v21  ;;  %v1965_v56 = vrot.slane %v1938_v3, 4 }
 0x87b   : > { %v1939_v50 = vadd.f32 %v1931_v2, %v1892_v6  ;;  %v1966_v37 = vsel %vm1119_vm10, %v1965_v56, %v1964_v10 }
 0x87d   : > { %v1967_v62 = vrot.slane %v1939_v50, 3 }
 0x87f   : > { %v1968_v44 = vsel %vm1122_vm8, %v1967_v62, %v1966_v37 }
 0x880   : > { %1969 = vrot.lane.b32.xlu0 %v1968_v44, %s5553_s21 }
 0x889   : > { %v1945_v32 = vpop.permute.xlu1 %1944 }
 0x88a   : > { %vm1946_vm7 = vcmp.eq.s32.totalorder %v1945_v32, 1 }
 0x8f2   : > { %v1970_v61 = vpop.permute.xlu0 %1969 }
 0x8f3   : > { %v1972_v11 = vsel %vm1946_vm7, %v1970_v61, 0.0  ;;  %v6470_v57 = vsel %vm1946_vm7, %v1970_v61, %v6328_v12 }
 0x8f4   : > { %v1974_v13 = vcombine.high %v1972_v11, %v1972_v11  ;;  %v1981_v16 = vrot.slane %v1972_v11, %v6191_v53  ;;  %4749 = vmatmul.mubr.msk.f32.vlgmr.msra.gmra.mrb[4].mxu1 %vm452_vm0, %v6470_v57 }
 0x8f5   : > { %4835 = vmatpush3.bf16.msra.mxu1 %v5819_v9  ;;  %4770 = vmatprep.mubr.msk.f32.mxu1 %vm5550_vm1, %v5549_v1 }
 0x8f6   : > { %v1988_v20 = vrot.slane %v1974_v13, %v6191_v53  ;;  %v1989_v30 = vcombine.high %v1981_v16, %v1981_v16  ;;  %v1997_v8 = vrot.slane %v1981_v16, %v6191_v53  ;;  %4836 = vmatprep.subr.bf16.mxu1 %v5548_v0 }
 0x8f8   : > { %v1990_v12 = vcombine.high %v1988_v20, %v1988_v20  ;;  %v2004_v59 = vrot.slane %v1988_v20, %v6191_v53  ;;  %v2011_v17 = vrot.slane %v1989_v30, %v6191_v53  ;;  %v2019_v22 = vcombine.high %v1997_v8, %v1997_v8  ;;  %2031 = vst.msk [vmem:[#allocation3 + $0x2] sm:$0x1] %vm1186_vm6, %v1997_v8 }
 0x8f9   : > { %4838 = vmatpush3.bf16.msra.mxu1 %v5823_v14 }
 0x8fa   : > { %v2018_v41 = vrot.slane %v1990_v12, %v6191_v53  ;;  %v2020_v26 = vcombine.high %v2004_v59, %v2004_v59  ;;  %v2021_v24 = vcombine.high %v2011_v17, %v2011_v17  ;;  %2032 = vst.msk [vmem:[#allocation3 + $0xa] sm:$0x1] %vm1186_vm6, %v2011_v17  ;;  %2033 = vst.msk [vmem:[#allocation3 + $0x12] sm:$0x1] %vm1186_vm6, %v2019_v22  ;;  %4845 = vmatprep.subr.bf16.mxu1 %v5548_v0 }
 0x8fb   : > { %2035 = vst.msk [vmem:[#allocation3 + $0x22] sm:$0x1] %vm1186_vm6, %v2004_v59 }
 0x8fc   : > { %v2022_v15 = vcombine.high %v2018_v41, %v2018_v41  ;;  %2034 = vst.msk [vmem:[#allocation3 + $0x1a] sm:$0x1] %vm1186_vm6, %v2021_v24  ;;  %2036 = vst.msk [vmem:[#allocation3 + $0x2a] sm:$0x1] %vm1186_vm6, %v2018_v41 }
 0x8fd   : > { %2037 = vst.msk [vmem:[#allocation3 + $0x32] sm:$0x1] %vm1186_vm6, %v2020_v26 }
 0x8fe   : > { %2038 = vst.msk [vmem:[#allocation3 + $0x3a] sm:$0x1] %vm1186_vm6, %v2022_v15 }
 0x9c7   : > { %v2111_v31 = vpop.f32.mrb[4].mxu1 }
 0x9c8   : > { %v2112_v27 = vadd.f32 %v6353_v51, %v2111_v31  ;;  %v4750_v29 = vpop.f32.mrb[5].mxu1 }
 0x9ca   : > { %2193 = vrot.lane.b32.xlu1 %v2112_v27, %s5551_s23  ;;  %v2117_v45 = vrot.slane %v2112_v27, 6  ;;  %v2116_v33 = vrot.slane %v2112_v27, 5  ;;  %v2119_v47 = vrot.slane %v2112_v27, 1  ;;  %v2118_v34 = vrot.slane %v2112_v27, 7 }
 0x9cb   : > { %v2120_v60 = vrot.slane %v2112_v27, 2  ;;  %v2121_v55 = vrot.slane %v2112_v27, 3  ;;  %v2122_v49 = vrot.slane %v2112_v27, 4  ;;  %v2134_v36 = vadd.f32 %v2112_v27, %v6035_v18 }
 0x9cc   : > { %2189 = vrot.lane.b32.xlu0 %v2117_v45, %s5551_s23  ;;  %v2132_v58 = vadd.f32 %v2117_v45, %v6002_v43  ;;  %v2131_v5 = vadd.f32 %v2116_v33, %v5984_v52  ;;  %v2135_v38 = vadd.f32 %v2119_v47, %v6066_v4  ;;  %v2133_v3 = vadd.f32 %v2118_v34, %v6024_v7 }
 0x9cd   : > { %v4583_v23 = vmul.f32 -1.442695, %v2134_v36  ;;  %v2136_v48 = vadd.f32 %v2120_v60, %v6053_v35  ;;  %v2137_v2 = vadd.f32 %v2121_v55, %v6084_v39  ;;  %v2138_v19 = vadd.f32 %v2122_v49, %v6079_v42 }
 0x9ce   : > { %2187 = vrot.lane.b32.xlu1 %v2116_v33, %s5551_s23  ;;  %v4581_v25 = vmul.f32 -1.442695, %v2132_v58  ;;  %v4580_v40 = vmul.f32 -1.442695, %v2131_v5  ;;  %v4584_v21 = vmul.f32 -1.442695, %v2135_v38 }
 0x9cf   : > { %5091 = vpow2.f32 %v4583_v23  ;;  %v4582_v63 = vmul.f32 -1.442695, %v2133_v3  ;;  %v4585_v6 = vmul.f32 -1.442695, %v2136_v48  ;;  %v4586_v56 = vmul.f32 -1.442695, %v2137_v2 }
 0x9d0   : > { %2195 = vrot.lane.b32.xlu0 %v2119_v47, %s5551_s23  ;;  %5093 = vpow2.f32 %v4581_v25  ;;  %v4587_v62 = vmul.f32 -1.442695, %v2138_v19  ;;  %v2316_v2 = vrot.slane %v6470_v57, 6  ;;  %v2318_v19 = vrot.slane %v6470_v57, 1 }
 0x9d1   : > { %5095 = vpow2.f32 %v4580_v40 }
 0x9d2   : > { %2191 = vrot.lane.b32.xlu1 %v2118_v34, %s5551_s23  ;;  %5097 = vpow2.f32 %v4584_v21 }
 0x9d3   : > { %5099 = vpow2.f32 %v4582_v63  ;;  %v2315_v63 = vrot.slane %v6470_v57, 5 }
 0x9d4   : > { %2197 = vrot.lane.b32.xlu0 %v2120_v60, %s5551_s23  ;;  %5101 = vpow2.f32 %v4585_v6  ;;  %v2317_v6 = vrot.slane %v6470_v57, 7 }
 0x9d5   : > { %5103 = vpow2.f32 %v4586_v56  ;;  %v2319_v56 = vrot.slane %v6470_v57, 2 }
 0x9d6   : > { %2199 = vrot.lane.b32.xlu1 %v2121_v55, %s5551_s23  ;;  %5105 = vpow2.f32 %v4587_v62 }
 0x9d8   : > { %2201 = vrot.lane.b32.xlu0 %v2122_v49, %s5551_s23 }
 0x9d9   : > { %v5092_v50 = vpop.eup %5091 }
 0x9da   : > { %v5094_v10 = vpop.eup %5093  ;;  %v2166_v37 = vadd.f32 1.0, %v5092_v50  ;;  %v2320_v50 = vrot.slane %v6470_v57, 3 }
 0x9db   : > { %v5096_v44 = vpop.eup %5095  ;;  %v2164_v32 = vadd.f32 1.0, %v5094_v10 }
 0x9dc   : > { %v5098_v61 = vpop.eup %5097  ;;  %v2163_v11 = vadd.f32 1.0, %v5096_v44  ;;  %5107 = vrcp.f32 %v2166_v37 }
 0x9dd   : > { %v5100_v13 = vpop.eup %5099  ;;  %5109 = vrcp.f32 %v2164_v32  ;;  %v2167_v16 = vadd.f32 1.0, %v5098_v61 }
 0x9de   : > { %v5102_v20 = vpop.eup %5101  ;;  %5111 = vrcp.f32 %v2163_v11  ;;  %v2165_v30 = vadd.f32 1.0, %v5100_v13 }
 0x9df   : > { %v5104_v8 = vpop.eup %5103  ;;  %5113 = vrcp.f32 %v2167_v16  ;;  %v2168_v12 = vadd.f32 1.0, %v5102_v20 }
 0x9e0   : > { %v5106_v59 = vpop.eup %5105  ;;  %5115 = vrcp.f32 %v2165_v30  ;;  %v2169_v17 = vadd.f32 1.0, %v5104_v8 }
 0x9e1   : > { %5117 = vrcp.f32 %v2168_v12  ;;  %v2170_v41 = vadd.f32 1.0, %v5106_v59 }
 0x9e2   : > { %5119 = vrcp.f32 %v2169_v17 }
 0x9e3   : > { %5121 = vrcp.f32 %v2170_v41 }
 0x9e6   : > { %v6511_v22 = vpop.eup %5107 }
 0x9e7   : > { %v6514_v15 = vpop.eup %5109 }
 0x9e8   : > { %v6518_v29 = vpop.eup %5111 }
 0x9e9   : > { %v6522_v47 = vpop.eup %5113 }
 0x9ea   : > { %v6526_v55 = vpop.eup %5115 }
 0x9eb   : > { %v6530_v58 = vpop.eup %5117 }
 0x9ec   : > { %v6534_v25 = vpop.eup %5119 }
 0x9ed   : > { %v6538_v3 = vpop.eup %5121 }
 0xa3c   : > { %v2194_v26 = vpop.permute.xlu1 %2193 }
 0xa3d   : > { %v2214_v24 = vmul.f32 %v6511_v22, %v2194_v26 }
 0xa3e   : > { %v2190_v31 = vpop.permute.xlu0 %2189 }
 0xa3f   : > { %v2212_v27 = vmul.f32 %v6514_v15, %v2190_v31  ;;  %2233 = vrot.lane.b32.xlu1 %v2214_v24, %s5551_s23 }
 0xa40   : > { %v2188_v45 = vpop.permute.xlu1 %2187 }
 0xa41   : > { %v2211_v33 = vmul.f32 %v6518_v29, %v2188_v45  ;;  %2229 = vrot.lane.b32.xlu0 %v2212_v27, %s5551_s23 }
 0xa42   : > { %v2196_v34 = vpop.permute.xlu0 %2195 }
 0xa43   : > { %v2215_v60 = vmul.f32 %v6522_v47, %v2196_v34  ;;  %2227 = vrot.lane.b32.xlu1 %v2211_v33, %s5551_s23  ;;  %v2321_v34 = vrot.slane %v6470_v57, 4 }
 0xa44   : > { %v2192_v49 = vpop.permute.xlu1 %2191 }
 0xa45   : > { %v2213_v36 = vmul.f32 %v6526_v55, %v2192_v49  ;;  %2235 = vrot.lane.b32.xlu0 %v2215_v60, %s5551_s23  ;;  %v2362_v49 = vstv %s2040_s11  ;;  %s5427_s11 = sshll.u32 %s5556_s13, 4  ;;  %s5428_s11 = int_to_ptr.vmem [resolvable:$false] %s5427_s11 }
 0xa46   : > { %v2198_v5 = vpop.permute.xlu0 %2197  ;;  %vm2363_vm7 = vcmp.lt.s32.totalorder %v2362_v49, %v6440_v54  ;;  %p5430_p4 = scmp.lt.s32.totalorder %s7140_s17, %s5428_s11 }
 0xa47   : > { %v2216_v23 = vmul.f32 %v6530_v58, %v2198_v5  ;;  %2231 = vrot.lane.b32.xlu1 %v2213_v36, %s5551_s23  ;;  %v2364_v5 = vsel %vm2363_vm7, 1, %v5554_v28 }
 0xa48   : > { %v2200_v38 = vpop.permute.xlu1 %2199 }
 0xa49   : > { %v2217_v40 = vmul.f32 %v6534_v25, %v2200_v38  ;;  %2237 = vrot.lane.b32.xlu0 %v2216_v23, %s5551_s23 }
 0xa4a   : > { %v2202_v21 = vpop.permute.xlu0 %2201 }
 0xa4b   : > { %v2218_v48 = vmul.f32 %v6538_v3, %v2202_v21  ;;  %2239 = vrot.lane.b32.xlu1 %v2217_v40, %s5551_s23 }
 0xa4d   : > { %2241 = vrot.lane.b32.xlu0 %v2218_v48, %s5551_s23 }
 0xa4f   : > { %2322 = vrot.lane.b32.xlu1 %v2315_v63, %s5552_s2 }
 0xa51   : > { %2324 = vrot.lane.b32.xlu0 %v2316_v2, %s5552_s2 }
 0xa53   : > { %2328 = vrot.lane.b32.xlu1 %v6470_v57, %s5552_s2 }
 0xa55   : > { %2326 = vrot.lane.b32.xlu0 %v2317_v6, %s5552_s2 }
 0xa59   : > { %2330 = vrot.lane.b32.xlu0 %v2318_v19, %s5552_s2  ;;  %v2267_v19 = vsub.f32 1.0, %v6518_v29 }
 0xa5d   : > { %2332 = vrot.lane.b32.xlu0 %v2319_v56, %s5552_s2 }
 0xa61   : > { %2334 = vrot.lane.b32.xlu0 %v2320_v50, %s5552_s2 }
 0xab1   : > { %v2234_v62 = vpop.permute.xlu1 %2233 }
 0xab2   : > { %v2254_v10 = vadd.f32 %v2234_v62, %v6035_v18  ;;  %v2268_v62 = vsub.f32 1.0, %v6514_v15 }
 0xab3   : > { %v2230_v37 = vpop.permute.xlu0 %2229 }
 0xab4   : > { %5123 = vtanh.f32 %v2254_v10  ;;  %v2252_v44 = vadd.f32 %v2230_v37, %v6002_v43 }
 0xab5   : > { %v2228_v32 = vpop.permute.xlu1 %2227 }
 0xab6   : > { %5125 = vtanh.f32 %v2252_v44  ;;  %v2251_v61 = vadd.f32 %v2228_v32, %v5984_v52  ;;  %v2269_v32 = vsub.f32 1.0, %v6526_v55 }
 0xab7   : > { %v2236_v11 = vpop.permute.xlu0 %2235 }
 0xab8   : > { %5127 = vtanh.f32 %v2251_v61  ;;  %v2255_v30 = vadd.f32 %v2236_v11, %v6066_v4 }
 0xab9   : > { %v2232_v13 = vpop.permute.xlu1 %2231 }
 0xaba   : > { %v2253_v16 = vadd.f32 %v2232_v13, %v6024_v7 }
 0xabb   : > { %v2238_v20 = vpop.permute.xlu0 %2237 }
 0xabc   : > { %5129 = vtanh.f32 %v2253_v16  ;;  %v2256_v8 = vadd.f32 %v2238_v20, %v6053_v35 }
 0xabd   : > { %v2240_v12 = vpop.permute.xlu1 %2239 }
 0xabe   : > { %v5124_v59 = vpop.eup %5123  ;;  %5131 = vtanh.f32 %v2256_v8  ;;  %v2257_v41 = vadd.f32 %v2240_v12, %v6084_v39  ;;  %v2271_v12 = vsub.f32 1.0, %v6522_v47 }
 0xabf   : > { %2289 = vrot.lane.b32.xlu1 %v5124_v59, %s5553_s21  ;;  %5133 = vtanh.f32 %v2255_v30  ;;  %v2242_v26 = vpop.permute.xlu0 %2241  ;;  %v2270_v59 = vsub.f32 1.0, %v6511_v22 }
 0xac0   : > { %v5126_v17 = vpop.eup %5125  ;;  %5135 = vtanh.f32 %v2257_v41  ;;  %v2258_v31 = vadd.f32 %v2242_v26, %v6079_v42 }
 0xac1   : > { %2285 = vrot.lane.b32.xlu0 %v5126_v17, %s5553_s21  ;;  %v2323_v21 = vpop.permute.xlu1 %2322 }
 0xac2   : > { %v5128_v24 = vpop.eup %5127  ;;  %5137 = vtanh.f32 %v2258_v31  ;;  %v2346_v37 = vmul.f32 %v6518_v29, %v2323_v21 }
 0xac3   : > { %2283 = vrot.lane.b32.xlu1 %v5128_v24, %s5553_s21  ;;  %v2325_v23 = vpop.permute.xlu0 %2324  ;;  %v2272_v24 = vsub.f32 1.0, %v6530_v58 }
 0xac4   : > { %v2347_v11 = vmul.f32 %v6514_v15, %v2325_v23  ;;  %v2273_v15 = vsub.f32 1.0, %v6534_v25 }
 0xac5   : > { %v2329_v63 = vpop.permute.xlu1 %2328 }
 0xac6   : > { %v5130_v27 = vpop.eup %5129 }
 0xac7   : > { %2287 = vrot.lane.b32.xlu1 %v5130_v27, %s5553_s21  ;;  %v2327_v38 = vpop.permute.xlu0 %2326 }
 0xac8   : > { %v5132_v45 = vpop.eup %5131  ;;  %v2348_v13 = vmul.f32 %v6526_v55, %v2327_v38 }
 0xac9   : > { %2293 = vrot.lane.b32.xlu0 %v5132_v45, %s5553_s21  ;;  %v5134_v33 = vpop.eup %5133 }
 0xaca   : > { %v5136_v60 = vpop.eup %5135 }
 0xacb   : > { %2291 = vrot.lane.b32.xlu1 %v5134_v33, %s5553_s21  ;;  %v2331_v40 = vpop.permute.xlu0 %2330 }
 0xacc   : > { %v5138_v36 = vpop.eup %5137  ;;  %v2350_v29 = vmul.f32 %v6522_v47, %v2331_v40 }
 0xacd   : > { %2336 = vrot.lane.b32.xlu0 %v2321_v34, %s5552_s2 }
 0xacf   : > { %2295 = vrot.lane.b32.xlu1 %v5136_v60, %s5553_s21  ;;  %v2333_v48 = vpop.permute.xlu0 %2332  ;;  %v2349_v60 = vmul.f32 %v6511_v22, %v2329_v63 }
 0xad3   : > { %2297 = vrot.lane.b32.xlu1 %v5138_v36, %s5553_s21  ;;  %v2335_v2 = vpop.permute.xlu0 %2334  ;;  %v2351_v36 = vmul.f32 %v6530_v58, %v2333_v48 }
 0xad7   : > { %2366 = vperm.xlu1 %4946, %v2364_v5   ;;  %v2352_v5 = vmul.f32 %v6534_v25, %v2335_v2 }
 0xb31   : > { %v2290_v6 = vpop.permute.xlu1 %2289 }
 0xb32   : > { %v2310_v55 = vmul.f32 %v2290_v6, %v2270_v59 }
 0xb33   : > { %v2286_v56 = vpop.permute.xlu0 %2285 }
 0xb34   : > { %v2308_v44 = vmul.f32 %v2286_v56, %v2268_v62 }
 0xb35   : > { %v2284_v50 = vpop.permute.xlu1 %2283 }
 0xb36   : > { %v2307_v10 = vmul.f32 %v2284_v50, %v2267_v19  ;;  %v2355_v30 = vadd.f32 %v2347_v11, %v2308_v44  ;;  %v2357_v19 = vadd.f32 %v2349_v60, %v2310_v55  ;;  %v2274_v50 = vsub.f32 1.0, %v6538_v3 }
 0xb38   : > { %v2354_v16 = vadd.f32 %v2346_v37, %v2307_v10  ;;  %v2378_v45 = vrot.slane %v2355_v30, 2 }
 0xb39   : > { %v2288_v61 = vpop.permute.xlu1 %2287 }
 0xb3a   : > { %v2309_v20 = vmul.f32 %v2288_v61, %v2269_v32  ;;  %v2377_v26 = vrot.slane %v2354_v16, 3 }
 0xb3b   : > { %v2294_v17 = vpop.permute.xlu0 %2293 }
 0xb3c   : > { %v2356_v8 = vadd.f32 %v2348_v13, %v2309_v20  ;;  %v2312_v33 = vmul.f32 %v2294_v17, %v2272_v24  ;;  %v2379_v47 = vsel %vm1104_vm11, %v2378_v45, %v2377_v26 }
 0xb3d   : > { %v2292_v41 = vpop.permute.xlu1 %2291 }
 0xb3e   : > { %v2311_v31 = vmul.f32 %v2292_v41, %v2271_v12  ;;  %v2380_v27 = vrot.slane %v2356_v8, 1  ;;  %v2359_v56 = vadd.f32 %v2351_v36, %v2312_v33 }
 0xb3f   : > { %v2337_v21 = vpop.permute.xlu0 %2336 }
 0xb40   : > { %v2358_v34 = vadd.f32 %v2350_v29, %v2311_v31  ;;  %v2381_v38 = vsel %vm1107_vm12, %v2380_v27, %v2379_v47  ;;  %v2353_v63 = vmul.f32 %v6538_v3, %v2337_v21  ;;  %v2385_v2 = vrot.slane %v2359_v56, 6 }
 0xb41   : > { %v2296_v49 = vpop.permute.xlu1 %2295  ;;  %v2382_v22 = vsel %vm1110_vm13, %v2357_v19, %v2381_v38 }
 0xb42   : > { %v2313_v23 = vmul.f32 %v2296_v49, %v2273_v15  ;;  %v2383_v40 = vrot.slane %v2358_v34, 7 }
 0xb44   : > { %v2360_v6 = vadd.f32 %v2352_v5, %v2313_v23  ;;  %v2384_v25 = vsel %vm1113_vm14, %v2383_v40, %v2382_v22 }
 0xb45   : > { %v2298_v62 = vpop.permute.xlu1 %2297  ;;  %v2386_v44 = vsel %vm1116_vm15, %v2385_v2, %v2384_v25 }
 0xb46   : > { %v2314_v58 = vmul.f32 %v2298_v62, %v2274_v50  ;;  %v2387_v48 = vrot.slane %v2360_v6, 5 }
 0xb48   : > { %v2361_v10 = vadd.f32 %v2353_v63, %v2314_v58  ;;  %v2388_v32 = vsel %vm1119_vm10, %v2387_v48, %v2386_v44 }
 0xb4a   : > { %v2389_v37 = vrot.slane %v2361_v10, 4 }
 0xb4c   : > { %v2390_v61 = vsel %vm1122_vm8, %v2389_v37, %v2388_v32 }
 0xb4d   : > { %2391 = vrot.lane.b32.xlu0 %v2390_v61, %s5553_s21 }
 0xb56   : > { %v2367_v11 = vpop.permute.xlu1 %2366 }
 0xb57   : > { %vm2368_vm7 = vcmp.eq.s32.totalorder %v2367_v11, 1 }
 0xbbf   : > { %v2392_v13 = vpop.permute.xlu0 %2391 }
 0xbc0   : > { %v2394_v16 = vsel %vm2368_vm7, %v2392_v13, 0.0  ;;  %v6604_v3 = vsel %vm2368_vm7, %v2392_v13, %v6470_v57 }
 0xbc1   : > { %v2396_v20 = vcombine.high %v2394_v16, %v2394_v16  ;;  %v2403_v30 = vrot.slane %v2394_v16, %v6191_v53  ;;  %4760 = vmatmul.mubr.msk.f32.vlgmr.msra.gmra.mrb[10].mxu0 %vm452_vm0, %v6604_v3 }
 0xbc2   : > { %4841 = vmatpush3.bf16.msra.mxu0 %v5819_v9  ;;  %4781 = vmatprep.mubr.msk.f32.mxu0 %vm5550_vm1, %v5549_v1 }
 0xbc3   : > { %v2410_v8 = vrot.slane %v2396_v20, %v6191_v53  ;;  %v2411_v12 = vcombine.high %v2403_v30, %v2403_v30  ;;  %v2419_v59 = vrot.slane %v2403_v30, %v6191_v53  ;;  %4842 = vmatprep.subr.bf16.mxu0 %v5548_v0 }
 0xbc5   : > { %v2412_v57 = vcombine.high %v2410_v8, %v2410_v8  ;;  %v2426_v17 = vrot.slane %v2410_v8, %v6191_v53  ;;  %v2433_v41 = vrot.slane %v2411_v12, %v6191_v53  ;;  %v2441_v29 = vcombine.high %v2419_v59, %v2419_v59  ;;  %2453 = vst.msk [vmem:[#allocation3 + $0x3] sm:$0x1] %vm1186_vm6, %v2419_v59 }
 0xbc6   : > { %4844 = vmatpush3.bf16.msra.mxu0 %v5823_v14 }
 0xbc7   : > { %v2440_v26 = vrot.slane %v2412_v57, %v6191_v53  ;;  %v2442_v24 = vcombine.high %v2426_v17, %v2426_v17  ;;  %v2443_v31 = vcombine.high %v2433_v41, %v2433_v41  ;;  %2454 = vst.msk [vmem:[#allocation3 + $0xb] sm:$0x1] %vm1186_vm6, %v2433_v41  ;;  %2455 = vst.msk [vmem:[#allocation3 + $0x13] sm:$0x1] %vm1186_vm6, %v2441_v29 }
 0xbc8   : > { %2457 = vst.msk [vmem:[#allocation3 + $0x23] sm:$0x1] %vm1186_vm6, %v2426_v17 }
 0xbc9   : > { %v2444_v27 = vcombine.high %v2440_v26, %v2440_v26  ;;  %2456 = vst.msk [vmem:[#allocation3 + $0x1b] sm:$0x1] %vm1186_vm6, %v2443_v31  ;;  %2458 = vst.msk [vmem:[#allocation3 + $0x2b] sm:$0x1] %vm1186_vm6, %v2440_v26 }
 0xbca   : > { %2459 = vst.msk [vmem:[#allocation3 + $0x33] sm:$0x1] %vm1186_vm6, %v2442_v24 }
 0xbcb   : > { %2460 = vst.msk [vmem:[#allocation3 + $0x3b] sm:$0x1] %vm1186_vm6, %v2444_v27 }
 0xc94   : > { %v2533_v15 = vpop.f32.mrb[10].mxu0 }
 0xc95   : > { %v2534_v55 = vadd.f32 %v6353_v51, %v2533_v15  ;;  %v4761_v45 = vpop.f32.mrb[11].mxu0 }
 0xc97   : > { %2617 = vrot.lane.b32.xlu0 %v2534_v55, %s5551_s23  ;;  %v2538_v33 = vrot.slane %v2534_v55, 4  ;;  %v2539_v34 = vrot.slane %v2534_v55, 5  ;;  %v2540_v60 = vrot.slane %v2534_v55, 6  ;;  %v2541_v49 = vrot.slane %v2534_v55, 7 }
 0xc98   : > { %v2542_v36 = vrot.slane %v2534_v55, 1  ;;  %v2544_v5 = vrot.slane %v2534_v55, 3  ;;  %v2543_v51 = vrot.slane %v2534_v55, 2  ;;  %v2557_v47 = vadd.f32 %v2534_v55, %v6066_v4 }
 0xc99   : > { %2609 = vrot.lane.b32.xlu1 %v2538_v33, %s5551_s23  ;;  %v2553_v23 = vadd.f32 %v2538_v33, %v5984_v52  ;;  %v2554_v38 = vadd.f32 %v2539_v34, %v6002_v43  ;;  %v2555_v19 = vadd.f32 %v2540_v60, %v6024_v7  ;;  %v2556_v6 = vadd.f32 %v2541_v49, %v6035_v18 }
 0xc9a   : > { %v4593_v40 = vmul.f32 -1.442695, %v2557_v47  ;;  %v2558_v62 = vadd.f32 %v2542_v36, %v6053_v35  ;;  %v2560_v63 = vadd.f32 %v2544_v5, %v6079_v42  ;;  %v2559_v25 = vadd.f32 %v2543_v51, %v6084_v39 }
 0xc9b   : > { %2611 = vrot.lane.b32.xlu0 %v2539_v34, %s5551_s23  ;;  %v4589_v21 = vmul.f32 -1.442695, %v2553_v23  ;;  %v4590_v56 = vmul.f32 -1.442695, %v2554_v38  ;;  %v4591_v50 = vmul.f32 -1.442695, %v2555_v19 }
 0xc9c   : > { %5139 = vpow2.f32 %v4593_v40  ;;  %v4592_v22 = vmul.f32 -1.442695, %v2556_v6  ;;  %v4594_v58 = vmul.f32 -1.442695, %v2558_v62  ;;  %v4596_v48 = vmul.f32 -1.442695, %v2560_v63 }
 0xc9d   : > { %2613 = vrot.lane.b32.xlu1 %v2540_v60, %s5551_s23  ;;  %5141 = vpow2.f32 %v4589_v21  ;;  %v4595_v10 = vmul.f32 -1.442695, %v2559_v25  ;;  %v2738_v62 = vrot.slane %v6604_v3, 5  ;;  %v2739_v63 = vrot.slane %v6604_v3, 6 }
 0xc9e   : > { %5143 = vpow2.f32 %v4590_v56  ;;  %v2741_v25 = vrot.slane %v6604_v3, 1 }
 0xc9f   : > { %2615 = vrot.lane.b32.xlu0 %v2541_v49, %s5551_s23  ;;  %5145 = vpow2.f32 %v4591_v50 }
 0xca0   : > { %5147 = vpow2.f32 %v4592_v22  ;;  %v2737_v22 = vrot.slane %v6604_v3, 4 }
 0xca1   : > { %2619 = vrot.lane.b32.xlu1 %v2542_v36, %s5551_s23  ;;  %5149 = vpow2.f32 %v4594_v58  ;;  %v2740_v58 = vrot.slane %v6604_v3, 7 }
 0xca2   : > { %5151 = vpow2.f32 %v4596_v48  ;;  %v2742_v48 = vrot.slane %v6604_v3, 2 }
 0xca3   : > { %2623 = vrot.lane.b32.xlu0 %v2544_v5, %s5551_s23  ;;  %5153 = vpow2.f32 %v4595_v10 }
 0xca5   : > { %2621 = vrot.lane.b32.xlu1 %v2543_v51, %s5551_s23 }
 0xca6   : > { %v5140_v2 = vpop.eup %5139 }
 0xca7   : > { %v5142_v37 = vpop.eup %5141  ;;  %v2589_v44 = vadd.f32 1.0, %v5140_v2 }
 0xca8   : > { %v5144_v32 = vpop.eup %5143  ;;  %v2585_v61 = vadd.f32 1.0, %v5142_v37 }
 0xca9   : > { %v5146_v11 = vpop.eup %5145  ;;  %v2586_v13 = vadd.f32 1.0, %v5144_v32  ;;  %5155 = vrcp.f32 %v2589_v44 }
 0xcaa   : > { %v5148_v16 = vpop.eup %5147  ;;  %5157 = vrcp.f32 %v2585_v61  ;;  %v2587_v20 = vadd.f32 1.0, %v5146_v11 }
 0xcab   : > { %v5150_v30 = vpop.eup %5149  ;;  %5159 = vrcp.f32 %v2586_v13  ;;  %v2588_v8 = vadd.f32 1.0, %v5148_v16 }
 0xcac   : > { %v5152_v12 = vpop.eup %5151  ;;  %5161 = vrcp.f32 %v2587_v20  ;;  %v2590_v59 = vadd.f32 1.0, %v5150_v30 }
 0xcad   : > { %v5154_v57 = vpop.eup %5153  ;;  %5163 = vrcp.f32 %v2588_v8  ;;  %v2592_v17 = vadd.f32 1.0, %v5152_v12 }
 0xcae   : > { %5165 = vrcp.f32 %v2590_v59  ;;  %v2591_v29 = vadd.f32 1.0, %v5154_v57 }
 0xcaf   : > { %5167 = vrcp.f32 %v2592_v17 }
 0xcb0   : > { %5169 = vrcp.f32 %v2591_v29 }
 0xcb3   : > { %v6644_v41 = vpop.eup %5155 }
 0xcb4   : > { %v6647_v31 = vpop.eup %5157 }
 0xcb5   : > { %v6651_v55 = vpop.eup %5159 }
 0xcb6   : > { %v6655_v34 = vpop.eup %5161 }
 0xcb7   : > { %v6659_v36 = vpop.eup %5163 }
 0xcb8   : > { %v6663_v47 = vpop.eup %5165 }
 0xcb9   : > { %v6667_v40 = vpop.eup %5167 }
 0xcba   : > { %v6671_v56 = vpop.eup %5169 }
 0xd09   : > { %v2618_v26 = vpop.permute.xlu0 %2617 }
 0xd0a   : > { %v2637_v24 = vmul.f32 %v6644_v41, %v2618_v26 }
 0xd0b   : > { %v2610_v27 = vpop.permute.xlu1 %2609 }
 0xd0c   : > { %v2633_v15 = vmul.f32 %v6647_v31, %v2610_v27  ;;  %2657 = vrot.lane.b32.xlu0 %v2637_v24, %s5551_s23 }
 0xd0d   : > { %v2612_v45 = vpop.permute.xlu0 %2611 }
 0xd0e   : > { %v2634_v33 = vmul.f32 %v6651_v55, %v2612_v45  ;;  %2649 = vrot.lane.b32.xlu1 %v2633_v15, %s5551_s23 }
 0xd0f   : > { %v2614_v60 = vpop.permute.xlu1 %2613 }
 0xd10   : > { %v2635_v49 = vmul.f32 %v6655_v34, %v2614_v60  ;;  %2651 = vrot.lane.b32.xlu0 %v2634_v33, %s5551_s23  ;;  %v2784_v60 = vstv %s2462_s9  ;;  %s5429_s9 = scalar_lea.vmem %s5428_s11, 256 }
 0xd11   : > { %v2616_v5 = vpop.permute.xlu0 %2615  ;;  %vm2785_vm7 = vcmp.lt.s32.totalorder %v2784_v60, %v6440_v54  ;;  %p5431_p10 = scmp.lt.s32.totalorder %s5429_s9, %s5423_s30 }
 0xd12   : > { %v2636_v51 = vmul.f32 %v6659_v36, %v2616_v5  ;;  %2653 = vrot.lane.b32.xlu1 %v2635_v49, %s5551_s23  ;;  %v2743_v49 = vrot.slane %v6604_v3, 3 }
 0xd13   : > { %v2620_v23 = vpop.permute.xlu1 %2619  ;;  %p5432_p5 = por %p5431_p10, %p5430_p4 }
 0xd14   : > { %v2638_v38 = vmul.f32 %v6663_v47, %v2620_v23  ;;  %2655 = vrot.lane.b32.xlu0 %v2636_v51, %s5551_s23  ;;  %v2786_v51 = vsel %vm2785_vm7, 1, %v5554_v28 }
 0xd15   : > { %v2624_v21 = vpop.permute.xlu0 %2623  ;;  %p5433_p2 = pnand %p5432_p5, %p5426_p1 }
 0xd16   : > { %v2640_v19 = vmul.f32 %v6667_v40, %v2624_v21  ;;  %2659 = vrot.lane.b32.xlu1 %v2638_v38, %s5551_s23 }
 0xd17   : > { %v2622_v6 = vpop.permute.xlu1 %2621 }
 0xd18   : > { %v2639_v50 = vmul.f32 %v6671_v56, %v2622_v6  ;;  %2663 = vrot.lane.b32.xlu0 %v2640_v19, %s5551_s23 }
 0xd1a   : > { %2661 = vrot.lane.b32.xlu1 %v2639_v50, %s5551_s23 }
 0xd1c   : > { %2746 = vrot.lane.b32.xlu0 %v2738_v62, %s5552_s2 }
 0xd1e   : > { %2744 = vrot.lane.b32.xlu1 %v2737_v22, %s5552_s2 }
 0xd20   : > { %2748 = vrot.lane.b32.xlu0 %v2739_v63, %s5552_s2  ;;  %v2690_v63 = vsub.f32 1.0, %v6651_v55 }
 0xd22   : > { %2752 = vrot.lane.b32.xlu1 %v6604_v3, %s5552_s2 }
 0xd24   : > { %2750 = vrot.lane.b32.xlu0 %v2740_v58, %s5552_s2  ;;  %v2689_v58 = vsub.f32 1.0, %v6647_v31 }
 0xd28   : > { %2754 = vrot.lane.b32.xlu0 %v2741_v25, %s5552_s2 }
 0xd2c   : > { %2756 = vrot.lane.b32.xlu0 %v2742_v48, %s5552_s2 }
 0xd7e   : > { %v2658_v2 = vpop.permute.xlu0 %2657 }
 0xd7f   : > { %v2677_v10 = vadd.f32 %v2658_v2, %v6066_v4 }
 0xd80   : > { %v2650_v37 = vpop.permute.xlu1 %2649 }
 0xd81   : > { %5171 = vtanh.f32 %v2677_v10  ;;  %v2673_v44 = vadd.f32 %v2650_v37, %v5984_v52 }
 0xd82   : > { %v2652_v32 = vpop.permute.xlu0 %2651 }
 0xd83   : > { %v2674_v61 = vadd.f32 %v2652_v32, %v6002_v43  ;;  %5173 = vtanh.f32 %v2673_v44  ;;  %v2691_v44 = vsub.f32 1.0, %v6655_v34 }
 0xd84   : > { %v2654_v11 = vpop.permute.xlu1 %2653 }
 0xd85   : > { %5175 = vtanh.f32 %v2674_v61  ;;  %v2675_v13 = vadd.f32 %v2654_v11, %v6024_v7 }
 0xd86   : > { %v2656_v16 = vpop.permute.xlu0 %2655 }
 0xd87   : > { %5177 = vtanh.f32 %v2675_v13  ;;  %v2676_v30 = vadd.f32 %v2656_v16, %v6035_v18 }
 0xd88   : > { %v2660_v20 = vpop.permute.xlu1 %2659 }
 0xd89   : > { %5179 = vtanh.f32 %v2676_v30  ;;  %v2678_v59 = vadd.f32 %v2660_v20, %v6053_v35  ;;  %v2692_v30 = vsub.f32 1.0, %v6659_v36 }
 0xd8a   : > { %v2664_v29 = vpop.permute.xlu0 %2663 }
 0xd8b   : > { %v5172_v8 = vpop.eup %5171  ;;  %v2680_v24 = vadd.f32 %v2664_v29, %v6079_v42  ;;  %v2695_v29 = vsub.f32 1.0, %v6671_v56 }
 0xd8c   : > { %2713 = vrot.lane.b32.xlu1 %v5172_v8, %s5553_s21  ;;  %v2662_v12 = vpop.permute.xlu1 %2661 }
 0xd8d   : > { %v2679_v57 = vadd.f32 %v2662_v12, %v6084_v39  ;;  %v5174_v17 = vpop.eup %5173 }
 0xd8e   : > { %v2747_v23 = vpop.permute.xlu0 %2746 }
 0xd8f   : > { %v5176_v26 = vpop.eup %5175  ;;  %5181 = vtanh.f32 %v2679_v57  ;;  %v2769_v10 = vmul.f32 %v6651_v55, %v2747_v23  ;;  %v2693_v55 = vsub.f32 1.0, %v6644_v41 }
 0xd90   : > { %2707 = vrot.lane.b32.xlu0 %v5176_v26, %s5553_s21  ;;  %2705 = vrot.lane.b32.xlu1 %v5174_v17, %s5553_s21  ;;  %5183 = vtanh.f32 %v2678_v59  ;;  %v2745_v19 = vpop.permute.xlu1 %2744 }
 0xd91   : > { %v5178_v27 = vpop.eup %5177  ;;  %5185 = vtanh.f32 %v2680_v24  ;;  %v2768_v37 = vmul.f32 %v6647_v31, %v2745_v19 }
 0xd92   : > { %v2749_v38 = vpop.permute.xlu0 %2748 }
 0xd93   : > { %v5180_v15 = vpop.eup %5179  ;;  %v2770_v61 = vmul.f32 %v6655_v34, %v2749_v38  ;;  %v2694_v34 = vsub.f32 1.0, %v6663_v47 }
 0xd94   : > { %2709 = vrot.lane.b32.xlu1 %v5178_v27, %s5553_s21  ;;  %v2753_v50 = vpop.permute.xlu1 %2752 }
 0xd96   : > { %v2751_v21 = vpop.permute.xlu0 %2750 }
 0xd97   : > { %v2771_v12 = vmul.f32 %v6659_v36, %v2751_v21 }
 0xd98   : > { %2711 = vrot.lane.b32.xlu1 %v5180_v15, %s5553_s21 }
 0xd99   : > { %v5182_v45 = vpop.eup %5181 }
 0xd9a   : > { %2717 = vrot.lane.b32.xlu0 %v5182_v45, %s5553_s21  ;;  %v5184_v33 = vpop.eup %5183  ;;  %v2755_v6 = vpop.permute.xlu0 %2754 }
 0xd9b   : > { %v5186_v5 = vpop.eup %5185 }
 0xd9c   : > { %2715 = vrot.lane.b32.xlu1 %v5184_v33, %s5553_s21  ;;  %v2773_v33 = vmul.f32 %v6663_v47, %v2755_v6 }
 0xd9e   : > { %2758 = vrot.lane.b32.xlu0 %v2743_v49, %s5552_s2  ;;  %v2757_v62 = vpop.permute.xlu0 %2756 }
 0xda0   : > { %2719 = vrot.lane.b32.xlu1 %v5186_v5, %s5553_s21  ;;  %v2772_v5 = vmul.f32 %v6644_v41, %v2753_v50 }
 0xda4   : > { %2788 = vperm.xlu1 %4946, %v2786_v51   ;;  %v2774_v51 = vmul.f32 %v6671_v56, %v2757_v62 }
 0xdfe   : > { %v2714_v22 = vpop.permute.xlu1 %2713 }
 0xdff   : > { %v2733_v27 = vmul.f32 %v2714_v22, %v2693_v55  ;;  %v2696_v22 = vsub.f32 1.0, %v6667_v40 }
 0xe02   : > { %v2708_v25 = vpop.permute.xlu0 %2707  ;;  %v2706_v54 = vpop.permute.xlu1 %2705 }
 0xe03   : > { %v2730_v48 = vmul.f32 %v2708_v25, %v2690_v63  ;;  %v2729_v2 = vmul.f32 %v2706_v54, %v2689_v58  ;;  %v2780_v63 = vadd.f32 %v2772_v5, %v2733_v27 }
 0xe05   : > { %v2777_v11 = vadd.f32 %v2769_v10, %v2730_v48  ;;  %v2776_v13 = vadd.f32 %v2768_v37, %v2729_v2 }
 0xe06   : > { %v2710_v32 = vpop.permute.xlu1 %2709 }
 0xe07   : > { %v2731_v16 = vmul.f32 %v2710_v32, %v2691_v44  ;;  %v2800_v59 = vrot.slane %v2777_v11, 3  ;;  %v2799_v57 = vrot.slane %v2776_v13, 4 }
 0xe09   : > { %v2778_v20 = vadd.f32 %v2770_v61, %v2731_v16  ;;  %v2801_v60 = vsel %vm1104_vm11, %v2800_v59, %v2799_v57  ;;  %v6761_v57 = vld [vmem:[%s5860_s20] ss:$0 sm:$0xff]  ;;  %s2884_s20 = scalar_select %p447_p9, 5, 2 }
 0xe0a   : > { %v2712_v8 = vpop.permute.xlu1 %2711 }
 0xe0b   : > { %v2732_v17 = vmul.f32 %v2712_v8, %v2692_v30  ;;  %v2802_v31 = vrot.slane %v2778_v20, 2 }
 0xe0c   : > { %v2718_v26 = vpop.permute.xlu0 %2717 }
 0xe0d   : > { %v2779_v24 = vadd.f32 %v2771_v12, %v2732_v17  ;;  %v2735_v15 = vmul.f32 %v2718_v26, %v2695_v29  ;;  %v2803_v23 = vsel %vm1107_vm12, %v2802_v31, %v2801_v60 }
 0xe0e   : > { %v2716_v45 = vpop.permute.xlu1 %2715 }
 0xe0f   : > { %v2804_v36 = vrot.slane %v2779_v24, 1  ;;  %v2734_v49 = vmul.f32 %v2716_v45, %v2694_v34  ;;  %v2782_v58 = vadd.f32 %v2774_v51, %v2735_v15 }
 0xe10   : > { %v2759_v38 = vpop.permute.xlu0 %2758 }
 0xe11   : > { %v2805_v21 = vsel %vm1110_vm13, %v2804_v36, %v2803_v23  ;;  %v2781_v19 = vadd.f32 %v2773_v33, %v2734_v49  ;;  %v2775_v6 = vmul.f32 %v6667_v40, %v2759_v38  ;;  %v2809_v50 = vrot.slane %v2782_v58, 6 }
 0xe12   : > { %v2720_v25 = vpop.permute.xlu1 %2719  ;;  %v2806_v48 = vsel %vm1113_vm14, %v2780_v63, %v2805_v21 }
 0xe13   : > { %v2807_v47 = vrot.slane %v2781_v19, 7  ;;  %v2736_v54 = vmul.f32 %v2720_v25, %v2696_v22 }
 0xe15   : > { %v2783_v41 = vadd.f32 %v2775_v6, %v2736_v54  ;;  %v2808_v56 = vsel %vm1116_vm15, %v2807_v47, %v2806_v48 }
 0xe16   : > { %v2810_v2 = vsel %vm1119_vm10, %v2809_v50, %v2808_v56 }
 0xe17   : > { %v2811_v62 = vrot.slane %v2783_v41, 5 }
 0xe19   : > { %v2812_v10 = vsel %vm1122_vm8, %v2811_v62, %v2810_v2 }
 0xe1a   : > { %2813 = vrot.lane.b32.xlu0 %v2812_v10, %s5553_s21 }
 0xe23   : > { %v2789_v37 = vpop.permute.xlu1 %2788 }
 0xe24   : > { %vm2790_vm7 = vcmp.eq.s32.totalorder %v2789_v37, 1 }
 0xe8c   : > { %v2814_v44 = vpop.permute.xlu0 %2813 }
 0xe8d   : > { %v2816_v32 = vsel %vm2790_vm7, %v2814_v44, 0.0  ;;  %v6737_v40 = vsel %vm2790_vm7, %v2814_v44, %v6604_v3 }
 0xe8e   : > { %v2818_v61 = vcombine.high %v2816_v32, %v2816_v32  ;;  %v2825_v11 = vrot.slane %v2816_v32, %v6191_v53  ;;  %4771 = vmatmul.mubr.msk.f32.vlgmr.msra.gmra.mrb[6].mxu1 %vm452_vm0, %v6737_v40 }
 0xe8f   : > { %4847 = vmatpush3.bf16.msra.mxu1 %v5819_v9  ;;  %4792 = vmatprep.mubr.msk.f32.mxu1 %vm5550_vm1, %v5549_v1 }
 0xe90   : > { %v2832_v13 = vrot.slane %v2818_v61, %v6191_v53  ;;  %v2833_v16 = vcombine.high %v2825_v11, %v2825_v11  ;;  %v2841_v20 = vrot.slane %v2825_v11, %v6191_v53  ;;  %4848 = vmatprep.subr.bf16.mxu1 %v5548_v0 }
 0xe92   : > { %v2834_v3 = vcombine.high %v2832_v13, %v2832_v13  ;;  %v2848_v30 = vrot.slane %v2832_v13, %v6191_v53  ;;  %v2855_v8 = vrot.slane %v2833_v16, %v6191_v53  ;;  %v2863_v12 = vcombine.high %v2841_v20, %v2841_v20  ;;  %2875 = vst.msk [vmem:[#allocation3 + $0x4] sm:$0x1] %vm1186_vm6, %v2841_v20 }
 0xe93   : > { %4850 = vmatpush3.bf16.msra.mxu1 %v5823_v14 }
 0xe94   : > { %v2862_v1 = vrot.slane %v2834_v3, %v6191_v53  ;;  %v2864_v9 = vcombine.high %v2848_v30, %v2848_v30  ;;  %v2865_v59 = vcombine.high %v2855_v8, %v2855_v8  ;;  %2876 = vst.msk [vmem:[#allocation3 + $0xc] sm:$0x1] %vm1186_vm6, %v2855_v8  ;;  %2877 = vst.msk [vmem:[#allocation3 + $0x14] sm:$0x1] %vm1186_vm6, %v2863_v12 }
 0xe95   : > { %2879 = vst.msk [vmem:[#allocation3 + $0x24] sm:$0x1] %vm1186_vm6, %v2848_v30 }
 0xe96   : > { %v2866_v0 = vcombine.high %v2862_v1, %v2862_v1  ;;  %2878 = vst.msk [vmem:[#allocation3 + $0x1c] sm:$0x1] %vm1186_vm6, %v2865_v59  ;;  %2880 = vst.msk [vmem:[#allocation3 + $0x2c] sm:$0x1] %vm1186_vm6, %v2862_v1 }
 0xe97   : > { %2881 = vst.msk [vmem:[#allocation3 + $0x34] sm:$0x1] %vm1186_vm6, %v2864_v9 }
 0xe98   : > { %2882 = vst.msk [vmem:[#allocation3 + $0x3c] sm:$0x1] %vm1186_vm6, %v2866_v0 }
 0xf61   : > { %v2955_v14 = vpop.f32.mrb[6].mxu1 }
 0xf62   : > { %v2956_v17 = vadd.f32 %v6761_v57, %v2955_v14  ;;  %v4772_v55 = vpop.f32.mrb[7].mxu1 }
 0xf64   : > { %v2961_v31 = vrot.slane %v2956_v17, 4  ;;  %v2960_v29 = vrot.slane %v2956_v17, 3  ;;  %v2963_v26 = vrot.slane %v2956_v17, 6  ;;  %v2962_v24 = vrot.slane %v2956_v17, 5 }
 0xf65   : > { %v2965_v34 = vrot.slane %v2956_v17, 1  ;;  %v2964_v27 = vrot.slane %v2956_v17, 7  ;;  %v2966_v15 = vrot.slane %v2956_v17, 2  ;;  %v2980_v58 = vadd.f32 %v2956_v17, %v6053_v35 }
 0xf66   : > { %3033 = vrot.lane.b32.xlu0 %v2961_v31, %s5551_s23  ;;  %3031 = vrot.lane.b32.xlu1 %v2960_v29, %s5551_s23  ;;  %v2976_v45 = vadd.f32 %v2961_v31, %v6002_v43  ;;  %v2975_v33 = vadd.f32 %v2960_v29, %v5984_v52  ;;  %v2978_v36 = vadd.f32 %v2963_v26, %v6035_v18 }
 0xf67   : > { %v2977_v5 = vadd.f32 %v2962_v24, %v6024_v7  ;;  %v2981_v23 = vadd.f32 %v2965_v34, %v6084_v39  ;;  %v2979_v21 = vadd.f32 %v2964_v27, %v6066_v4  ;;  %v2982_v22 = vadd.f32 %v2966_v15, %v6079_v42 }
 0xf68   : > { %v4599_v60 = vmul.f32 -1.442695, %v2976_v45  ;;  %v4598_v49 = vmul.f32 -1.442695, %v2975_v33  ;;  %v4601_v51 = vmul.f32 -1.442695, %v2978_v36 }
 0xf69   : > { %v4600_v38 = vmul.f32 -1.442695, %v2977_v5  ;;  %v4604_v19 = vmul.f32 -1.442695, %v2981_v23  ;;  %v4602_v63 = vmul.f32 -1.442695, %v2979_v21 }
 0xf6a   : > { %3037 = vrot.lane.b32.xlu0 %v2963_v26, %s5551_s23  ;;  %3035 = vrot.lane.b32.xlu1 %v2962_v24, %s5551_s23  ;;  %5187 = vpow2.f32 %v4599_v60  ;;  %v4605_v25 = vmul.f32 -1.442695, %v2982_v22  ;;  %v4603_v47 = vmul.f32 -1.442695, %v2980_v58  ;;  %v3160_v5 = vrot.slane %v6737_v40, 4 }
 0xf6b   : > { %5189 = vpow2.f32 %v4598_v49  ;;  %v3161_v23 = vrot.slane %v6737_v40, 5  ;;  %v3163_v21 = vrot.slane %v6737_v40, 7 }
 0xf6c   : > { %5191 = vpow2.f32 %v4601_v51  ;;  %v3159_v51 = vrot.slane %v6737_v40, 3 }
 0xf6d   : > { %5193 = vpow2.f32 %v4600_v38  ;;  %v3162_v38 = vrot.slane %v6737_v40, 6 }
 0xf6e   : > { %3043 = vrot.lane.b32.xlu0 %v2965_v34, %s5551_s23  ;;  %3039 = vrot.lane.b32.xlu1 %v2964_v27, %s5551_s23  ;;  %5195 = vpow2.f32 %v4604_v19  ;;  %v3164_v19 = vrot.slane %v6737_v40, 1 }
 0xf6f   : > { %5197 = vpow2.f32 %v4602_v63 }
 0xf70   : > { %5199 = vpow2.f32 %v4605_v25 }
 0xf71   : > { %5201 = vpow2.f32 %v4603_v47 }
 0xf72   : > { %3045 = vrot.lane.b32.xlu0 %v2966_v15, %s5551_s23  ;;  %3041 = vrot.lane.b32.xlu1 %v2956_v17, %s5551_s23 }
 0xf74   : > { %v5188_v6 = vpop.eup %5187 }
 0xf75   : > { %v5190_v54 = vpop.eup %5189  ;;  %v3008_v48 = vadd.f32 1.0, %v5188_v6 }
 0xf76   : > { %v5192_v41 = vpop.eup %5191  ;;  %v3007_v56 = vadd.f32 1.0, %v5190_v54 }
 0xf77   : > { %v5194_v50 = vpop.eup %5193  ;;  %5203 = vrcp.f32 %v3008_v48  ;;  %v3010_v62 = vadd.f32 1.0, %v5192_v41 }
 0xf78   : > { %v5196_v2 = vpop.eup %5195  ;;  %5205 = vrcp.f32 %v3007_v56  ;;  %v3009_v10 = vadd.f32 1.0, %v5194_v50 }
 0xf79   : > { %v5198_v37 = vpop.eup %5197  ;;  %5207 = vrcp.f32 %v3010_v62  ;;  %v3013_v44 = vadd.f32 1.0, %v5196_v2 }
 0xf7a   : > { %v5200_v32 = vpop.eup %5199  ;;  %5209 = vrcp.f32 %v3009_v10  ;;  %v3011_v61 = vadd.f32 1.0, %v5198_v37 }
 0xf7b   : > { %v5202_v11 = vpop.eup %5201  ;;  %5211 = vrcp.f32 %v3013_v44  ;;  %v3014_v13 = vadd.f32 1.0, %v5200_v32 }
 0xf7c   : > { %5213 = vrcp.f32 %v3011_v61  ;;  %v3012_v16 = vadd.f32 1.0, %v5202_v11  ;;  %v3165_v11 = vrot.slane %v6737_v40, 2 }
 0xf7d   : > { %5215 = vrcp.f32 %v3014_v13 }
 0xf7e   : > { %5217 = vrcp.f32 %v3012_v16 }
 0xf81   : > { %v6780_v20 = vpop.eup %5203 }
 0xf82   : > { %v6782_v3 = vpop.eup %5205 }
 0xf83   : > { %v6786_v9 = vpop.eup %5207 }
 0xf84   : > { %v6790_v59 = vpop.eup %5209 }
 0xf85   : > { %v6794_v31 = vpop.eup %5211 }
 0xf86   : > { %v6798_v29 = vpop.eup %5213 }
 0xf87   : > { %v6802_v15 = vpop.eup %5215 }
 0xf88   : > { %v6806_v45 = vpop.eup %5217 }
 0xfd8   : > { %v3034_v30 = vpop.permute.xlu0 %3033  ;;  %v3032_v8 = vpop.permute.xlu1 %3031 }
 0xfd9   : > { %v3056_v12 = vmul.f32 %v6780_v20, %v3034_v30  ;;  %v3055_v1 = vmul.f32 %v6782_v3, %v3032_v8 }
 0xfdb   : > { %3073 = vrot.lane.b32.xlu0 %v3056_v12, %s5551_s23  ;;  %3071 = vrot.lane.b32.xlu1 %v3055_v1, %s5551_s23 }
 0xfdc   : > { %v3038_v0 = vpop.permute.xlu0 %3037  ;;  %v3036_v14 = vpop.permute.xlu1 %3035 }
 0xfdd   : > { %v3058_v17 = vmul.f32 %v6786_v9, %v3038_v0  ;;  %v3057_v55 = vmul.f32 %v6790_v59, %v3036_v14  ;;  %v3206_v0 = vstv %s2884_s20  ;;  %v6847_v14 = vld [vmem:[%s7408_s0] sm:$0xff] }
 0xfde   : > { %vm3207_vm1 = vcmp.lt.s32.totalorder %v3206_v0, %v6847_v14 }
 0xfdf   : > { %3077 = vrot.lane.b32.xlu0 %v3058_v17, %s5551_s23  ;;  %3075 = vrot.lane.b32.xlu1 %v3057_v55, %s5551_s23  ;;  %v3208_v17 = vsel %vm3207_vm1, 1, %v5554_v28 }
 0xfe0   : > { %v3044_v26 = vpop.permute.xlu0 %3043  ;;  %v3040_v24 = vpop.permute.xlu1 %3039 }
 0xfe1   : > { %v3061_v34 = vmul.f32 %v6794_v31, %v3044_v26  ;;  %v3059_v27 = vmul.f32 %v6798_v29, %v3040_v24 }
 0xfe3   : > { %3083 = vrot.lane.b32.xlu0 %v3061_v34, %s5551_s23  ;;  %3079 = vrot.lane.b32.xlu1 %v3059_v27, %s5551_s23 }
 0xfe4   : > { %v3046_v33 = vpop.permute.xlu0 %3045  ;;  %v3042_v60 = vpop.permute.xlu1 %3041 }
 0xfe5   : > { %v3062_v36 = vmul.f32 %v6802_v15, %v3046_v33  ;;  %v3060_v49 = vmul.f32 %v6806_v45, %v3042_v60 }
 0xfe7   : > { %3085 = vrot.lane.b32.xlu0 %v3062_v36, %s5551_s23  ;;  %3081 = vrot.lane.b32.xlu1 %v3060_v49, %s5551_s23 }
 0xfeb   : > { %3168 = vrot.lane.b32.xlu0 %v3160_v5, %s5552_s2  ;;  %3166 = vrot.lane.b32.xlu1 %v3159_v51, %s5552_s2  ;;  %v3111_v51 = vsub.f32 1.0, %v6782_v3 }
 0xfef   : > { %3170 = vrot.lane.b32.xlu0 %v3161_v23, %s5552_s2 }
 0xff3   : > { %3172 = vrot.lane.b32.xlu0 %v3162_v38, %s5552_s2  ;;  %v3113_v38 = vsub.f32 1.0, %v6790_v59 }
 0xff7   : > { %3174 = vrot.lane.b32.xlu0 %v3163_v21, %s5552_s2 }
 0xffb   : > { %3178 = vrot.lane.b32.xlu0 %v3164_v19, %s5552_s2  ;;  %v3112_v19 = vsub.f32 1.0, %v6780_v20 }
0x104d   : > { %v3074_v22 = vpop.permute.xlu0 %3073  ;;  %v3072_v63 = vpop.permute.xlu1 %3071 }
0x104e   : > { %v3096_v58 = vadd.f32 %v3074_v22, %v6002_v43  ;;  %v3095_v2 = vadd.f32 %v3072_v63, %v5984_v52  ;;  %v3114_v63 = vsub.f32 1.0, %v6786_v9 }
0x1050   : > { %5219 = vtanh.f32 %v3096_v58 }
0x1051   : > { %v3078_v25 = vpop.permute.xlu0 %3077  ;;  %v3076_v47 = vpop.permute.xlu1 %3075 }
0x1052   : > { %v3097_v10 = vadd.f32 %v3076_v47, %v6024_v7  ;;  %v3098_v37 = vadd.f32 %v3078_v25, %v6035_v18 }
0x1055   : > { %v3084_v6 = vpop.permute.xlu0 %3083  ;;  %v3080_v54 = vpop.permute.xlu1 %3079 }
0x1056   : > { %v3099_v61 = vadd.f32 %v3080_v54, %v6066_v4  ;;  %v3101_v16 = vadd.f32 %v3084_v6, %v6084_v39  ;;  %v3115_v54 = vsub.f32 1.0, %v6798_v29 }
0x1059   : > { %v3086_v48 = vpop.permute.xlu0 %3085  ;;  %v3082_v41 = vpop.permute.xlu1 %3081 }
0x105a   : > { %v5220_v56 = vpop.eup %5219  ;;  %v3102_v50 = vadd.f32 %v3086_v48, %v6079_v42  ;;  %v3100_v62 = vadd.f32 %v3082_v41, %v6053_v35 }
0x105b   : > { %3129 = vrot.lane.b32.xlu0 %v5220_v56, %s5553_s21 }
0x105c   : > { %5221 = vtanh.f32 %v3102_v50 }
0x105d   : > { %5223 = vtanh.f32 %v3100_v62  ;;  %v3169_v55 = vpop.permute.xlu0 %3168  ;;  %v3167_v34 = vpop.permute.xlu1 %3166 }
0x105e   : > { %5225 = vtanh.f32 %v3095_v2  ;;  %v3190_v25 = vmul.f32 %v6782_v3, %v3167_v34  ;;  %v3191_v56 = vmul.f32 %v6780_v20, %v3169_v55  ;;  %v3117_v3 = vsub.f32 1.0, %v6794_v31 }
0x105f   : > { %5227 = vtanh.f32 %v3097_v10 }
0x1060   : > { %5229 = vtanh.f32 %v3098_v37 }
0x1061   : > { %5231 = vtanh.f32 %v3099_v61  ;;  %v3171_v26 = vpop.permute.xlu0 %3170 }
0x1062   : > { %5233 = vtanh.f32 %v3101_v16  ;;  %v3192_v48 = vmul.f32 %v6790_v59, %v3171_v26  ;;  %v3118_v16 = vsub.f32 1.0, %v6802_v15 }
0x1065   : > { %v3173_v24 = vpop.permute.xlu0 %3172 }
0x1066   : > { %v5222_v44 = vpop.eup %5221  ;;  %v3193_v50 = vmul.f32 %v6786_v9, %v3173_v24 }
0x1067   : > { %v5224_v32 = vpop.eup %5223  ;;  %3141 = vrot.lane.b32.xlu0 %v5222_v44, %s5553_s21 }
0x1068   : > { %3137 = vrot.lane.b32.xlu1 %v5224_v32, %s5553_s21  ;;  %v5226_v13 = vpop.eup %5225 }
0x1069   : > { %v5228_v30 = vpop.eup %5227  ;;  %v3175_v27 = vpop.permute.xlu0 %3174 }
0x106a   : > { %v5230_v8 = vpop.eup %5229  ;;  %v3194_v10 = vmul.f32 %v6798_v29, %v3175_v27  ;;  %v3116_v29 = vsub.f32 1.0, %v6806_v45 }
0x106b   : > { %3180 = vrot.lane.b32.xlu0 %v3165_v11, %s5552_s2  ;;  %v5232_v12 = vpop.eup %5231 }
0x106c   : > { %3127 = vrot.lane.b32.xlu1 %v5226_v13, %s5553_s21  ;;  %v5234_v1 = vpop.eup %5233 }
0x106d   : > { %v3179_v60 = vpop.permute.xlu0 %3178 }
0x106e   : > { %v3196_v9 = vmul.f32 %v6794_v31, %v3179_v60 }
0x1070   : > { %3131 = vrot.lane.b32.xlu1 %v5228_v30, %s5553_s21 }
0x1074   : > { %3133 = vrot.lane.b32.xlu1 %v5230_v8, %s5553_s21 }
0x1078   : > { %3135 = vrot.lane.b32.xlu1 %v5232_v12, %s5553_s21 }
0x107c   : > { %3139 = vrot.lane.b32.xlu1 %v5234_v1, %s5553_s21 }
0x1080   : > { %3176 = vrot.lane.b32.xlu1 %v6737_v40, %s5552_s2 }
0x1084   : > { %3210 = vperm.xlu1 %4946, %v3208_v17  }
0x10cd   : > { %v3130_v49 = vpop.permute.xlu0 %3129 }
0x10ce   : > { %v3152_v47 = vmul.f32 %v3130_v49, %v3112_v19 }
0x10d0   : > { %v3199_v32 = vadd.f32 %v3191_v56, %v3152_v47 }
0x10d2   : > { %v3222_v12 = vrot.slane %v3199_v32, 4 }
0x10d9   : > { %v3142_v23 = vpop.permute.xlu0 %3141 }
0x10da   : > { %v3138_v33 = vpop.permute.xlu1 %3137  ;;  %v3158_v1 = vmul.f32 %v3142_v23, %v3118_v16 }
0x10db   : > { %v3156_v24 = vmul.f32 %v3138_v33, %v3116_v29 }
0x10dd   : > { %v3181_v37 = vpop.permute.xlu0 %3180 }
0x10de   : > { %v3128_v36 = vpop.permute.xlu1 %3127  ;;  %v3197_v59 = vmul.f32 %v6802_v15, %v3181_v37 }
0x10df   : > { %v3151_v22 = vmul.f32 %v3128_v36, %v3111_v51 }
0x10e0   : > { %v3205_v34 = vadd.f32 %v3197_v59, %v3158_v1 }
0x10e1   : > { %v3198_v62 = vadd.f32 %v3190_v25, %v3151_v22 }
0x10e2   : > { %v3132_v5 = vpop.permute.xlu1 %3131  ;;  %v3233_v51 = vrot.slane %v3205_v34, 6 }
0x10e3   : > { %v3153_v58 = vmul.f32 %v3132_v5, %v3113_v38  ;;  %v3221_v30 = vrot.slane %v3198_v62, 5 }
0x10e5   : > { %v3200_v44 = vadd.f32 %v3192_v48, %v3153_v58  ;;  %v3223_v27 = vsel %vm1104_vm11, %v3222_v12, %v3221_v30 }
0x10e6   : > { %v3134_v21 = vpop.permute.xlu1 %3133 }
0x10e7   : > { %v3154_v6 = vmul.f32 %v3134_v21, %v3114_v63  ;;  %v3224_v8 = vrot.slane %v3200_v44, 3 }
0x10e9   : > { %v3201_v61 = vadd.f32 %v3193_v50, %v3154_v6  ;;  %v3225_v15 = vsel %vm1107_vm12, %v3224_v8, %v3223_v27 }
0x10ea   : > { %v3136_v41 = vpop.permute.xlu1 %3135 }
0x10eb   : > { %v3155_v2 = vmul.f32 %v3136_v41, %v3115_v54  ;;  %v3226_v0 = vrot.slane %v3201_v61, 2 }
0x10ed   : > { %v3202_v11 = vadd.f32 %v3194_v10, %v3155_v2  ;;  %v3227_v49 = vsel %vm1110_vm13, %v3226_v0, %v3225_v15 }
0x10ee   : > { %v3140_v13 = vpop.permute.xlu1 %3139 }
0x10ef   : > { %v3157_v20 = vmul.f32 %v3140_v13, %v3117_v3  ;;  %v3228_v17 = vrot.slane %v3202_v11, 1 }
0x10f1   : > { %v3204_v55 = vadd.f32 %v3196_v9, %v3157_v20  ;;  %v3229_v60 = vsel %vm1113_vm14, %v3228_v17, %v3227_v49 }
0x10f2   : > { %v3177_v26 = vpop.permute.xlu1 %3176 }
0x10f3   : > { %v3195_v36 = vmul.f32 %v6806_v45, %v3177_v26  ;;  %v3231_v5 = vrot.slane %v3204_v55, 7 }
0x10f5   : > { %v3203_v31 = vadd.f32 %v3195_v36, %v3156_v24 }
0x10f7   : > { %v3230_v23 = vsel %vm1116_vm15, %v3203_v31, %v3229_v60 }
0x10f8   : > { %v3232_v38 = vsel %vm1119_vm10, %v3231_v5, %v3230_v23 }
0x10f9   : > { %v3234_v33 = vsel %vm1122_vm8, %v3233_v51, %v3232_v38 }
0x10fa   : > { %3235 = vrot.lane.b32.xlu0 %v3234_v33, %s5553_s21 }
0x1103   : > { %v3211_v21 = vpop.permute.xlu1 %3210 }
0x1104   : > { %vm3212_vm7 = vcmp.eq.s32.totalorder %v3211_v21, 1 }
0x116c   : > { %v3236_v45 = vpop.permute.xlu0 %3235 }
0x116d   : > { %v3238_v19 = vsel %vm3212_vm7, %v3236_v45, 0.0  ;;  %v6878_v22 = vsel %vm3212_vm7, %v3236_v45, %v6737_v40 }
0x116e   : > { %v3240_v63 = vcombine.high %v3238_v19, %v3238_v19  ;;  %v3247_v58 = vrot.slane %v3238_v19, %v6191_v53  ;;  %4782 = vmatmul.mubr.msk.f32.vlgmr.msra.gmra.mrb[12].mxu0 %vm452_vm0, %v6878_v22 }
0x1170   : > { %v3254_v25 = vrot.slane %v3240_v63, %v6191_v53  ;;  %v3255_v47 = vcombine.high %v3247_v58, %v3247_v58  ;;  %v3263_v6 = vrot.slane %v3247_v58, %v6191_v53 }
0x1172   : > { %v3256_v54 = vcombine.high %v3254_v25, %v3254_v25  ;;  %v3270_v48 = vrot.slane %v3254_v25, %v6191_v53  ;;  %v3277_v41 = vrot.slane %v3255_v47, %v6191_v53  ;;  %v3285_v56 = vcombine.high %v3263_v6, %v3263_v6  ;;  %3297 = vst.msk [vmem:[#allocation3 + $0x5] sm:$0x1] %vm1186_vm6, %v3263_v6 }
0x1174   : > { %v3284_v40 = vrot.slane %v3256_v54, %v6191_v53  ;;  %v3286_v50 = vcombine.high %v3270_v48, %v3270_v48  ;;  %v3287_v62 = vcombine.high %v3277_v41, %v3277_v41  ;;  %3298 = vst.msk [vmem:[#allocation3 + $0xd] sm:$0x1] %vm1186_vm6, %v3277_v41  ;;  %3299 = vst.msk [vmem:[#allocation3 + $0x15] sm:$0x1] %vm1186_vm6, %v3285_v56 }
0x1175   : > { %3301 = vst.msk [vmem:[#allocation3 + $0x25] sm:$0x1] %vm1186_vm6, %v3270_v48 }
0x1176   : > { %v3288_v2 = vcombine.high %v3284_v40, %v3284_v40  ;;  %3300 = vst.msk [vmem:[#allocation3 + $0x1d] sm:$0x1] %vm1186_vm6, %v3287_v62  ;;  %3302 = vst.msk [vmem:[#allocation3 + $0x2d] sm:$0x1] %vm1186_vm6, %v3284_v40 }
0x1177   : > { %3303 = vst.msk [vmem:[#allocation3 + $0x35] sm:$0x1] %vm1186_vm6, %v3286_v50 }
0x1178   : > { %3304 = vst.msk [vmem:[#allocation3 + $0x3d] sm:$0x1] %vm1186_vm6, %v3288_v2 }
0x1241   : > { %v3377_v10 = vpop.f32.mrb[12].mxu0 }
0x1242   : > { %v3378_v37 = vadd.f32 %v6761_v57, %v3377_v10  ;;  %v4783_v44 = vpop.f32.mrb[13].mxu0 }
0x1244   : > { %v3383_v32 = vrot.slane %v3378_v37, 3  ;;  %v3382_v61 = vrot.slane %v3378_v37, 2  ;;  %v3385_v3 = vrot.slane %v3378_v37, 5  ;;  %v3384_v11 = vrot.slane %v3378_v37, 4 }
0x1245   : > { %v3387_v13 = vrot.slane %v3378_v37, 7  ;;  %v3386_v16 = vrot.slane %v3378_v37, 6  ;;  %v3388_v59 = vrot.slane %v3378_v37, 1  ;;  %v3403_v27 = vadd.f32 %v3378_v37, %v6084_v39 }
0x1246   : > { %3455 = vrot.lane.b32.xlu0 %v3383_v32, %s5551_s23  ;;  %3453 = vrot.lane.b32.xlu1 %v3382_v61, %s5551_s23  ;;  %v3398_v30 = vadd.f32 %v3383_v32, %v6002_v43  ;;  %v3397_v20 = vadd.f32 %v3382_v61, %v5984_v52  ;;  %v3400_v8 = vadd.f32 %v3385_v3, %v6035_v18 }
0x1247   : > { %v3399_v1 = vadd.f32 %v3384_v11, %v6024_v7  ;;  %v3402_v0 = vadd.f32 %v3387_v13, %v6053_v35  ;;  %v3401_v55 = vadd.f32 %v3386_v16, %v6066_v4  ;;  %v3404_v24 = vadd.f32 %v3388_v59, %v6079_v42 }
0x1248   : > { %v4608_v9 = vmul.f32 -1.442695, %v3398_v30  ;;  %v4607_v12 = vmul.f32 -1.442695, %v3397_v20  ;;  %v4610_v29 = vmul.f32 -1.442695, %v3400_v8 }
0x1249   : > { %v4609_v17 = vmul.f32 -1.442695, %v3399_v1  ;;  %v4612_v26 = vmul.f32 -1.442695, %v3402_v0  ;;  %v4611_v34 = vmul.f32 -1.442695, %v3401_v55 }
0x124a   : > { %3459 = vrot.lane.b32.xlu0 %v3385_v3, %s5551_s23  ;;  %3457 = vrot.lane.b32.xlu1 %v3384_v11, %s5551_s23  ;;  %5235 = vpow2.f32 %v4608_v9  ;;  %v4614_v36 = vmul.f32 -1.442695, %v3404_v24  ;;  %v4613_v15 = vmul.f32 -1.442695, %v3403_v27  ;;  %v3581_v0 = vrot.slane %v6878_v22, 2 }
0x124b   : > { %5237 = vpow2.f32 %v4607_v12  ;;  %v3584_v55 = vrot.slane %v6878_v22, 5  ;;  %v3586_v24 = vrot.slane %v6878_v22, 7 }
0x124c   : > { %5239 = vpow2.f32 %v4610_v29  ;;  %v3582_v29 = vrot.slane %v6878_v22, 3 }
0x124d   : > { %5241 = vpow2.f32 %v4609_v17  ;;  %v3583_v17 = vrot.slane %v6878_v22, 4 }
0x124e   : > { %3463 = vrot.lane.b32.xlu0 %v3387_v13, %s5551_s23  ;;  %3461 = vrot.lane.b32.xlu1 %v3386_v16, %s5551_s23  ;;  %5243 = vpow2.f32 %v4612_v26  ;;  %v3585_v26 = vrot.slane %v6878_v22, 6 }
0x124f   : > { %5245 = vpow2.f32 %v4611_v34 }
0x1250   : > { %5247 = vpow2.f32 %v4614_v36 }
0x1251   : > { %5249 = vpow2.f32 %v4613_v15 }
0x1252   : > { %3465 = vrot.lane.b32.xlu0 %v3378_v37, %s5551_s23  ;;  %3467 = vrot.lane.b32.xlu1 %v3388_v59, %s5551_s23 }
0x1254   : > { %v5236_v49 = vpop.eup %5235 }
0x1255   : > { %v5238_v31 = vpop.eup %5237  ;;  %v3430_v60 = vadd.f32 1.0, %v5236_v49 }
0x1256   : > { %v5240_v5 = vpop.eup %5239  ;;  %v3429_v51 = vadd.f32 1.0, %v5238_v31 }
0x1257   : > { %v5242_v23 = vpop.eup %5241  ;;  %5251 = vrcp.f32 %v3430_v60  ;;  %v3432_v38 = vadd.f32 1.0, %v5240_v5 }
0x1258   : > { %v5244_v33 = vpop.eup %5243  ;;  %5253 = vrcp.f32 %v3429_v51  ;;  %v3431_v21 = vadd.f32 1.0, %v5242_v23 }
0x1259   : > { %v5246_v45 = vpop.eup %5245  ;;  %5255 = vrcp.f32 %v3432_v38  ;;  %v3434_v19 = vadd.f32 1.0, %v5244_v33 }
0x125a   : > { %v5248_v63 = vpop.eup %5247  ;;  %5257 = vrcp.f32 %v3431_v21  ;;  %v3433_v58 = vadd.f32 1.0, %v5246_v45 }
0x125b   : > { %v5250_v25 = vpop.eup %5249  ;;  %5259 = vrcp.f32 %v3434_v19  ;;  %v3436_v47 = vadd.f32 1.0, %v5248_v63  ;;  %v3587_v19 = vrot.slane %v6878_v22, 1 }
0x125c   : > { %5261 = vrcp.f32 %v3433_v58  ;;  %v3435_v6 = vadd.f32 1.0, %v5250_v25 }
0x125d   : > { %5263 = vrcp.f32 %v3436_v47 }
0x125e   : > { %5265 = vrcp.f32 %v3435_v6 }
0x1261   : > { %v6913_v54 = vpop.eup %5251 }
0x1262   : > { %v6915_v48 = vpop.eup %5253 }
0x1263   : > { %v6919_v62 = vpop.eup %5255 }
0x1264   : > { %v6923_v2 = vpop.eup %5257 }
0x1265   : > { %v6927_v61 = vpop.eup %5259 }
0x1266   : > { %v6931_v3 = vpop.eup %5261 }
0x1267   : > { %v6935_v30 = vpop.eup %5263 }
0x1268   : > { %v6939_v20 = vpop.eup %5265 }
0x12b8   : > { %v3456_v41 = vpop.permute.xlu0 %3455  ;;  %v3454_v56 = vpop.permute.xlu1 %3453 }
0x12b9   : > { %v3478_v40 = vmul.f32 %v6913_v54, %v3456_v41  ;;  %v3477_v50 = vmul.f32 %v6915_v48, %v3454_v56 }
0x12bb   : > { %3495 = vrot.lane.b32.xlu0 %v3478_v40, %s5551_s23  ;;  %3493 = vrot.lane.b32.xlu1 %v3477_v50, %s5551_s23 }
0x12bc   : > { %v3460_v10 = vpop.permute.xlu0 %3459  ;;  %v3458_v37 = vpop.permute.xlu1 %3457 }
0x12bd   : > { %v3480_v44 = vmul.f32 %v6919_v62, %v3460_v10  ;;  %v3479_v32 = vmul.f32 %v6923_v2, %v3458_v37  ;;  %v3628_v10 = vstv %s3306_s15 }
0x12be   : > { %vm3629_vm1 = vcmp.lt.s32.totalorder %v3628_v10, %v6847_v14 }
0x12bf   : > { %3499 = vrot.lane.b32.xlu0 %v3480_v44, %s5551_s23  ;;  %3497 = vrot.lane.b32.xlu1 %v3479_v32, %s5551_s23  ;;  %v3630_v44 = vsel %vm3629_vm1, 1, %v5554_v28 }
0x12c0   : > { %v3464_v11 = vpop.permute.xlu0 %3463  ;;  %v3462_v13 = vpop.permute.xlu1 %3461 }
0x12c1   : > { %v3482_v16 = vmul.f32 %v6927_v61, %v3464_v11  ;;  %v3481_v59 = vmul.f32 %v6931_v3, %v3462_v13 }
0x12c3   : > { %3503 = vrot.lane.b32.xlu0 %v3482_v16, %s5551_s23  ;;  %3501 = vrot.lane.b32.xlu1 %v3481_v59, %s5551_s23 }
0x12c4   : > { %v3466_v9 = vpop.permute.xlu0 %3465  ;;  %v3468_v8 = vpop.permute.xlu1 %3467 }
0x12c5   : > { %v3483_v12 = vmul.f32 %v6939_v20, %v3466_v9  ;;  %v3484_v1 = vmul.f32 %v6935_v30, %v3468_v8 }
0x12c7   : > { %3505 = vrot.lane.b32.xlu0 %v3483_v12, %s5551_s23  ;;  %3507 = vrot.lane.b32.xlu1 %v3484_v1, %s5551_s23 }
0x12cb   : > { %3590 = vrot.lane.b32.xlu0 %v3582_v29, %s5552_s2  ;;  %3588 = vrot.lane.b32.xlu1 %v3581_v0, %s5552_s2  ;;  %v3534_v0 = vsub.f32 1.0, %v6913_v54 }
0x12cf   : > { %3592 = vrot.lane.b32.xlu0 %v3583_v17, %s5552_s2  ;;  %v3533_v17 = vsub.f32 1.0, %v6915_v48 }
0x12d3   : > { %3594 = vrot.lane.b32.xlu0 %v3584_v55, %s5552_s2  ;;  %v3535_v55 = vsub.f32 1.0, %v6923_v2 }
0x12d7   : > { %3596 = vrot.lane.b32.xlu0 %v3585_v26, %s5552_s2 }
0x12db   : > { %3598 = vrot.lane.b32.xlu0 %v3586_v24, %s5552_s2 }
0x132d   : > { %v3496_v34 = vpop.permute.xlu0 %3495  ;;  %v3494_v27 = vpop.permute.xlu1 %3493 }
0x132e   : > { %v3518_v36 = vadd.f32 %v3496_v34, %v6002_v43  ;;  %v3517_v15 = vadd.f32 %v3494_v27, %v5984_v52  ;;  %v3536_v34 = vsub.f32 1.0, %v6919_v62 }
0x1330   : > { %5267 = vtanh.f32 %v3518_v36 }
0x1331   : > { %5269 = vtanh.f32 %v3517_v15  ;;  %v3498_v49 = vpop.permute.xlu1 %3497  ;;  %v3500_v31 = vpop.permute.xlu0 %3499  ;;  %v3537_v15 = vsub.f32 1.0, %v6931_v3 }
0x1332   : > { %v3519_v60 = vadd.f32 %v3498_v49, %v6024_v7  ;;  %v3520_v5 = vadd.f32 %v3500_v31, %v6035_v18 }
0x1334   : > { %5271 = vtanh.f32 %v3519_v60 }
0x1335   : > { %v3502_v51 = vpop.permute.xlu1 %3501  ;;  %5273 = vtanh.f32 %v3520_v5  ;;  %v3504_v33 = vpop.permute.xlu0 %3503 }
0x1336   : > { %v3521_v23 = vadd.f32 %v3502_v51, %v6066_v4  ;;  %v3522_v45 = vadd.f32 %v3504_v33, %v6053_v35 }
0x1338   : > { %5275 = vtanh.f32 %v3521_v23  ;;  %v3538_v23 = vsub.f32 1.0, %v6927_v61 }
0x1339   : > { %v3508_v63 = vpop.permute.xlu1 %3507  ;;  %5277 = vtanh.f32 %v3522_v45  ;;  %v3506_v47 = vpop.permute.xlu0 %3505 }
0x133a   : > { %v5268_v38 = vpop.eup %5267  ;;  %v3524_v25 = vadd.f32 %v3508_v63, %v6079_v42  ;;  %v3523_v41 = vadd.f32 %v3506_v47, %v6084_v39 }
0x133b   : > { %v5270_v21 = vpop.eup %5269  ;;  %3551 = vrot.lane.b32.xlu0 %v5268_v38, %s5553_s21 }
0x133c   : > { %3549 = vrot.lane.b32.xlu1 %v5270_v21, %s5553_s21  ;;  %5279 = vtanh.f32 %v3524_v25 }
0x133d   : > { %5281 = vtanh.f32 %v3523_v41  ;;  %v3591_v32 = vpop.permute.xlu0 %3590  ;;  %v3589_v16 = vpop.permute.xlu1 %3588 }
0x133e   : > { %v5272_v58 = vpop.eup %5271  ;;  %v3613_v49 = vmul.f32 %v6913_v54, %v3591_v32  ;;  %v3612_v31 = vmul.f32 %v6915_v48, %v3589_v16 }
0x133f   : > { %3602 = vrot.lane.b32.xlu0 %v3587_v19, %s5552_s2  ;;  %v5274_v6 = vpop.eup %5273 }
0x1340   : > { %3553 = vrot.lane.b32.xlu1 %v5272_v58, %s5553_s21 }
0x1341   : > { %v3593_v11 = vpop.permute.xlu0 %3592 }
0x1342   : > { %v5276_v56 = vpop.eup %5275  ;;  %v3614_v5 = vmul.f32 %v6923_v2, %v3593_v11 }
0x1343   : > { %3600 = vrot.lane.b32.xlu0 %v6878_v22, %s5552_s2  ;;  %v5278_v40 = vpop.eup %5277 }
0x1344   : > { %3555 = vrot.lane.b32.xlu1 %v5274_v6, %s5553_s21  ;;  %v3540_v6 = vsub.f32 1.0, %v6935_v30 }
0x1345   : > { %v3595_v13 = vpop.permute.xlu0 %3594 }
0x1346   : > { %v5280_v50 = vpop.eup %5279  ;;  %v3615_v38 = vmul.f32 %v6919_v62, %v3595_v13 }
0x1347   : > { %v5282_v37 = vpop.eup %5281 }
0x1348   : > { %3557 = vrot.lane.b32.xlu1 %v5276_v56, %s5553_s21 }
0x1349   : > { %v3597_v59 = vpop.permute.xlu0 %3596 }
0x134a   : > { %v3616_v63 = vmul.f32 %v6931_v3, %v3597_v59  ;;  %v3539_v3 = vsub.f32 1.0, %v6939_v20 }
0x134c   : > { %3559 = vrot.lane.b32.xlu1 %v5278_v40, %s5553_s21 }
0x134d   : > { %v3599_v12 = vpop.permute.xlu0 %3598 }
0x134e   : > { %v3617_v54 = vmul.f32 %v6927_v61, %v3599_v12 }
0x1350   : > { %3563 = vrot.lane.b32.xlu1 %v5280_v50, %s5553_s21 }
0x1354   : > { %3561 = vrot.lane.b32.xlu1 %v5282_v37, %s5553_s21 }
0x1358   : > { %3632 = vperm.xlu1 %4946, %v3630_v44  }
0x13ad   : > { %v3552_v29 = vpop.permute.xlu0 %3551 }
0x13ae   : > { %v3550_v9 = vpop.permute.xlu1 %3549  ;;  %v3574_v26 = vmul.f32 %v3552_v29, %v3534_v0 }
0x13af   : > { %v3573_v24 = vmul.f32 %v3550_v9, %v3533_v17 }
0x13b0   : > { %v3621_v33 = vadd.f32 %v3613_v49, %v3574_v26 }
0x13b1   : > { %v3620_v21 = vadd.f32 %v3612_v31, %v3573_v24  ;;  %v3603_v45 = vpop.permute.xlu0 %3602 }
0x13b2   : > { %v3554_v8 = vpop.permute.xlu1 %3553  ;;  %v3644_v2 = vrot.slane %v3621_v33, 5  ;;  %v3619_v10 = vmul.f32 %v6935_v30, %v3603_v45 }
0x13b3   : > { %v3575_v36 = vmul.f32 %v3554_v8, %v3535_v55  ;;  %v3643_v41 = vrot.slane %v3620_v21, 6 }
0x13b5   : > { %v3622_v58 = vadd.f32 %v3614_v5, %v3575_v36  ;;  %v3601_v37 = vpop.permute.xlu0 %3600  ;;  %v3645_v11 = vsel %vm1104_vm11, %v3644_v2, %v3643_v41 }
0x13b6   : > { %v3556_v1 = vpop.permute.xlu1 %3555  ;;  %v3618_v9 = vmul.f32 %v6939_v20, %v3601_v37 }
0x13b7   : > { %v3576_v60 = vmul.f32 %v3556_v1, %v3536_v34  ;;  %v3646_v50 = vrot.slane %v3622_v58, 4 }
0x13b9   : > { %v3623_v47 = vadd.f32 %v3615_v38, %v3576_v60  ;;  %v3647_v59 = vsel %vm1107_vm12, %v3646_v50, %v3645_v11 }
0x13ba   : > { %v3558_v27 = vpop.permute.xlu1 %3557 }
0x13bb   : > { %v3577_v51 = vmul.f32 %v3558_v27, %v3537_v15  ;;  %v3648_v44 = vrot.slane %v3623_v47, 3 }
0x13bd   : > { %v3624_v48 = vadd.f32 %v3616_v63, %v3577_v51  ;;  %v3649_v12 = vsel %vm1110_vm13, %v3648_v44, %v3647_v59 }
0x13be   : > { %v3560_v19 = vpop.permute.xlu1 %3559 }
0x13bf   : > { %v3578_v25 = vmul.f32 %v3560_v19, %v3538_v23  ;;  %v3650_v32 = vrot.slane %v3624_v48, 2 }
0x13c1   : > { %v3625_v56 = vadd.f32 %v3617_v54, %v3578_v25  ;;  %v3651_v1 = vsel %vm1113_vm14, %v3650_v32, %v3649_v12 }
0x13c2   : > { %v3564_v40 = vpop.permute.xlu1 %3563 }
0x13c3   : > { %v3580_v62 = vmul.f32 %v3564_v40, %v3540_v6  ;;  %v3652_v61 = vrot.slane %v3625_v56, 1 }
0x13c5   : > { %v3627_v13 = vadd.f32 %v3619_v10, %v3580_v62  ;;  %v3653_v29 = vsel %vm1116_vm15, %v3652_v61, %v3651_v1 }
0x13c6   : > { %v3562_v16 = vpop.permute.xlu1 %3561 }
0x13c7   : > { %v3579_v8 = vmul.f32 %v3562_v16, %v3539_v3  ;;  %v3655_v0 = vrot.slane %v3627_v13, 7 }
0x13c9   : > { %v3626_v30 = vadd.f32 %v3618_v9, %v3579_v8 }
0x13cb   : > { %v3654_v17 = vsel %vm1119_vm10, %v3626_v30, %v3653_v29 }
0x13cc   : > { %v3656_v55 = vsel %vm1122_vm8, %v3655_v0, %v3654_v17 }
0x13cd   : > { %3657 = vrot.lane.b32.xlu0 %v3656_v55, %s5553_s21 }
0x13d7   : > { %v3633_v26 = vpop.permute.xlu1 %3632 }
0x13d8   : > { %vm3634_vm7 = vcmp.eq.s32.totalorder %v3633_v26, 1 }
0x143f   : > { %v3658_v24 = vpop.permute.xlu0 %3657 }
0x1440   : > { %v3660_v34 = vsel %vm3634_vm7, %v3658_v24, 0.0  ;;  %v7006_v20 = vsel %vm3634_vm7, %v3658_v24, %v6878_v22 }
0x1441   : > { %v3662_v27 = vcombine.high %v3660_v34, %v3660_v34  ;;  %v3669_v36 = vrot.slane %v3660_v34, %v6191_v53  ;;  %4793 = vmatmul.mubr.msk.f32.vlgmr.msra.gmra.mrb[8].mxu1 %vm452_vm0, %v7006_v20 }
0x1443   : > { %v3676_v15 = vrot.slane %v3662_v27, %v6191_v53  ;;  %v3677_v49 = vcombine.high %v3669_v36, %v3669_v36  ;;  %v3685_v31 = vrot.slane %v3669_v36, %v6191_v53 }
0x1445   : > { %v3678_v60 = vcombine.high %v3676_v15, %v3676_v15  ;;  %v3692_v5 = vrot.slane %v3676_v15, %v6191_v53  ;;  %v3699_v51 = vrot.slane %v3677_v49, %v6191_v53  ;;  %v3707_v23 = vcombine.high %v3685_v31, %v3685_v31  ;;  %3719 = vst.msk [vmem:[#allocation3 + $0x6] sm:$0x1] %vm1186_vm6, %v3685_v31 }
0x1447   : > { %v3706_v22 = vrot.slane %v3678_v60, %v6191_v53  ;;  %v3708_v38 = vcombine.high %v3692_v5, %v3692_v5  ;;  %v3709_v33 = vcombine.high %v3699_v51, %v3699_v51  ;;  %3720 = vst.msk [vmem:[#allocation3 + $0xe] sm:$0x1] %vm1186_vm6, %v3699_v51  ;;  %3721 = vst.msk [vmem:[#allocation3 + $0x16] sm:$0x1] %vm1186_vm6, %v3707_v23 }
0x1448   : > { %3723 = vst.msk [vmem:[#allocation3 + $0x26] sm:$0x1] %vm1186_vm6, %v3692_v5 }
0x1449   : > { %v3710_v21 = vcombine.high %v3706_v22, %v3706_v22  ;;  %3722 = vst.msk [vmem:[#allocation3 + $0x1e] sm:$0x1] %vm1186_vm6, %v3709_v33  ;;  %3724 = vst.msk [vmem:[#allocation3 + $0x2e] sm:$0x1] %vm1186_vm6, %v3706_v22 }
0x144a   : > { %3725 = vst.msk [vmem:[#allocation3 + $0x36] sm:$0x1] %vm1186_vm6, %v3708_v38 }
0x144b   : > { %3726 = vst.msk [vmem:[#allocation3 + $0x3e] sm:$0x1] %vm1186_vm6, %v3710_v21 }
0x1514   : > { %v3799_v45 = vpop.f32.mrb[8].mxu1 }
0x1515   : > { %v3800_v19 = vadd.f32 %v6761_v57, %v3799_v45  ;;  %v4794_v63 = vpop.f32.mrb[9].mxu1 }
0x1517   : > { %v3805_v58 = vrot.slane %v3800_v19, 2  ;;  %v3804_v25 = vrot.slane %v3800_v19, 1  ;;  %v3807_v54 = vrot.slane %v3800_v19, 4  ;;  %v3806_v47 = vrot.slane %v3800_v19, 3 }
0x1518   : > { %v3809_v48 = vrot.slane %v3800_v19, 6  ;;  %v3808_v6 = vrot.slane %v3800_v19, 5  ;;  %v3810_v57 = vrot.slane %v3800_v19, 7  ;;  %v3826_v13 = vadd.f32 %v3800_v19, %v6079_v42 }
0x1519   : > { %3877 = vrot.lane.b32.xlu0 %v3805_v58, %s5551_s23  ;;  %3875 = vrot.lane.b32.xlu1 %v3804_v25, %s5551_s23  ;;  %v3820_v2 = vadd.f32 %v3805_v58, %v6002_v43  ;;  %v3819_v41 = vadd.f32 %v3804_v25, %v5984_v52  ;;  %v3822_v40 = vadd.f32 %v3807_v54, %v6035_v18 }
0x151a   : > { %v3821_v62 = vadd.f32 %v3806_v47, %v6024_v7  ;;  %v3824_v37 = vadd.f32 %v3809_v48, %v6053_v35  ;;  %v3823_v32 = vadd.f32 %v3808_v6, %v6066_v4  ;;  %v3825_v11 = vadd.f32 %v3810_v57, %v6084_v39 }
0x151b   : > { %v4617_v56 = vmul.f32 -1.442695, %v3820_v2  ;;  %v4616_v50 = vmul.f32 -1.442695, %v3819_v41  ;;  %v4619_v10 = vmul.f32 -1.442695, %v3822_v40 }
0x151c   : > { %v4618_v44 = vmul.f32 -1.442695, %v3821_v62  ;;  %v4621_v3 = vmul.f32 -1.442695, %v3824_v37  ;;  %v4620_v61 = vmul.f32 -1.442695, %v3823_v32 }
0x151d   : > { %3881 = vrot.lane.b32.xlu0 %v3807_v54, %s5551_s23  ;;  %3879 = vrot.lane.b32.xlu1 %v3806_v47, %s5551_s23  ;;  %5283 = vpow2.f32 %v4617_v56  ;;  %v4622_v16 = vmul.f32 -1.442695, %v3825_v11  ;;  %v4623_v59 = vmul.f32 -1.442695, %v3826_v13  ;;  %v4004_v62 = vrot.slane %v7006_v20, 2 }
0x151e   : > { %5285 = vpow2.f32 %v4616_v50  ;;  %v4005_v37 = vrot.slane %v7006_v20, 3  ;;  %v4007_v32 = vrot.slane %v7006_v20, 5 }
0x151f   : > { %5287 = vpow2.f32 %v4619_v10  ;;  %v4003_v10 = vrot.slane %v7006_v20, 1 }
0x1520   : > { %5289 = vpow2.f32 %v4618_v44  ;;  %v4006_v44 = vrot.slane %v7006_v20, 4 }
0x1521   : > { %3885 = vrot.lane.b32.xlu0 %v3809_v48, %s5551_s23  ;;  %3883 = vrot.lane.b32.xlu1 %v3808_v6, %s5551_s23  ;;  %5291 = vpow2.f32 %v4621_v3  ;;  %v4008_v3 = vrot.slane %v7006_v20, 6 }
0x1522   : > { %5293 = vpow2.f32 %v4620_v61 }
0x1523   : > { %5295 = vpow2.f32 %v4622_v16 }
0x1524   : > { %5297 = vpow2.f32 %v4623_v59 }
0x1525   : > { %3889 = vrot.lane.b32.xlu0 %v3800_v19, %s5551_s23  ;;  %3887 = vrot.lane.b32.xlu1 %v3810_v57, %s5551_s23 }
0x1527   : > { %v5284_v9 = vpop.eup %5283 }
0x1528   : > { %v5286_v8 = vpop.eup %5285  ;;  %v3852_v12 = vadd.f32 1.0, %v5284_v9 }
0x1529   : > { %v5288_v1 = vpop.eup %5287  ;;  %v3851_v30 = vadd.f32 1.0, %v5286_v8 }
0x152a   : > { %v5290_v29 = vpop.eup %5289  ;;  %5299 = vrcp.f32 %v3852_v12  ;;  %v3854_v0 = vadd.f32 1.0, %v5288_v1 }
0x152b   : > { %v5292_v17 = vpop.eup %5291  ;;  %5301 = vrcp.f32 %v3851_v30  ;;  %v3853_v55 = vadd.f32 1.0, %v5290_v29 }
0x152c   : > { %v5294_v26 = vpop.eup %5293  ;;  %5303 = vrcp.f32 %v3854_v0  ;;  %v3856_v24 = vadd.f32 1.0, %v5292_v17 }
0x152d   : > { %v5296_v34 = vpop.eup %5295  ;;  %5305 = vrcp.f32 %v3853_v55  ;;  %v3855_v27 = vadd.f32 1.0, %v5294_v26 }
0x152e   : > { %v5298_v36 = vpop.eup %5297  ;;  %5307 = vrcp.f32 %v3856_v24  ;;  %v3857_v15 = vadd.f32 1.0, %v5296_v34 }
0x152f   : > { %5309 = vrcp.f32 %v3855_v27  ;;  %v3858_v49 = vadd.f32 1.0, %v5298_v36 }
0x1530   : > { %5311 = vrcp.f32 %v3857_v15 }
0x1531   : > { %5313 = vrcp.f32 %v3858_v49 }
0x1534   : > { %v7041_v31 = vpop.eup %5299 }
0x1535   : > { %v7043_v60 = vpop.eup %5301 }
0x1536   : > { %v7047_v38 = vpop.eup %5303 }
0x1537   : > { %v7051_v33 = vpop.eup %5305 }
0x1538   : > { %v7055_v58 = vpop.eup %5307 }
0x1539   : > { %v7059_v25 = vpop.eup %5309 }
0x153a   : > { %v7063_v57 = vpop.eup %5311 }
0x153b   : > { %v7067_v2 = vpop.eup %5313 }
0x158b   : > { %v3878_v5 = vpop.permute.xlu0 %3877  ;;  %v3876_v51 = vpop.permute.xlu1 %3875 }
0x158c   : > { %v3900_v23 = vmul.f32 %v7041_v31, %v3878_v5  ;;  %v3899_v22 = vmul.f32 %v7043_v60, %v3876_v51 }
0x158e   : > { %3917 = vrot.lane.b32.xlu0 %v3900_v23, %s5551_s23  ;;  %3915 = vrot.lane.b32.xlu1 %v3899_v22, %s5551_s23 }
0x158f   : > { %v3882_v21 = vpop.permute.xlu0 %3881  ;;  %v3880_v45 = vpop.permute.xlu1 %3879 }
0x1590   : > { %v3902_v19 = vmul.f32 %v7047_v38, %v3882_v21  ;;  %v3901_v63 = vmul.f32 %v7051_v33, %v3880_v45 }
0x1592   : > { %3921 = vrot.lane.b32.xlu0 %v3902_v19, %s5551_s23  ;;  %3919 = vrot.lane.b32.xlu1 %v3901_v63, %s5551_s23  ;;  %v3956_v63 = vsub.f32 1.0, %v7041_v31 }
0x1593   : > { %v3886_v54 = vpop.permute.xlu0 %3885  ;;  %v3884_v47 = vpop.permute.xlu1 %3883 }
0x1594   : > { %v3904_v48 = vmul.f32 %v7055_v58, %v3886_v54  ;;  %v3903_v6 = vmul.f32 %v7059_v25, %v3884_v47  ;;  %v3955_v54 = vsub.f32 1.0, %v7043_v60  ;;  %v3957_v47 = vsub.f32 1.0, %v7051_v33 }
0x1596   : > { %3925 = vrot.lane.b32.xlu0 %v3904_v48, %s5551_s23  ;;  %3923 = vrot.lane.b32.xlu1 %v3903_v6, %s5551_s23 }
0x1597   : > { %v3890_v41 = vpop.permute.xlu0 %3889  ;;  %v3888_v56 = vpop.permute.xlu1 %3887 }
0x1598   : > { %v3906_v40 = vmul.f32 %v7067_v2, %v3890_v41  ;;  %v3905_v50 = vmul.f32 %v7063_v57, %v3888_v56  ;;  %v3959_v56 = vsub.f32 1.0, %v7059_v25 }
0x159a   : > { %3929 = vrot.lane.b32.xlu0 %v3906_v40, %s5551_s23  ;;  %3927 = vrot.lane.b32.xlu1 %v3905_v50, %s5551_s23  ;;  %s3728_s23 = scalar_select %p447_p9, 7, 0 }
0x159c   : > { %v4050_v27 = vstv %s3728_s23 }
0x159d   : > { %vm4051_vm1 = vcmp.lt.s32.totalorder %v4050_v27, %v6847_v14 }
0x159e   : > { %4012 = vrot.lane.b32.xlu0 %v4004_v62, %s5552_s2  ;;  %4010 = vrot.lane.b32.xlu1 %v4003_v10, %s5552_s2 }
0x15a2   : > { %4014 = vrot.lane.b32.xlu0 %v4005_v37, %s5552_s2 }
0x15a6   : > { %4016 = vrot.lane.b32.xlu0 %v4006_v44, %s5552_s2 }
0x15aa   : > { %4018 = vrot.lane.b32.xlu0 %v4007_v32, %s5552_s2 }
0x15ae   : > { %4020 = vrot.lane.b32.xlu0 %v4008_v3, %s5552_s2 }
0x1600   : > { %v3918_v11 = vpop.permute.xlu0 %3917  ;;  %v3916_v61 = vpop.permute.xlu1 %3915 }
0x1601   : > { %v3940_v13 = vadd.f32 %v3918_v11, %v6002_v43  ;;  %v3939_v16 = vadd.f32 %v3916_v61, %v5984_v52  ;;  %v4009_v43 = vrot.slane %v7006_v20, 7 }
0x1603   : > { %5315 = vtanh.f32 %v3940_v13 }
0x1604   : > { %5317 = vtanh.f32 %v3939_v16  ;;  %v3920_v59 = vpop.permute.xlu1 %3919  ;;  %v3922_v9 = vpop.permute.xlu0 %3921  ;;  %v3960_v16 = vsub.f32 1.0, %v7055_v58 }
0x1605   : > { %v3941_v8 = vadd.f32 %v3920_v59, %v6024_v7  ;;  %v3942_v12 = vadd.f32 %v3922_v9, %v6035_v18 }
0x1607   : > { %5319 = vtanh.f32 %v3941_v8 }
0x1608   : > { %v3924_v1 = vpop.permute.xlu1 %3923  ;;  %5321 = vtanh.f32 %v3942_v12  ;;  %v3926_v0 = vpop.permute.xlu0 %3925 }
0x1609   : > { %v3943_v30 = vadd.f32 %v3924_v1, %v6066_v4  ;;  %v3944_v52 = vadd.f32 %v3926_v0, %v6053_v35 }
0x160b   : > { %5323 = vtanh.f32 %v3943_v30 }
0x160c   : > { %v3928_v7 = vpop.permute.xlu1 %3927  ;;  %5325 = vtanh.f32 %v3944_v52  ;;  %v3930_v55 = vpop.permute.xlu0 %3929 }
0x160d   : > { %v5316_v29 = vpop.eup %5315  ;;  %v3945_v4 = vadd.f32 %v3928_v7, %v6084_v39  ;;  %v3946_v35 = vadd.f32 %v3930_v55, %v6079_v42  ;;  %v4052_v42 = vsel %vm4051_vm1, 1, %v5554_v28  ;;  %v3958_v28 = vsub.f32 1.0, %v7047_v38 }
0x160e   : > { %v5318_v17 = vpop.eup %5317  ;;  %3973 = vrot.lane.b32.xlu0 %v5316_v29, %s5553_s21 }
0x160f   : > { %3971 = vrot.lane.b32.xlu1 %v5318_v17, %s5553_s21  ;;  %5327 = vtanh.f32 %v3945_v4 }
0x1610   : > { %5329 = vtanh.f32 %v3946_v35  ;;  %v4013_v15 = vpop.permute.xlu0 %4012  ;;  %v4011_v51 = vpop.permute.xlu1 %4010 }
0x1611   : > { %v5320_v18 = vpop.eup %5319  ;;  %v4035_v40 = vmul.f32 %v7041_v31, %v4013_v15  ;;  %v4034_v50 = vmul.f32 %v7043_v60, %v4011_v51 }
0x1612   : > { %4022 = vrot.lane.b32.xlu0 %v4009_v43, %s5552_s2  ;;  %v5322_v26 = vpop.eup %5321 }
0x1613   : > { %3975 = vrot.lane.b32.xlu1 %v5320_v18, %s5553_s21 }
0x1614   : > { %v4015_v49 = vpop.permute.xlu0 %4014 }
0x1615   : > { %v5324_v24 = vpop.eup %5323  ;;  %v4036_v37 = vmul.f32 %v7051_v33, %v4015_v49 }
0x1616   : > { %4024 = vrot.lane.b32.xlu0 %v7006_v20, %s5552_s2  ;;  %v5326_v34 = vpop.eup %5325  ;;  %s4629_s2 = sshll.u32 %s5533_s27, 7 }
0x1617   : > { %3977 = vrot.lane.b32.xlu1 %v5322_v26, %s5553_s21  ;;  %v3962_v26 = vsub.f32 1.0, %v7067_v2  ;;  %s7138_s10 = scalar_lea.hbm %s7415_s7, %s4629_s2 }
0x1618   : > { %v4017_v5 = vpop.permute.xlu0 %4016 }
0x1619   : > { %v5328_v39 = vpop.eup %5327  ;;  %v4037_v32 = vmul.f32 %v7047_v38, %v4017_v5  ;;  %v3961_v38 = vsub.f32 1.0, %v7063_v57 }
0x161a   : > { %v5330_v36 = vpop.eup %5329 }
0x161b   : > { %3979 = vrot.lane.b32.xlu1 %v5324_v24, %s5553_s21 }
0x161c   : > { %v4019_v23 = vpop.permute.xlu0 %4018 }
0x161d   : > { %v4038_v61 = vmul.f32 %v7059_v25, %v4019_v23 }
0x161f   : > { %3981 = vrot.lane.b32.xlu1 %v5326_v34, %s5553_s21 }
0x1620   : > { %v4021_v21 = vpop.permute.xlu0 %4020 }
0x1621   : > { %v4039_v31 = vmul.f32 %v7055_v58, %v4021_v21 }
0x1623   : > { %3983 = vrot.lane.b32.xlu1 %v5328_v39, %s5553_s21 }
0x1627   : > { %3985 = vrot.lane.b32.xlu1 %v5330_v36, %s5553_s21 }
0x162b   : > { %4054 = vperm.xlu1 %4946, %v4052_v42  }
0x1680   : > { %v3974_v19 = vpop.permute.xlu0 %3973 }
0x1681   : > { %v3972_v22 = vpop.permute.xlu1 %3971  ;;  %v3996_v48 = vmul.f32 %v3974_v19, %v3956_v63 }
0x1682   : > { %v3995_v6 = vmul.f32 %v3972_v22, %v3955_v54 }
0x1683   : > { %v4043_v3 = vadd.f32 %v4035_v40, %v3996_v48 }
0x1684   : > { %v4042_v11 = vadd.f32 %v4034_v50, %v3995_v6  ;;  %v4023_v59 = vpop.permute.xlu0 %4022 }
0x1685   : > { %v3976_v45 = vpop.permute.xlu1 %3975  ;;  %v4066_v1 = vrot.slane %v4043_v3, 6  ;;  %v4040_v25 = vmul.f32 %v7063_v57, %v4023_v59 }
0x1686   : > { %v3997_v41 = vmul.f32 %v3976_v45, %v3957_v47  ;;  %v4065_v30 = vrot.slane %v4042_v11, 7 }
0x1688   : > { %v4044_v13 = vadd.f32 %v4036_v37, %v3997_v41  ;;  %v4067_v7 = vsel %vm1104_vm11, %v4066_v1, %v4065_v30  ;;  %v4025_v18 = vpop.permute.xlu0 %4024 }
0x1689   : > { %v3978_v14 = vpop.permute.xlu1 %3977  ;;  %v4041_v34 = vmul.f32 %v7067_v2, %v4025_v18 }
0x168a   : > { %v3998_v62 = vmul.f32 %v3978_v14, %v3958_v28  ;;  %v4068_v33 = vrot.slane %v4044_v13, 5 }
0x168c   : > { %v4045_v9 = vadd.f32 %v4037_v32, %v3998_v62  ;;  %v4069_v58 = vsel %vm1107_vm12, %v4068_v33, %v4067_v7 }
0x168d   : > { %v3980_v10 = vpop.permute.xlu1 %3979 }
0x168e   : > { %v3999_v44 = vmul.f32 %v3980_v10, %v3959_v56  ;;  %v4070_v0 = vrot.slane %v4045_v9, 4 }
0x1690   : > { %v4046_v60 = vadd.f32 %v4038_v61, %v3999_v44  ;;  %v4071_v35 = vsel %vm1110_vm13, %v4070_v0, %v4069_v58 }
0x1691   : > { %v3982_v8 = vpop.permute.xlu1 %3981 }
0x1692   : > { %v4000_v12 = vmul.f32 %v3982_v8, %v3960_v16  ;;  %v4072_v52 = vrot.slane %v4046_v60, 3 }
0x1694   : > { %v4047_v29 = vadd.f32 %v4039_v31, %v4000_v12  ;;  %v4073_v57 = vsel %vm1113_vm14, %v4072_v52, %v4071_v35 }
0x1695   : > { %v3984_v17 = vpop.permute.xlu1 %3983 }
0x1696   : > { %v4001_v43 = vmul.f32 %v3984_v17, %v3961_v38  ;;  %v4074_v4 = vrot.slane %v4047_v29, 2 }
0x1698   : > { %v4048_v55 = vadd.f32 %v4040_v25, %v4001_v43  ;;  %v4075_v36 = vsel %vm1116_vm15, %v4074_v4, %v4073_v57 }
0x1699   : > { %v3986_v24 = vpop.permute.xlu1 %3985 }
0x169a   : > { %v4076_v39 = vrot.slane %v4048_v55, 1  ;;  %v4002_v27 = vmul.f32 %v3986_v24, %v3962_v26 }
0x169c   : > { %v4049_v42 = vadd.f32 %v4041_v34, %v4002_v27  ;;  %v4077_v15 = vsel %vm1119_vm10, %v4076_v39, %v4075_v36 }
0x169e   : > { %v4078_v49 = vsel %vm1122_vm8, %v4049_v42, %v4077_v15 }
0x169f   : > { %4079 = vrot.lane.b32.xlu0 %v4078_v49, %s5553_s21  ;;  %s4313_s21 = scalar_lea.sflag [#allocation12], %s5807_s22 }
0x16aa   : > { %v4055_v5 = vpop.permute.xlu1 %4054 }
0x16ab   : > { %vm4056_vm11 = vcmp.eq.s32.totalorder %v4055_v5, 1 }
0x1711   : > { %v4080_v2 = vpop.permute.xlu0 %4079 }
0x1712   : > { %v4082_v51 = vsel %vm4056_vm11, %v4080_v2, 0.0  ;;  %v4149_v23 = vsel %vm4056_vm11, %v4080_v2, %v7006_v20 }
0x1713   : > { %v4084_v22 = vcombine.high %v4082_v51, %v4082_v51  ;;  %v4091_v21 = vrot.slane %v4082_v51, %v6191_v53  ;;  %4150 = vst.msk [vmem:[#allocation2] sm:$0xff] %vm452_vm0, %v4149_v23  ;;  %4306 = vst.msk [vmem:[%s434_s8] sm:$0xff] %vm452_vm0, %v4149_v23 }
0x1714   : > { %5436 = shalt.err (!%p5433_p2)
}
0x1715   : > { %s5437_s20 = scalar_lea.hbm %s7138_s10, 128  ;;  %s5441_s15 = scalar_lea.hbm %s7415_s7, 256 }
0x1716   : > { %p5438_p3 = scmp.ne.s32.totalorder %s7138_s10, %s5437_s20  ;;  %p5442_p6 = scmp.lt.u32.totalorder %s7138_s10, %s7415_s7 }
0x1717   : > { %p5443_p7 = scmp.lt.u32.totalorder %s5441_s15, %s5437_s20  ;;  %p5445_p12 = scmp.lt.u32.totalorder %s5437_s20, %s7138_s10 }
0x1718   : > { %p5439_p8 = pnand %p5438_p3, %p7451_p0 }
0x1719   : > { %p5444_p9 = por %p5443_p7, %p5442_p6 }
0x171a   : > { %p5440_p11 = pneg %p5439_p8 }
0x171b   : > { %p5446_p13 = por %p5445_p12, %p5444_p9 }
0x171d   : > { %p5447_p1 = pnand %p5446_p13, %p5440_p11 }
0x171f   : > { %5450 = shalt.err (!%p5447_p1)
}
0x1720   : > { %4860 = dma.vmem_to_hbm [thread:$0]  (%p7451_p0), %s7140_s17, 128, %s7138_s10, %s4313_s21   ;;  %v4098_v20 = vrot.slane %v4084_v22, %v6191_v53  ;;  %v4099_v45 = vcombine.high %v4091_v21, %v4091_v21  ;;  %v4107_v19 = vrot.slane %v4091_v21, %v6191_v53 }
0x1721   : > { %s4539_s2 = sshll.u32 %s5807_s22, 6  ;;  %s4634_s8 = sshll.u32 %s5533_s27, 10 }
0x1722   : > { %v4100_v63 = vcombine.high %v4098_v20, %v4098_v20  ;;  %v4114_v54 = vrot.slane %v4098_v20, %v6191_v53  ;;  %v4121_v14 = vrot.slane %v4099_v45, %v6191_v53  ;;  %v4129_v47 = vcombine.high %v4107_v19, %v4107_v19  ;;  %4141 = vst.msk [vmem:[#allocation3 + $0x7] sm:$0x1] %vm1186_vm6, %v4107_v19  ;;  %s7297_s17 = scalar_lea.vmem [#allocation10], %s4539_s2  ;;  %s7317_s10 = scalar_lea.hbm %s7414_s6, %s4634_s8 }
0x1723   : > { %s4330_s19 = sshll.u32 %s7297_s17, 4  ;;  %s4308_s21 = scalar_lea.sflag [#allocation6], %s5807_s22  ;;  %s7319_s19 = int_to_ptr.vmem [resolvable:$true] %s4330_s19 }
0x1724   : > { %v4128_v48 = vrot.slane %v4100_v63, %v6191_v53  ;;  %v4130_v6 = vcombine.high %v4114_v54, %v4114_v54  ;;  %v4131_v28 = vcombine.high %v4121_v14, %v4121_v14  ;;  %4142 = vst.msk [vmem:[#allocation3 + $0xf] sm:$0x1] %vm1186_vm6, %v4121_v14  ;;  %4143 = vst.msk [vmem:[#allocation3 + $0x17] sm:$0x1] %vm1186_vm6, %v4129_v47  ;;  %s5451_s30 = scalar_lea.vmem %s7319_s19, 1024  ;;  %s5557_s13 = smov [#allocation10]  }
0x1725   : > { %4145 = vst.msk [vmem:[#allocation3 + $0x27] sm:$0x1] %vm1186_vm6, %v4114_v54  ;;  %p5452_p4 = scmp.ne.s32.totalorder %s7319_s19, %s5451_s30  ;;  %s5455_s11 = sshll.u32 %s5557_s13, 4  ;;  %s5456_s11 = int_to_ptr.vmem [resolvable:$false] %s5455_s11 }
0x1726   : > { %v4132_v41 = vcombine.high %v4128_v48, %v4128_v48  ;;  %4144 = vst.msk [vmem:[#allocation3 + $0x1f] sm:$0x1] %vm1186_vm6, %v4131_v28  ;;  %4146 = vst.msk [vmem:[#allocation3 + $0x2f] sm:$0x1] %vm1186_vm6, %v4128_v48  ;;  %s5457_s9 = scalar_lea.vmem %s5456_s11, 2048  ;;  %p5458_p2 = scmp.lt.s32.totalorder %s7319_s19, %s5456_s11 }
0x1727   : > { %4147 = vst.msk [vmem:[#allocation3 + $0x37] sm:$0x1] %vm1186_vm6, %v4130_v6  ;;  %p5453_p10 = pnand %p5452_p4, %p7451_p0  ;;  %p5459_p3 = scmp.lt.s32.totalorder %s5457_s9, %s5451_s30 }
0x1728   : > { %4148 = vst.msk [vmem:[#allocation3 + $0x3f] sm:$0x1] %vm1186_vm6, %v4132_v41 }
0x1729   : > { %v7181_v56 = vld [vmem:[#allocation3] sm:$0xff]  ;;  %p5454_p5 = pneg %p5453_p10  ;;  %p5460_p8 = por %p5459_p3, %p5458_p2 }
0x172a   : > { %v4167_v53 = vrot.slane %v7181_v56, 7  ;;  %v4183_v40 = vrot.slane %v7181_v56, 5  ;;  %v4199_v37 = vrot.slane %v7181_v56, 3  ;;  %v4215_v44 = vrot.slane %v7181_v56, 1 }
0x172b   : > { %v7185_v50 = vld [vmem:[#allocation3 + $0x8] sm:$0xff]  ;;  %v7187_v62 = vld [vmem:[#allocation3 + $0x10] sm:$0xff]  ;;  %p5461_p11 = pnand %p5460_p8, %p5454_p5 }
0x172c   : > { %v7189_v10 = vld [vmem:[#allocation3 + $0x20] sm:$0xff]  ;;  %v4168_v32 = vrot.slane %v7185_v50, 7  ;;  %v4169_v3 = vrot.slane %v7187_v62, 7  ;;  %v4184_v61 = vrot.slane %v7185_v50, 5  ;;  %v4185_v9 = vrot.slane %v7187_v62, 5 }
0x172d   : > { %v4171_v11 = vrot.slane %v7189_v10, 7  ;;  %v7197_v13 = vld [vmem:[#allocation3 + $0x18] sm:$0xff]  ;;  %v7199_v16 = vld [vmem:[#allocation3 + $0x28] sm:$0xff]  ;;  %v4187_v8 = vrot.slane %v7189_v10, 5  ;;  %v4200_v31 = vrot.slane %v7185_v50, 3  ;;  %v4231_v60 = vsel %vm679_vm2, %v4167_v53, %v4183_v40 }
0x172e   : > { %v7201_v59 = vld [vmem:[#allocation3 + $0x30] sm:$0xff]  ;;  %v4170_v12 = vrot.slane %v7197_v13, 7  ;;  %v4172_v1 = vrot.slane %v7199_v16, 7  ;;  %v4186_v33 = vrot.slane %v7197_v13, 5  ;;  %v4188_v38 = vrot.slane %v7199_v16, 5 }
0x172f   : > { %v4173_v30 = vrot.slane %v7201_v59, 7  ;;  %v7215_v29 = vld [vmem:[#allocation3 + $0x38] sm:$0xff]  ;;  %v4189_v0 = vrot.slane %v7201_v59, 5  ;;  %v4201_v17 = vrot.slane %v7187_v62, 3  ;;  %v4202_v25 = vrot.slane %v7197_v13, 3 }
0x1730   : > { %v4174_v52 = vrot.slane %v7215_v29, 7  ;;  %v4190_v43 = vrot.slane %v7215_v29, 5  ;;  %v4203_v7 = vrot.slane %v7189_v10, 3  ;;  %v4204_v18 = vrot.slane %v7199_v16, 3 }
0x1731   : > { %v4205_v4 = vrot.slane %v7201_v59, 3  ;;  %v4206_v58 = vrot.slane %v7215_v29, 3  ;;  %v4216_v55 = vrot.slane %v7185_v50, 1  ;;  %v4217_v26 = vrot.slane %v7187_v62, 1 }
0x1732   : > { %v4218_v35 = vrot.slane %v7197_v13, 1  ;;  %v4219_v24 = vrot.slane %v7189_v10, 1  ;;  %v4220_v34 = vrot.slane %v7199_v16, 1  ;;  %v4221_v57 = vrot.slane %v7201_v59, 1 }
0x1733   : > { %v4222_v39 = vrot.slane %v7215_v29, 1  ;;  %v4232_v27 = vsel %vm679_vm2, %v4168_v32, %v4184_v61  ;;  %v4233_v36 = vsel %vm679_vm2, %v4169_v3, %v4185_v9  ;;  %v4234_v42 = vsel %vm679_vm2, %v4170_v12, %v4186_v33 }
0x1734   : > { %v4235_v15 = vsel %vm679_vm2, %v4171_v11, %v4187_v8  ;;  %v4236_v49 = vsel %vm679_vm2, %v4172_v1, %v4188_v38  ;;  %v4237_v5 = vsel %vm679_vm2, %v4173_v30, %v4189_v0  ;;  %v4238_v2 = vsel %vm679_vm2, %v4174_v52, %v4190_v43 }
0x1735   : > { %v4239_v51 = vsel %vm688_vm3, %v4231_v60, %v4199_v37  ;;  %v4240_v23 = vsel %vm688_vm3, %v4232_v27, %v4200_v31  ;;  %v4241_v22 = vsel %vm688_vm3, %v4233_v36, %v4201_v17  ;;  %v4242_v21 = vsel %vm688_vm3, %v4234_v42, %v4202_v25 }
0x1736   : > { %v4243_v20 = vsel %vm688_vm3, %v4235_v15, %v4203_v7  ;;  %v4244_v45 = vsel %vm688_vm3, %v4236_v49, %v4204_v18  ;;  %v4245_v19 = vsel %vm688_vm3, %v4237_v5, %v4205_v4  ;;  %v4246_v63 = vsel %vm688_vm3, %v4238_v2, %v4206_v58 }
0x1737   : > { %v4247_v54 = vsel %vm697_vm4, %v4239_v51, %v4215_v44  ;;  %v4248_v14 = vsel %vm697_vm4, %v4240_v23, %v4216_v55  ;;  %v4249_v47 = vsel %vm697_vm4, %v4241_v22, %v4217_v26  ;;  %v4250_v48 = vsel %vm697_vm4, %v4242_v21, %v4218_v35 }
0x1738   : > { %v4251_v6 = vsel %vm697_vm4, %v4243_v20, %v4219_v24  ;;  %v4252_v28 = vsel %vm697_vm4, %v4244_v45, %v4220_v34  ;;  %v4253_v41 = vsel %vm697_vm4, %v4245_v19, %v4221_v57  ;;  %v4254_v60 = vsel %vm697_vm4, %v4246_v63, %v4222_v39 }
0x1739   : > { %v4255_v27 = vsel %vm706_vm5, %v4247_v54, %v4167_v53  ;;  %v4256_v36 = vsel %vm706_vm5, %v4248_v14, %v4168_v32  ;;  %v4257_v42 = vsel %vm706_vm5, %v4249_v47, %v4169_v3  ;;  %v4258_v15 = vsel %vm706_vm5, %v4250_v48, %v4170_v12 }
0x173a   : > { %v4259_v49 = vsel %vm706_vm5, %v4251_v6, %v4171_v11  ;;  %v4260_v5 = vsel %vm706_vm5, %v4252_v28, %v4172_v1  ;;  %v4261_v2 = vsel %vm706_vm5, %v4253_v41, %v4173_v30  ;;  %v4262_v51 = vsel %vm706_vm5, %v4254_v60, %v4174_v52 }
0x173b   : > { %vm7452_vm2 = vcmask 1044480   ;;  %vm7460_vm5 = vcmask 1045504  }
0x173c   : > { %v4263_v53 = vsel %vm7452_vm2, %v4255_v27, %v4183_v40  ;;  %vm7453_vm3 = vmmov %vm7452_vm2 }
0x173d   : > { %v4264_v32 = vsel %vm7453_vm3, %v4256_v36, %v4184_v61  ;;  %vm7454_vm4 = vmmov %vm7452_vm2  ;;  %v4271_v40 = vsel %vm7460_vm5, %v4263_v53, %v4199_v37 }
0x173e   : > { %v4265_v3 = vsel %vm7454_vm4, %v4257_v42, %v4185_v9  ;;  %vm7455_vm6 = vmmov %vm7452_vm2  ;;  %vm7468_vm4 = vcmask 1046528  }
0x173f   : > { %v4266_v12 = vsel %vm7455_vm6, %v4258_v15, %v4186_v33  ;;  %vm7456_vm8 = vmmov %vm7452_vm2 }
0x1740   : > { %v4267_v11 = vsel %vm7456_vm8, %v4259_v49, %v4187_v8  ;;  %vm7457_vm12 = vmmov %vm7452_vm2 }
0x1741   : > { %v4268_v1 = vsel %vm7457_vm12, %v4260_v5, %v4188_v38  ;;  %vm7458_vm13 = vmmov %vm7452_vm2 }
0x1742   : > { %v4269_v30 = vsel %vm7458_vm13, %v4261_v2, %v4189_v0  ;;  %vm7459_vm14 = vmmov %vm7452_vm2 }
0x1743   : > { %v4270_v52 = vsel %vm7459_vm14, %v4262_v51, %v4190_v43  ;;  %vm7461_vm15 = vmmov %vm7460_vm5 }
0x1744   : > { %v4272_v61 = vsel %vm7461_vm15, %v4264_v32, %v4200_v31  ;;  %vm7462_vm10 = vmmov %vm7460_vm5  ;;  %v4279_v31 = vsel %vm7468_vm4, %v4271_v40, %v4215_v44 }
0x1745   : > { %v4273_v9 = vsel %vm7462_vm10, %v4265_v3, %v4201_v17  ;;  %vm7463_vm7 = vmmov %vm7460_vm5  ;;  %v4287_v44 = vsel %vm5970_vm9, %v7181_v56, %v4279_v31 }
0x1746   : > { %v4274_v33 = vsel %vm7463_vm7, %v4266_v12, %v4202_v25  ;;  %vm7464_vm1 = vmmov %vm7460_vm5  ;;  %4295 = vst.msk [vmem:[%s7297_s17] sm:$0xff] %vm452_vm0, %v4287_v44 }
0x1747   : > { %v4275_v8 = vsel %vm7464_vm1, %v4267_v11, %v4203_v7  ;;  %vm7465_vm11 = vmmov %vm7464_vm1 }
0x1748   : > { %v4276_v38 = vsel %vm7465_vm11, %v4268_v1, %v4204_v18  ;;  %vm7466_vm2 = vmmov %vm7464_vm1 }
0x1749   : > { %v4277_v0 = vsel %vm7466_vm2, %v4269_v30, %v4205_v4  ;;  %vm7467_vm3 = vmmov %vm7464_vm1 }
0x174a   : > { %v4278_v37 = vsel %vm7467_vm3, %v4270_v52, %v4206_v58  ;;  %vm7469_vm6 = vmmov %vm7468_vm4 }
0x174b   : > { %v4280_v17 = vsel %vm7469_vm6, %v4272_v61, %v4216_v55  ;;  %vm7470_vm8 = vmmov %vm7468_vm4 }
0x174c   : > { %v4281_v25 = vsel %vm7470_vm8, %v4273_v9, %v4217_v26  ;;  %vm7471_vm12 = vmmov %vm7468_vm4  ;;  %v4288_v55 = vsel %vm5970_vm9, %v7185_v50, %v4280_v17 }
0x174d   : > { %v4282_v43 = vsel %vm7471_vm12, %v4274_v33, %v4218_v35  ;;  %vm7472_vm13 = vmmov %vm7468_vm4  ;;  %v4289_v26 = vsel %vm5970_vm9, %v7187_v62, %v4281_v25  ;;  %4296 = vst.msk [vmem:[%s7297_s17 + $0x8] sm:$0xff] %vm452_vm0, %v4288_v55 }
0x174e   : > { %v4283_v7 = vsel %vm7472_vm13, %v4275_v8, %v4219_v24  ;;  %vm7473_vm14 = vmmov %vm7468_vm4  ;;  %v4290_v35 = vsel %vm5970_vm9, %v7197_v13, %v4282_v43  ;;  %4297 = vst.msk [vmem:[%s7297_s17 + $0x10] sm:$0xff] %vm452_vm0, %v4289_v26 }
0x174f   : > { %v4284_v18 = vsel %vm7473_vm14, %v4276_v38, %v4220_v34  ;;  %vm7474_vm5 = vmmov %vm7468_vm4  ;;  %v4291_v56 = vsel %vm5970_vm9, %v7189_v10, %v4283_v7  ;;  %4298 = vst.msk [vmem:[%s7297_s17 + $0x18] sm:$0xff] %vm452_vm0, %v4290_v35 }
0x1750   : > { %v4285_v4 = vsel %vm7474_vm5, %v4277_v0, %v4221_v57  ;;  %vm7475_vm15 = vmmov %vm7468_vm4  ;;  %v4292_v24 = vsel %vm5970_vm9, %v7199_v16, %v4284_v18  ;;  %4299 = vst.msk [vmem:[%s7297_s17 + $0x20] sm:$0xff] %vm452_vm0, %v4291_v56 }
0x1751   : > { %v4286_v58 = vsel %vm7475_vm15, %v4278_v37, %v4222_v39  ;;  %v4293_v50 = vsel %vm5970_vm9, %v7201_v59, %v4285_v4  ;;  %4300 = vst.msk [vmem:[%s7297_s17 + $0x28] sm:$0xff] %vm452_vm0, %v4292_v24 }
0x1752   : > { %v4294_v62 = vsel %vm5970_vm9, %v7215_v29, %v4286_v58  ;;  %4301 = vst.msk [vmem:[%s7297_s17 + $0x30] sm:$0xff] %vm452_vm0, %v4293_v50 }
0x1753   : > { %4302 = vst.msk [vmem:[%s7297_s17 + $0x38] sm:$0xff] %vm452_vm0, %v4294_v62 }
0x1754   : > { %5464 = shalt.err (!%p5461_p11)
}
0x1755   : > { %s5465_s20 = scalar_lea.hbm %s7317_s10, 1024  ;;  %s5469_s15 = scalar_lea.hbm %s7414_s6, 2048 }
0x1756   : > { %p5466_p6 = scmp.ne.s32.totalorder %s7317_s10, %s5465_s20  ;;  %p5470_p12 = scmp.lt.u32.totalorder %s7317_s10, %s7414_s6 }
0x1757   : > { %p5471_p13 = scmp.lt.u32.totalorder %s5469_s15, %s5465_s20  ;;  %p5473_p4 = scmp.lt.u32.totalorder %s5465_s20, %s7317_s10 }
0x1758   : > { %p5467_p7 = pnand %p5466_p6, %p7451_p0 }
0x1759   : > { %p5472_p1 = por %p5471_p13, %p5470_p12 }
0x175a   : > { %p5468_p9 = pneg %p5467_p7 }
0x175b   : > { %p5474_p10 = por %p5473_p4, %p5472_p1 }
0x175d   : > { %p5475_p5 = pnand %p5474_p10, %p5468_p9 }
0x175f   : > { %5478 = shalt.err (!%p5475_p5)
}
0x1760   : > { %s5558_s2 = smov 128   ;;  %s5559_s8 = smov 8  }
0x1761   : > { %4859 = dma.vmem_to_hbm [thread:$0]  (%p7451_p0), %s7319_s19, 1024, %s7317_s10, %s4308_s21, %s5558_s2, %s5558_s2, %s5559_s8  }
0x1762 PF: > { %s4358_s17 = sand.u32 1, %s5521_s24   ;;  %p7476_p2 = scmp.ne.s32.totalorder %s7437_s16, 0 }
0x1763   : > { %p7477_p3 = scmp.ge.s32.totalorder %s5541_s29, 2  ;;  %s4359_s27 = scalar_lea.sflag [#allocation6], %s4358_s17 }
0x1765   : > { %p4874_p8 = pnand %p7477_p3, %p7476_p2 }
0x1767   : > { %5512 = dma.done.wait (!%p4874_p8), %s4359_s27, 1024  }
0x1768   : > { %5514 = vsyncadd (!%p4874_p8), %s4359_s27, 4294966272  ;;  %s4368_s18 = scalar_lea.sflag [#allocation12], %s4358_s17 }
0x1769   : > { %5516 = dma.done.wait (!%p4874_p8), %s4368_s18, 128  }
0x176a   : > { %5518 = vsyncadd (!%p4874_p8), %s4368_s18, 4294967168  ;;  %s30_s29 = sadd.s32 1, %s5541_s29   ;;  %s7478_s14 = sld [smem:[#allocation17_spill]] }
0x176b   : > { %p27_p11 = scmp.ge.s32.totalorder %s30_s29, 4   ;;  %s7479_s26 = sld [smem:[#allocation20_spill]] }
0x176c   : > { %s7480_s27 = sld [smem:[#allocation18_spill]]  ;;  %s7481_s28 = sld [smem:[#allocation19_spill]] }
0x176d   : > { %s7482_s24 = smov %s5525_s25  ;;  %29 = sbr.rel (!%p27_p11) target bundleno = 12 (0xc), region = 144 }
0x1770   : > { %s7483_s25 = smov %s7478_s14 }
0x1774   :  { %4373 = vsyncpa [#allocation5], 1 }
0x1775   :  { %4375 = vsyncpa [#allocation5 + $0x1], 1 }
0x1776   :  { %4376 = vsyncpa [#allocation8], 1 }
0x1777   :  { %4378 = vsyncpa [#allocation8 + $0x1], 1 }
0x1778   :  { %4379 = vsyncpa [#allocation6], 1 }
0x1779   :  { %4381 = vsyncpa [#allocation6 + $0x1], 1 }
0x177a   :  { %4382 = vsyncpa [#allocation12], 1 }
0x177b   :  { %4384 = vsyncpa [#allocation12 + $0x1], 1 }

</bundles_post_ra>
